<compile_context>
chip_gen: v7x
topology: tpu7x:2x2x1
jax: 0.10.0
libtpu: 0.0.40
codegen_flags: <defaults>
</compile_context>

<pallas_src>
import math

import numpy as np
import jax
import jax.numpy as jnp
from jax.experimental import pallas as pl
from jax.experimental.pallas import tpu as pltpu

# ------------------------- model / test configuration -----------------------
B = 2        # batch
T = 8        # tgt_len
S = 16       # src_len
D = 32       # d_model
H = 4        # heads
DH = D // H  # dim per head
DFF = 64     # d_ff
L = 2        # num_layers
VOCAB = 50
PAD = 0      # padding_idx
EPS = 1e-6
NEG = -1e30  # finite "minus infinity" for additive masks


# ------------------------------ Pallas kernel --------------------------------
def _decoder_stack_kernel(
        x0_ref, mem_ref, dmask_ref, smask_ref,
        ln1g_ref, ln1b_ref,
        swq_ref, sbq_ref, swk_ref, sbk_ref, swv_ref, sbv_ref, swo_ref, sbo_ref,
        ln2g_ref, ln2b_ref,
        cwq_ref, cbq_ref, cwk_ref, cbk_ref, cwv_ref, cbv_ref, cwo_ref, cbo_ref,
        lnfg_ref, lnfb_ref, w1_ref, b1_ref, w2_ref, b2_ref,
        fing_ref, finb_ref,
        out_ref, attn_ref, allin_ref):
    """All L decoder layers + final LayerNorm, whole batch, one invocation.

    Shapes:
      x0_ref    [B*T, D]          embeddings + positional encoding
      mem_ref   [B*S, D]          memory bank (flattened)
      dmask_ref [B, T, T]         additive self-attn mask (-1e30 / 0)
      smask_ref [B, T, S]         additive cross-attn mask
      stacked params: leading axis L; wq/bq pre-scaled by 1/sqrt(DH)
      out_ref   [B*T, D]          final (post-LN) output
      attn_ref  [L, B, T, H*S]    cross-attn weights, heads packed on lanes
      allin_ref [L, B*T, D]       saved all_input (= ln1(x)) per layer
    """
    x = x0_ref[...]          # [BT, D]
    mem = mem_ref[...]       # [BS, D]
    dmask = dmask_ref[...]   # [B, T, T]
    smask = smask_ref[...]   # [B, T, S]

    def ln(v, g, b):
        mu = jnp.mean(v, axis=-1, keepdims=True)
        var = jnp.mean(jnp.square(v - mu), axis=-1, keepdims=True)
        return (v - mu) * jax.lax.rsqrt(var + EPS) * g + b

    def mha(qin, kin, vin, add_mask, tk,
            wq, bq, wk, bk, wv, bv, wo, bo, want_attn):
        # qin [B*T, D]; kin/vin [B*tk, D]; wq/bq already scaled by 1/sqrt(DH)
        q = jnp.dot(qin, wq, preferred_element_type=jnp.float32) + bq
        k = jnp.dot(kin, wk, preferred_element_type=jnp.float32) + bk
        v = jnp.dot(vin, wv, preferred_element_type=jnp.float32) + bv
        ctxs, attns = [], []
        for h in range(H):
            hs = slice(h * DH, (h + 1) * DH)
            qh = q[:, hs].reshape(B, T, DH)
            kh = k[:, hs].reshape(B, tk, DH)
            vh = v[:, hs].reshape(B, tk, DH)
            s = jnp.einsum('bqd,bkd->bqk', qh, kh,
                           preferred_element_type=jnp.float32) + add_mask
            m = jnp.max(s, axis=-1, keepdims=True)
            e = jnp.exp(s - m)
            a = e / jnp.sum(e, axis=-1, keepdims=True)
            if want_attn:
                attns.append(a)
            ctxs.append(jnp.einsum('bqk,bkd->bqd', a, vh,
                                   preferred_element_type=jnp.float32))
        ctx = jnp.concatenate(ctxs, axis=-1).reshape(B * T, D)
        out = jnp.dot(ctx, wo, preferred_element_type=jnp.float32) + bo
        attn_cat = jnp.concatenate(attns, axis=-1) if want_attn else None
        return out, attn_cat

    c = math.sqrt(2.0 / math.pi)
    for l in range(L):                                   # unrolled (L small)
        # --- self-attention block -------------------------------------------
        x_norm = ln(x, ln1g_ref[l], ln1b_ref[l])
        allin_ref[l] = x_norm                            # all_input = ln1(x)
        self_out, _ = mha(x_norm, x_norm, x_norm, dmask, T,
                          swq_ref[l], sbq_ref[l], swk_ref[l], sbk_ref[l],
                          swv_ref[l], sbv_ref[l], swo_ref[l], sbo_ref[l],
                          want_attn=False)
        query = self_out + x

        # --- context (cross) attention block --------------------------------
        qn = ln(query, ln2g_ref[l], ln2b_ref[l])
        mid, cattn = mha(qn, mem, mem, smask, S,
                         cwq_ref[l], cbq_ref[l], cwk_ref[l], cbk_ref[l],
                         cwv_ref[l], cbv_ref[l], cwo_ref[l], cbo_ref[l],
                         want_attn=True)
        attn_ref[l] = cattn                              # [B, T, H*S]
        y = mid + query

        # --- position-wise feed forward (gelu_new) ---------------------------
        yn = ln(y, lnfg_ref[l], lnfb_ref[l])
        h1 = jnp.dot(yn, w1_ref[l], preferred_element_type=jnp.float32) + b1_ref[l]
        h1 = 0.5 * h1 * (1.0 + jnp.tanh(c * (h1 + 0.044715 * h1 * h1 * h1)))
        x = jnp.dot(h1, w2_ref[l], preferred_element_type=jnp.float32) + b2_ref[l] + y

    # final LayerNorm of the decoder stack
    out_ref[...] = ln(x, fing_ref[...], finb_ref[...])


def decoder_stack_pallas(x0, mem_flat, dmask, smask, stacked_params,
                         final_g, final_b):
    out_shape = (
        jax.ShapeDtypeStruct((B * T, D), jnp.float32),        # output
        jax.ShapeDtypeStruct((L, B, T, H * S), jnp.float32),  # cross attn
        jax.ShapeDtypeStruct((L, B * T, D), jnp.float32),     # saved inputs
    )
    return pl.pallas_call(
        _decoder_stack_kernel,
        out_shape=out_shape,
        compiler_params=pltpu.CompilerParams(vmem_limit_bytes=32 * 1024 * 1024),
    )(x0, mem_flat, dmask, smask, *stacked_params, final_g, final_b)


# ------------------------------ JAX glue / wrapper ---------------------------
def make_positional_encoding(max_len, dim):
    pe = np.zeros((max_len, dim), dtype=np.float32)
    position = np.arange(0, max_len, dtype=np.float32)[:, None]
    div_term = np.exp(np.arange(0, dim, 2, dtype=np.float32)
                      * -(math.log(10000.0) / dim))
    pe[:, 0::2] = np.sin(position * div_term)
    pe[:, 1::2] = np.cos(position * div_term)
    return jnp.asarray(pe)


def build_bool_masks(tgt, src):
    pad_t = (tgt == PAD)                                        # [B, T]
    causal = jnp.triu(jnp.ones((T, T), jnp.bool_), k=1)          # [T, T]
    dmask = pad_t[:, None, :] | causal[None, :, :]               # [B, T, T]
    pad_s = (src == PAD)                                         # [B, S]
    smask = jnp.broadcast_to(pad_s[:, None, :], (B, T, S))       # [B, T, S]
    return dmask, smask


def build_additive_masks(tgt, src):
    dmask_b, smask_b = build_bool_masks(tgt, src)
    dmask = jnp.where(dmask_b, jnp.float32(NEG), jnp.float32(0.0))
    smask = jnp.where(smask_b, jnp.float32(NEG), jnp.float32(0.0))
    return dmask, smask


def prepare_stacked_params(layer_params):
    """Stack per-layer params along L; fold 1/sqrt(DH) into query W/b."""
    scale = 1.0 / math.sqrt(DH)
    scaled_idx = (2, 3, 12, 13)      # self wq/bq, context wq/bq
    stacked = []
    for i in range(26):
        arrs = [p[i] for p in layer_params]
        if i in scaled_idx:
            arrs = [a * scale for a in arrs]
        stacked.append(jnp.stack(arrs, axis=0))
    return stacked


def transformer_decoder_forward(tgt, src, memory_bank,
                                emb_table, pe, layer_params, final_g, final_b):
    """Mirrors TransformerDecoder.forward (state.cache=None, step=None)."""
    emb = emb_table[tgt]                                   # [B, T, D] gather
    x0 = (emb * math.sqrt(D) + pe[None, :T, :]).reshape(B * T, D)
    dmask, smask = build_additive_masks(tgt, src)
    mem_flat = memory_bank.reshape(B * S, D)
    stacked = prepare_stacked_params(layer_params)

    out_flat, attn_cat, allin = decoder_stack_pallas(
        x0, mem_flat, dmask, smask, stacked, final_g, final_b)

    output = out_flat.reshape(B, T, D)
    # kernel stores attn lane-dense as [L, B, T, H*S]; restore [B, H, T, S]
    attns = [attn_cat[l].reshape(B, T, H, S).transpose(0, 2, 1, 3)
             for l in range(L)]
    saved_inputs = allin.reshape(L, B, T, D)
    return output, attns, saved_inputs


# ------------------------------ pure-JAX reference ---------------------------
def _ref_ln(x, g, b):
    mu = x.mean(-1, keepdims=True)
    var = ((x - mu) ** 2).mean(-1, keepdims=True)
    return (x - mu) / jnp.sqrt(var + EPS) * g + b


def _ref_mha(qin, kin, vin, mask, wq, bq, wk, bk, wv, bv, wo, bo):
    Tq, Tk = qin.shape[1], kin.shape[1]
    q = qin @ wq + bq
    k = kin @ wk + bk
    v = vin @ wv + bv
    qh = q.reshape(B, Tq, H, DH).transpose(0, 2, 1, 3) / math.sqrt(DH)
    kh = k.reshape(B, Tk, H, DH).transpose(0, 2, 1, 3)
    vh = v.reshape(B, Tk, H, DH).transpose(0, 2, 1, 3)
    s = jnp.einsum('bhtd,bhsd->bhts', qh, kh)
    s = jnp.where(mask[:, None], -jnp.inf, s)
    a = jax.nn.softmax(s, axis=-1)
    ctx = jnp.einsum('bhts,bhsd->bhtd', a, vh).transpose(0, 2, 1, 3)
    ctx = ctx.reshape(B, Tq, D)
    return ctx @ wo + bo, a


def _gelu_new(x):
    return 0.5 * x * (1.0 + jnp.tanh(
        math.sqrt(2.0 / math.pi) * (x + 0.044715 * x ** 3)))


def ref_decoder(tgt, src, memory_bank, emb_table, pe, layer_params,
                final_g, final_b):
    out = emb_table[tgt] * math.sqrt(D) + pe[None, :T, :]
    dmask, smask = build_bool_masks(tgt, src)
    attns = []
    for p in layer_params:
        (ln1g, ln1b, swq, sbq, swk, sbk, swv, sbv, swo, sbo,
         ln2g, ln2b, cwq, cbq, cwk, cbk, cwv, cbv, cwo, cbo,
         lnfg, lnfb, w1, b1, w2, b2) = p
        xn = _ref_ln(out, ln1g, ln1b)
        self_out, _ = _ref_mha(xn, xn, xn, dmask,
                               swq, sbq, swk, sbk, swv, sbv, swo, sbo)
        query = self_out + out
        qn = _ref_ln(query, ln2g, ln2b)
        mid, a = _ref_mha(qn, memory_bank, memory_bank, smask,
                          cwq, cbq, cwk, cbk, cwv, cbv, cwo, cbo)
        attns.append(a)
        y = mid + query
        yn = _ref_ln(y, lnfg, lnfb)
        out = _gelu_new(yn @ w1 + b1) @ w2 + b2 + y
    return _ref_ln(out, final_g, final_b), attns


# ------------------------------ parameter init -------------------------------
def init_params(key):
    def nrm(k, shape, scale=0.05):
        return scale * jax.random.normal(k, shape, jnp.float32)

    keys = iter(jax.random.split(key, 4 + L * 32))
    emb_table = nrm(next(keys), (VOCAB, D), 0.1)
    emb_table = emb_table.at[PAD].set(0.0)        # padding_idx row zeroed

    layer_params = []
    for _ in range(L):
        def lnp():
            return (1.0 + nrm(next(keys), (1, D), 0.1), nrm(next(keys), (1, D), 0.1))
        ln1g, ln1b = lnp()
        attn_s = []
        for _w in range(4):
            attn_s += [nrm(next(keys), (D, D)), nrm(next(keys), (1, D))]
        ln2g, ln2b = lnp()
        attn_c = []
        for _w in range(4):
            attn_c += [nrm(next(keys), (D, D)), nrm(next(keys), (1, D))]
        lnfg, lnfb = lnp()
        w1 = nrm(next(keys), (D, DFF));  b1 = nrm(next(keys), (1, DFF))
        w2 = nrm(next(keys), (DFF, D));  b2 = nrm(next(keys), (1, D))
        layer_params.append(tuple(
            [ln1g, ln1b] + attn_s + [ln2g, ln2b] + attn_c
            + [lnfg, lnfb, w1, b1, w2, b2]))
    final_g = 1.0 + nrm(next(keys), (1, D), 0.1)
    final_b = nrm(next(keys), (1, D), 0.1)
    return emb_table, layer_params, final_g, final_b


# ----------------------------------- main ------------------------------------
if __name__ == "__main__":
    key = jax.random.PRNGKey(0)
    k_tgt, k_src, k_mem, k_par = jax.random.split(key, 4)

    # token ids (0 == padding_idx); trailing pads exercise the pad masks
    tgt = jax.random.randint(k_tgt, (B, T), 1, VOCAB, dtype=jnp.int32)
    tgt = tgt.at[1, T - 2:].set(PAD)
    src = jax.random.randint(k_src, (B, S), 1, VOCAB, dtype=jnp.int32)
    src = src.at[0, S - 3:].set(PAD)
    memory_bank = jax.random.normal(k_mem, (B, S, D), jnp.float32)

    emb_table, layer_params, final_g, final_b = init_params(k_par)
    pe = make_positional_encoding(64, D)

    out, attns, saved_inputs = transformer_decoder_forward(
        tgt, src, memory_bank, emb_table, pe, layer_params, final_g, final_b)
    out = jax.block_until_ready(out)

    # correctness check against a pure-JAX reference
    ref_out, ref_attns = ref_decoder(
        tgt, src, memory_bank, emb_table, pe, layer_params, final_g, final_b)
    np.testing.assert_allclose(np.asarray(out), np.asarray(ref_out),
                               rtol=2e-3, atol=2e-3)
    for a, ra in zip(attns, ref_attns):
        np.testing.assert_allclose(np.asarray(a), np.asarray(ra),
                                   rtol=2e-3, atol=2e-3)
    assert saved_inputs.shape == (L, B, T, D)

    print("KERNEL_OK")
</pallas_src>

<mosaic_0001>
module attributes {stable_mosaic.version = 11 : i64} {
  func.func @_decoder_stack_kernel(%arg0: memref<16x32xf32, #tpu.memory_space<vmem>>, %arg1: memref<32x32xf32, #tpu.memory_space<vmem>>, %arg2: memref<2x8x8xf32, #tpu.memory_space<vmem>>, %arg3: memref<2x8x16xf32, #tpu.memory_space<vmem>>, %arg4: memref<2x1x32xf32, #tpu.memory_space<vmem>>, %arg5: memref<2x1x32xf32, #tpu.memory_space<vmem>>, %arg6: memref<2x32x32xf32, #tpu.memory_space<vmem>>, %arg7: memref<2x1x32xf32, #tpu.memory_space<vmem>>, %arg8: memref<2x32x32xf32, #tpu.memory_space<vmem>>, %arg9: memref<2x1x32xf32, #tpu.memory_space<vmem>>, %arg10: memref<2x32x32xf32, #tpu.memory_space<vmem>>, %arg11: memref<2x1x32xf32, #tpu.memory_space<vmem>>, %arg12: memref<2x32x32xf32, #tpu.memory_space<vmem>>, %arg13: memref<2x1x32xf32, #tpu.memory_space<vmem>>, %arg14: memref<2x1x32xf32, #tpu.memory_space<vmem>>, %arg15: memref<2x1x32xf32, #tpu.memory_space<vmem>>, %arg16: memref<2x32x32xf32, #tpu.memory_space<vmem>>, %arg17: memref<2x1x32xf32, #tpu.memory_space<vmem>>, %arg18: memref<2x32x32xf32, #tpu.memory_space<vmem>>, %arg19: memref<2x1x32xf32, #tpu.memory_space<vmem>>, %arg20: memref<2x32x32xf32, #tpu.memory_space<vmem>>, %arg21: memref<2x1x32xf32, #tpu.memory_space<vmem>>, %arg22: memref<2x32x32xf32, #tpu.memory_space<vmem>>, %arg23: memref<2x1x32xf32, #tpu.memory_space<vmem>>, %arg24: memref<2x1x32xf32, #tpu.memory_space<vmem>>, %arg25: memref<2x1x32xf32, #tpu.memory_space<vmem>>, %arg26: memref<2x32x64xf32, #tpu.memory_space<vmem>>, %arg27: memref<2x1x64xf32, #tpu.memory_space<vmem>>, %arg28: memref<2x64x32xf32, #tpu.memory_space<vmem>>, %arg29: memref<2x1x32xf32, #tpu.memory_space<vmem>>, %arg30: memref<1x32xf32, #tpu.memory_space<vmem>>, %arg31: memref<1x32xf32, #tpu.memory_space<vmem>>, %arg32: memref<16x32xf32, #tpu.memory_space<vmem>>, %arg33: memref<2x2x8x64xf32, #tpu.memory_space<vmem>>, %arg34: memref<2x16x32xf32, #tpu.memory_space<vmem>>) attributes {dimension_semantics = [], scalar_prefetch = 0 : i64, scratch_operands = 0 : i64, tpu.core_type = #tpu.core_type<tc>} {
    %c0 = arith.constant 0 : index
    %c0_0 = arith.constant 0 : index
    %0 = vector.load %arg0[%c0, %c0_0] : memref<16x32xf32, #tpu.memory_space<vmem>>, vector<16x32xf32>
    %c0_1 = arith.constant 0 : index
    %c0_2 = arith.constant 0 : index
    %1 = vector.load %arg1[%c0_1, %c0_2] : memref<32x32xf32, #tpu.memory_space<vmem>>, vector<32x32xf32>
    %c0_3 = arith.constant 0 : index
    %c0_4 = arith.constant 0 : index
    %c0_5 = arith.constant 0 : index
    %2 = vector.load %arg2[%c0_3, %c0_4, %c0_5] : memref<2x8x8xf32, #tpu.memory_space<vmem>>, vector<2x8x8xf32>
    %c0_6 = arith.constant 0 : index
    %c0_7 = arith.constant 0 : index
    %c0_8 = arith.constant 0 : index
    %3 = vector.load %arg3[%c0_6, %c0_7, %c0_8] : memref<2x8x16xf32, #tpu.memory_space<vmem>>, vector<2x8x16xf32>
    %c0_9 = arith.constant 0 : index
    %c0_10 = arith.constant 0 : index
    %c0_11 = arith.constant 0 : index
    %4 = vector.load %arg4[%c0_9, %c0_10, %c0_11] : memref<2x1x32xf32, #tpu.memory_space<vmem>>, vector<1x1x32xf32>
    %5 = vector.shape_cast %4 : vector<1x1x32xf32> to vector<1x32xf32>
    %c0_12 = arith.constant 0 : index
    %c0_13 = arith.constant 0 : index
    %c0_14 = arith.constant 0 : index
    %6 = vector.load %arg5[%c0_12, %c0_13, %c0_14] : memref<2x1x32xf32, #tpu.memory_space<vmem>>, vector<1x1x32xf32>
    %7 = vector.shape_cast %6 : vector<1x1x32xf32> to vector<1x32xf32>
    %cst = arith.constant dense<0.000000e+00> : vector<16xf32>
    %8 = vector.multi_reduction <add>, %0, %cst [1] : vector<16x32xf32> to vector<16xf32>
    %9 = vector.shape_cast %8 : vector<16xf32> to vector<16x1xf32>
    %cst_15 = arith.constant 3.200000e+01 : f32
    %10 = vector.broadcast %cst_15 : f32 to vector<16x1xf32>
    %11 = arith.divf %9, %10 : vector<16x1xf32>
    %12 = vector.broadcast %11 : vector<16x1xf32> to vector<16x32xf32>
    %13 = arith.subf %0, %12 : vector<16x32xf32>
    %14 = arith.mulf %13, %13 : vector<16x32xf32>
    %cst_16 = arith.constant dense<0.000000e+00> : vector<16xf32>
    %15 = vector.multi_reduction <add>, %14, %cst_16 [1] : vector<16x32xf32> to vector<16xf32>
    %16 = vector.shape_cast %15 : vector<16xf32> to vector<16x1xf32>
    %cst_17 = arith.constant 3.200000e+01 : f32
    %17 = vector.broadcast %cst_17 : f32 to vector<16x1xf32>
    %18 = arith.divf %16, %17 : vector<16x1xf32>
    %19 = vector.broadcast %11 : vector<16x1xf32> to vector<16x32xf32>
    %20 = arith.subf %0, %19 : vector<16x32xf32>
    %cst_18 = arith.constant 9.99999997E-7 : f32
    %21 = vector.broadcast %cst_18 : f32 to vector<16x1xf32>
    %22 = arith.addf %18, %21 : vector<16x1xf32>
    %23 = math.rsqrt %22 : vector<16x1xf32>
    %24 = vector.broadcast %23 : vector<16x1xf32> to vector<16x32xf32>
    %25 = arith.mulf %20, %24 : vector<16x32xf32>
    %26 = vector.broadcast %5 : vector<1x32xf32> to vector<16x32xf32>
    %27 = arith.mulf %25, %26 : vector<16x32xf32>
    %28 = vector.broadcast %7 : vector<1x32xf32> to vector<16x32xf32>
    %29 = arith.addf %27, %28 : vector<16x32xf32>
    %c0_19 = arith.constant 0 : index
    %c0_20 = arith.constant 0 : index
    %c0_21 = arith.constant 0 : index
    %30 = vector.load %arg34[%c0_19, %c0_20, %c0_21] : memref<2x16x32xf32, #tpu.memory_space<vmem>>, vector<1x16x32xf32>
    %31 = vector.shape_cast %30 : vector<1x16x32xf32> to vector<16x32xf32>
    %32 = vector.shape_cast %29 : vector<16x32xf32> to vector<1x16x32xf32>
    tpu.vector_store %arg34[%c0_19, %c0_20, %c0_21], %32 {strides = array<i32>} : memref<2x16x32xf32, #tpu.memory_space<vmem>>, vector<1x16x32xf32>,
    %c0_22 = arith.constant 0 : index
    %c0_23 = arith.constant 0 : index
    %c0_24 = arith.constant 0 : index
    %33 = vector.load %arg6[%c0_22, %c0_23, %c0_24] : memref<2x32x32xf32, #tpu.memory_space<vmem>>, vector<1x32x32xf32>
    %34 = vector.shape_cast %33 : vector<1x32x32xf32> to vector<32x32xf32>
    %c0_25 = arith.constant 0 : index
    %c0_26 = arith.constant 0 : index
    %c0_27 = arith.constant 0 : index
    %35 = vector.load %arg7[%c0_25, %c0_26, %c0_27] : memref<2x1x32xf32, #tpu.memory_space<vmem>>, vector<1x1x32xf32>
    %36 = vector.shape_cast %35 : vector<1x1x32xf32> to vector<1x32xf32>
    %c0_28 = arith.constant 0 : index
    %c0_29 = arith.constant 0 : index
    %c0_30 = arith.constant 0 : index
    %37 = vector.load %arg8[%c0_28, %c0_29, %c0_30] : memref<2x32x32xf32, #tpu.memory_space<vmem>>, vector<1x32x32xf32>
    %38 = vector.shape_cast %37 : vector<1x32x32xf32> to vector<32x32xf32>
    %c0_31 = arith.constant 0 : index
    %c0_32 = arith.constant 0 : index
    %c0_33 = arith.constant 0 : index
    %39 = vector.load %arg9[%c0_31, %c0_32, %c0_33] : memref<2x1x32xf32, #tpu.memory_space<vmem>>, vector<1x1x32xf32>
    %40 = vector.shape_cast %39 : vector<1x1x32xf32> to vector<1x32xf32>
    %c0_34 = arith.constant 0 : index
    %c0_35 = arith.constant 0 : index
    %c0_36 = arith.constant 0 : index
    %41 = vector.load %arg10[%c0_34, %c0_35, %c0_36] : memref<2x32x32xf32, #tpu.memory_space<vmem>>, vector<1x32x32xf32>
    %42 = vector.shape_cast %41 : vector<1x32x32xf32> to vector<32x32xf32>
    %c0_37 = arith.constant 0 : index
    %c0_38 = arith.constant 0 : index
    %c0_39 = arith.constant 0 : index
    %43 = vector.load %arg11[%c0_37, %c0_38, %c0_39] : memref<2x1x32xf32, #tpu.memory_space<vmem>>, vector<1x1x32xf32>
    %44 = vector.shape_cast %43 : vector<1x1x32xf32> to vector<1x32xf32>
    %c0_40 = arith.constant 0 : index
    %c0_41 = arith.constant 0 : index
    %c0_42 = arith.constant 0 : index
    %45 = vector.load %arg12[%c0_40, %c0_41, %c0_42] : memref<2x32x32xf32, #tpu.memory_space<vmem>>, vector<1x32x32xf32>
    %46 = vector.shape_cast %45 : vector<1x32x32xf32> to vector<32x32xf32>
    %c0_43 = arith.constant 0 : index
    %c0_44 = arith.constant 0 : index
    %c0_45 = arith.constant 0 : index
    %47 = vector.load %arg13[%c0_43, %c0_44, %c0_45] : memref<2x1x32xf32, #tpu.memory_space<vmem>>, vector<1x1x32xf32>
    %48 = vector.shape_cast %47 : vector<1x1x32xf32> to vector<1x32xf32>
    %cst_46 = arith.constant dense<0.000000e+00> : vector<16x32xf32>
    %49 = tpu.matmul %29, %34, %cst_46 {dimension_numbers = #tpu.dot_dimension_numbers<[1], [0], [0], [1], [0, 0, 1, 1], [], []>} : vector<16x32xf32>, vector<32x32xf32>, vector<16x32xf32> -> vector<16x32xf32>
    %50 = vector.broadcast %36 : vector<1x32xf32> to vector<16x32xf32>
    %51 = arith.addf %49, %50 : vector<16x32xf32>
    %cst_47 = arith.constant dense<0.000000e+00> : vector<16x32xf32>
    %52 = tpu.matmul %29, %38, %cst_47 {dimension_numbers = #tpu.dot_dimension_numbers<[1], [0], [0], [1], [0, 0, 1, 1], [], []>} : vector<16x32xf32>, vector<32x32xf32>, vector<16x32xf32> -> vector<16x32xf32>
    %53 = vector.broadcast %40 : vector<1x32xf32> to vector<16x32xf32>
    %54 = arith.addf %52, %53 : vector<16x32xf32>
    %cst_48 = arith.constant dense<0.000000e+00> : vector<16x32xf32>
    %55 = tpu.matmul %29, %42, %cst_48 {dimension_numbers = #tpu.dot_dimension_numbers<[1], [0], [0], [1], [0, 0, 1, 1], [], []>} : vector<16x32xf32>, vector<32x32xf32>, vector<16x32xf32> -> vector<16x32xf32>
    %56 = vector.broadcast %44 : vector<1x32xf32> to vector<16x32xf32>
    %57 = arith.addf %55, %56 : vector<16x32xf32>
    %58 = vector.extract_strided_slice %51 {offsets = [0, 0], sizes = [16, 8], strides = [1, 1]} : vector<16x32xf32> to vector<16x8xf32>
    %59 = vector.shape_cast %58 : vector<16x8xf32> to vector<2x8x8xf32>
    %60 = vector.extract_strided_slice %54 {offsets = [0, 0], sizes = [16, 8], strides = [1, 1]} : vector<16x32xf32> to vector<16x8xf32>
    %61 = vector.shape_cast %60 : vector<16x8xf32> to vector<2x8x8xf32>
    %62 = vector.extract_strided_slice %57 {offsets = [0, 0], sizes = [16, 8], strides = [1, 1]} : vector<16x32xf32> to vector<16x8xf32>
    %63 = vector.shape_cast %62 : vector<16x8xf32> to vector<2x8x8xf32>
    "tpu.trace_start"() <{level = 10 : i32, message = "bqd,bkd->bqk"}> : () -> ()
    %cst_49 = arith.constant dense<0.000000e+00> : vector<2x8x8xf32>
    %64 = tpu.matmul %59, %61, %cst_49 {dimension_numbers = #tpu.dot_dimension_numbers<[2], [2], [1], [1], [0, 0, 0, 1, 1, 1], [0], [0]>} : vector<2x8x8xf32>, vector<2x8x8xf32>, vector<2x8x8xf32> -> vector<2x8x8xf32>
    "tpu.trace_stop"() : () -> ()
    %65 = arith.addf %64, %2 : vector<2x8x8xf32>
    %cst_50 = arith.constant dense<0xFF800000> : vector<2x8xf32>
    %66 = vector.multi_reduction <maximumf>, %65, %cst_50 [2] : vector<2x8x8xf32> to vector<2x8xf32>
    %67 = vector.shape_cast %66 : vector<2x8xf32> to vector<2x8x1xf32>
    %68 = vector.broadcast %67 : vector<2x8x1xf32> to vector<2x8x8xf32>
    %69 = arith.subf %65, %68 : vector<2x8x8xf32>
    %70 = math.exp %69 : vector<2x8x8xf32>
    %cst_51 = arith.constant dense<0.000000e+00> : vector<2x8xf32>
    %71 = vector.multi_reduction <add>, %70, %cst_51 [2] : vector<2x8x8xf32> to vector<2x8xf32>
    %72 = vector.shape_cast %71 : vector<2x8xf32> to vector<2x8x1xf32>
    %73 = vector.broadcast %72 : vector<2x8x1xf32> to vector<2x8x8xf32>
    %74 = arith.divf %70, %73 : vector<2x8x8xf32>
    "tpu.trace_start"() <{level = 10 : i32, message = "bqk,bkd->bqd"}> : () -> ()
    %cst_52 = arith.constant dense<0.000000e+00> : vector<2x8x8xf32>
    %75 = tpu.matmul %74, %63, %cst_52 {dimension_numbers = #tpu.dot_dimension_numbers<[2], [1], [1], [2], [0, 0, 0, 1, 1, 2], [0], [0]>} : vector<2x8x8xf32>, vector<2x8x8xf32>, vector<2x8x8xf32> -> vector<2x8x8xf32>
    "tpu.trace_stop"() : () -> ()
    %76 = vector.extract_strided_slice %51 {offsets = [0, 8], sizes = [16, 8], strides = [1, 1]} : vector<16x32xf32> to vector<16x8xf32>
    %77 = vector.shape_cast %76 : vector<16x8xf32> to vector<2x8x8xf32>
    %78 = vector.extract_strided_slice %54 {offsets = [0, 8], sizes = [16, 8], strides = [1, 1]} : vector<16x32xf32> to vector<16x8xf32>
    %79 = vector.shape_cast %78 : vector<16x8xf32> to vector<2x8x8xf32>
    %80 = vector.extract_strided_slice %57 {offsets = [0, 8], sizes = [16, 8], strides = [1, 1]} : vector<16x32xf32> to vector<16x8xf32>
    %81 = vector.shape_cast %80 : vector<16x8xf32> to vector<2x8x8xf32>
    "tpu.trace_start"() <{level = 10 : i32, message = "bqd,bkd->bqk"}> : () -> ()
    %cst_53 = arith.constant dense<0.000000e+00> : vector<2x8x8xf32>
    %82 = tpu.matmul %77, %79, %cst_53 {dimension_numbers = #tpu.dot_dimension_numbers<[2], [2], [1], [1], [0, 0, 0, 1, 1, 1], [0], [0]>} : vector<2x8x8xf32>, vector<2x8x8xf32>, vector<2x8x8xf32> -> vector<2x8x8xf32>
    "tpu.trace_stop"() : () -> ()
    %83 = arith.addf %82, %2 : vector<2x8x8xf32>
    %cst_54 = arith.constant dense<0xFF800000> : vector<2x8xf32>
    %84 = vector.multi_reduction <maximumf>, %83, %cst_54 [2] : vector<2x8x8xf32> to vector<2x8xf32>
    %85 = vector.shape_cast %84 : vector<2x8xf32> to vector<2x8x1xf32>
    %86 = vector.broadcast %85 : vector<2x8x1xf32> to vector<2x8x8xf32>
    %87 = arith.subf %83, %86 : vector<2x8x8xf32>
    %88 = math.exp %87 : vector<2x8x8xf32>
    %cst_55 = arith.constant dense<0.000000e+00> : vector<2x8xf32>
    %89 = vector.multi_reduction <add>, %88, %cst_55 [2] : vector<2x8x8xf32> to vector<2x8xf32>
    %90 = vector.shape_cast %89 : vector<2x8xf32> to vector<2x8x1xf32>
    %91 = vector.broadcast %90 : vector<2x8x1xf32> to vector<2x8x8xf32>
    %92 = arith.divf %88, %91 : vector<2x8x8xf32>
    "tpu.trace_start"() <{level = 10 : i32, message = "bqk,bkd->bqd"}> : () -> ()
    %cst_56 = arith.constant dense<0.000000e+00> : vector<2x8x8xf32>
    %93 = tpu.matmul %92, %81, %cst_56 {dimension_numbers = #tpu.dot_dimension_numbers<[2], [1], [1], [2], [0, 0, 0, 1, 1, 2], [0], [0]>} : vector<2x8x8xf32>, vector<2x8x8xf32>, vector<2x8x8xf32> -> vector<2x8x8xf32>
    "tpu.trace_stop"() : () -> ()
    %94 = vector.extract_strided_slice %51 {offsets = [0, 16], sizes = [16, 8], strides = [1, 1]} : vector<16x32xf32> to vector<16x8xf32>
    %95 = vector.shape_cast %94 : vector<16x8xf32> to vector<2x8x8xf32>
    %96 = vector.extract_strided_slice %54 {offsets = [0, 16], sizes = [16, 8], strides = [1, 1]} : vector<16x32xf32> to vector<16x8xf32>
    %97 = vector.shape_cast %96 : vector<16x8xf32> to vector<2x8x8xf32>
    %98 = vector.extract_strided_slice %57 {offsets = [0, 16], sizes = [16, 8], strides = [1, 1]} : vector<16x32xf32> to vector<16x8xf32>
    %99 = vector.shape_cast %98 : vector<16x8xf32> to vector<2x8x8xf32>
    "tpu.trace_start"() <{level = 10 : i32, message = "bqd,bkd->bqk"}> : () -> ()
    %cst_57 = arith.constant dense<0.000000e+00> : vector<2x8x8xf32>
    %100 = tpu.matmul %95, %97, %cst_57 {dimension_numbers = #tpu.dot_dimension_numbers<[2], [2], [1], [1], [0, 0, 0, 1, 1, 1], [0], [0]>} : vector<2x8x8xf32>, vector<2x8x8xf32>, vector<2x8x8xf32> -> vector<2x8x8xf32>
    "tpu.trace_stop"() : () -> ()
    %101 = arith.addf %100, %2 : vector<2x8x8xf32>
    %cst_58 = arith.constant dense<0xFF800000> : vector<2x8xf32>
    %102 = vector.multi_reduction <maximumf>, %101, %cst_58 [2] : vector<2x8x8xf32> to vector<2x8xf32>
    %103 = vector.shape_cast %102 : vector<2x8xf32> to vector<2x8x1xf32>
    %104 = vector.broadcast %103 : vector<2x8x1xf32> to vector<2x8x8xf32>
    %105 = arith.subf %101, %104 : vector<2x8x8xf32>
    %106 = math.exp %105 : vector<2x8x8xf32>
    %cst_59 = arith.constant dense<0.000000e+00> : vector<2x8xf32>
    %107 = vector.multi_reduction <add>, %106, %cst_59 [2] : vector<2x8x8xf32> to vector<2x8xf32>
    %108 = vector.shape_cast %107 : vector<2x8xf32> to vector<2x8x1xf32>
    %109 = vector.broadcast %108 : vector<2x8x1xf32> to vector<2x8x8xf32>
    %110 = arith.divf %106, %109 : vector<2x8x8xf32>
    "tpu.trace_start"() <{level = 10 : i32, message = "bqk,bkd->bqd"}> : () -> ()
    %cst_60 = arith.constant dense<0.000000e+00> : vector<2x8x8xf32>
    %111 = tpu.matmul %110, %99, %cst_60 {dimension_numbers = #tpu.dot_dimension_numbers<[2], [1], [1], [2], [0, 0, 0, 1, 1, 2], [0], [0]>} : vector<2x8x8xf32>, vector<2x8x8xf32>, vector<2x8x8xf32> -> vector<2x8x8xf32>
    "tpu.trace_stop"() : () -> ()
    %112 = vector.extract_strided_slice %51 {offsets = [0, 24], sizes = [16, 8], strides = [1, 1]} : vector<16x32xf32> to vector<16x8xf32>
    %113 = vector.shape_cast %112 : vector<16x8xf32> to vector<2x8x8xf32>
    %114 = vector.extract_strided_slice %54 {offsets = [0, 24], sizes = [16, 8], strides = [1, 1]} : vector<16x32xf32> to vector<16x8xf32>
    %115 = vector.shape_cast %114 : vector<16x8xf32> to vector<2x8x8xf32>
    %116 = vector.extract_strided_slice %57 {offsets = [0, 24], sizes = [16, 8], strides = [1, 1]} : vector<16x32xf32> to vector<16x8xf32>
    %117 = vector.shape_cast %116 : vector<16x8xf32> to vector<2x8x8xf32>
    "tpu.trace_start"() <{level = 10 : i32, message = "bqd,bkd->bqk"}> : () -> ()
    %cst_61 = arith.constant dense<0.000000e+00> : vector<2x8x8xf32>
    %118 = tpu.matmul %113, %115, %cst_61 {dimension_numbers = #tpu.dot_dimension_numbers<[2], [2], [1], [1], [0, 0, 0, 1, 1, 1], [0], [0]>} : vector<2x8x8xf32>, vector<2x8x8xf32>, vector<2x8x8xf32> -> vector<2x8x8xf32>
    "tpu.trace_stop"() : () -> ()
    %119 = arith.addf %118, %2 : vector<2x8x8xf32>
    %cst_62 = arith.constant dense<0xFF800000> : vector<2x8xf32>
    %120 = vector.multi_reduction <maximumf>, %119, %cst_62 [2] : vector<2x8x8xf32> to vector<2x8xf32>
    %121 = vector.shape_cast %120 : vector<2x8xf32> to vector<2x8x1xf32>
    %122 = vector.broadcast %121 : vector<2x8x1xf32> to vector<2x8x8xf32>
    %123 = arith.subf %119, %122 : vector<2x8x8xf32>
    %124 = math.exp %123 : vector<2x8x8xf32>
    %cst_63 = arith.constant dense<0.000000e+00> : vector<2x8xf32>
    %125 = vector.multi_reduction <add>, %124, %cst_63 [2] : vector<2x8x8xf32> to vector<2x8xf32>
    %126 = vector.shape_cast %125 : vector<2x8xf32> to vector<2x8x1xf32>
    %127 = vector.broadcast %126 : vector<2x8x1xf32> to vector<2x8x8xf32>
    %128 = arith.divf %124, %127 : vector<2x8x8xf32>
    "tpu.trace_start"() <{level = 10 : i32, message = "bqk,bkd->bqd"}> : () -> ()
    %cst_64 = arith.constant dense<0.000000e+00> : vector<2x8x8xf32>
    %129 = tpu.matmul %128, %117, %cst_64 {dimension_numbers = #tpu.dot_dimension_numbers<[2], [1], [1], [2], [0, 0, 0, 1, 1, 2], [0], [0]>} : vector<2x8x8xf32>, vector<2x8x8xf32>, vector<2x8x8xf32> -> vector<2x8x8xf32>
    "tpu.trace_stop"() : () -> ()
    %130 = tpu.concatenate %75, %93, %111, %129 in 2 : vector<2x8x8xf32>, vector<2x8x8xf32>, vector<2x8x8xf32>, vector<2x8x8xf32> -> vector<2x8x32xf32>
    %131 = vector.shape_cast %130 : vector<2x8x32xf32> to vector<16x32xf32>
    %cst_65 = arith.constant dense<0.000000e+00> : vector<16x32xf32>
    %132 = tpu.matmul %131, %46, %cst_65 {dimension_numbers = #tpu.dot_dimension_numbers<[1], [0], [0], [1], [0, 0, 1, 1], [], []>} : vector<16x32xf32>, vector<32x32xf32>, vector<16x32xf32> -> vector<16x32xf32>
    %133 = vector.broadcast %48 : vector<1x32xf32> to vector<16x32xf32>
    %134 = arith.addf %132, %133 : vector<16x32xf32>
    %135 = arith.addf %134, %0 : vector<16x32xf32>
    %c0_66 = arith.constant 0 : index
    %c0_67 = arith.constant 0 : index
    %c0_68 = arith.constant 0 : index
    %136 = vector.load %arg14[%c0_66, %c0_67, %c0_68] : memref<2x1x32xf32, #tpu.memory_space<vmem>>, vector<1x1x32xf32>
    %137 = vector.shape_cast %136 : vector<1x1x32xf32> to vector<1x32xf32>
    %c0_69 = arith.constant 0 : index
    %c0_70 = arith.constant 0 : index
    %c0_71 = arith.constant 0 : index
    %138 = vector.load %arg15[%c0_69, %c0_70, %c0_71] : memref<2x1x32xf32, #tpu.memory_space<vmem>>, vector<1x1x32xf32>
    %139 = vector.shape_cast %138 : vector<1x1x32xf32> to vector<1x32xf32>
    %cst_72 = arith.constant dense<0.000000e+00> : vector<16xf32>
    %140 = vector.multi_reduction <add>, %135, %cst_72 [1] : vector<16x32xf32> to vector<16xf32>
    %141 = vector.shape_cast %140 : vector<16xf32> to vector<16x1xf32>
    %cst_73 = arith.constant 3.200000e+01 : f32
    %142 = vector.broadcast %cst_73 : f32 to vector<16x1xf32>
    %143 = arith.divf %141, %142 : vector<16x1xf32>
    %144 = vector.broadcast %143 : vector<16x1xf32> to vector<16x32xf32>
    %145 = arith.subf %135, %144 : vector<16x32xf32>
    %146 = arith.mulf %145, %145 : vector<16x32xf32>
    %cst_74 = arith.constant dense<0.000000e+00> : vector<16xf32>
    %147 = vector.multi_reduction <add>, %146, %cst_74 [1] : vector<16x32xf32> to vector<16xf32>
    %148 = vector.shape_cast %147 : vector<16xf32> to vector<16x1xf32>
    %cst_75 = arith.constant 3.200000e+01 : f32
    %149 = vector.broadcast %cst_75 : f32 to vector<16x1xf32>
    %150 = arith.divf %148, %149 : vector<16x1xf32>
    %151 = vector.broadcast %143 : vector<16x1xf32> to vector<16x32xf32>
    %152 = arith.subf %135, %151 : vector<16x32xf32>
    %cst_76 = arith.constant 9.99999997E-7 : f32
    %153 = vector.broadcast %cst_76 : f32 to vector<16x1xf32>
    %154 = arith.addf %150, %153 : vector<16x1xf32>
    %155 = math.rsqrt %154 : vector<16x1xf32>
    %156 = vector.broadcast %155 : vector<16x1xf32> to vector<16x32xf32>
    %157 = arith.mulf %152, %156 : vector<16x32xf32>
    %158 = vector.broadcast %137 : vector<1x32xf32> to vector<16x32xf32>
    %159 = arith.mulf %157, %158 : vector<16x32xf32>
    %160 = vector.broadcast %139 : vector<1x32xf32> to vector<16x32xf32>
    %161 = arith.addf %159, %160 : vector<16x32xf32>
    %c0_77 = arith.constant 0 : index
    %c0_78 = arith.constant 0 : index
    %c0_79 = arith.constant 0 : index
    %162 = vector.load %arg16[%c0_77, %c0_78, %c0_79] : memref<2x32x32xf32, #tpu.memory_space<vmem>>, vector<1x32x32xf32>
    %163 = vector.shape_cast %162 : vector<1x32x32xf32> to vector<32x32xf32>
    %c0_80 = arith.constant 0 : index
    %c0_81 = arith.constant 0 : index
    %c0_82 = arith.constant 0 : index
    %164 = vector.load %arg17[%c0_80, %c0_81, %c0_82] : memref<2x1x32xf32, #tpu.memory_space<vmem>>, vector<1x1x32xf32>
    %165 = vector.shape_cast %164 : vector<1x1x32xf32> to vector<1x32xf32>
    %c0_83 = arith.constant 0 : index
    %c0_84 = arith.constant 0 : index
    %c0_85 = arith.constant 0 : index
    %166 = vector.load %arg18[%c0_83, %c0_84, %c0_85] : memref<2x32x32xf32, #tpu.memory_space<vmem>>, vector<1x32x32xf32>
    %167 = vector.shape_cast %166 : vector<1x32x32xf32> to vector<32x32xf32>
    %c0_86 = arith.constant 0 : index
    %c0_87 = arith.constant 0 : index
    %c0_88 = arith.constant 0 : index
    %168 = vector.load %arg19[%c0_86, %c0_87, %c0_88] : memref<2x1x32xf32, #tpu.memory_space<vmem>>, vector<1x1x32xf32>
    %169 = vector.shape_cast %168 : vector<1x1x32xf32> to vector<1x32xf32>
    %c0_89 = arith.constant 0 : index
    %c0_90 = arith.constant 0 : index
    %c0_91 = arith.constant 0 : index
    %170 = vector.load %arg20[%c0_89, %c0_90, %c0_91] : memref<2x32x32xf32, #tpu.memory_space<vmem>>, vector<1x32x32xf32>
    %171 = vector.shape_cast %170 : vector<1x32x32xf32> to vector<32x32xf32>
    %c0_92 = arith.constant 0 : index
    %c0_93 = arith.constant 0 : index
    %c0_94 = arith.constant 0 : index
    %172 = vector.load %arg21[%c0_92, %c0_93, %c0_94] : memref<2x1x32xf32, #tpu.memory_space<vmem>>, vector<1x1x32xf32>
    %173 = vector.shape_cast %172 : vector<1x1x32xf32> to vector<1x32xf32>
    %c0_95 = arith.constant 0 : index
    %c0_96 = arith.constant 0 : index
    %c0_97 = arith.constant 0 : index
    %174 = vector.load %arg22[%c0_95, %c0_96, %c0_97] : memref<2x32x32xf32, #tpu.memory_space<vmem>>, vector<1x32x32xf32>
    %175 = vector.shape_cast %174 : vector<1x32x32xf32> to vector<32x32xf32>
    %c0_98 = arith.constant 0 : index
    %c0_99 = arith.constant 0 : index
    %c0_100 = arith.constant 0 : index
    %176 = vector.load %arg23[%c0_98, %c0_99, %c0_100] : memref<2x1x32xf32, #tpu.memory_space<vmem>>, vector<1x1x32xf32>
    %177 = vector.shape_cast %176 : vector<1x1x32xf32> to vector<1x32xf32>
    %cst_101 = arith.constant dense<0.000000e+00> : vector<16x32xf32>
    %178 = tpu.matmul %161, %163, %cst_101 {dimension_numbers = #tpu.dot_dimension_numbers<[1], [0], [0], [1], [0, 0, 1, 1], [], []>} : vector<16x32xf32>, vector<32x32xf32>, vector<16x32xf32> -> vector<16x32xf32>
    %179 = vector.broadcast %165 : vector<1x32xf32> to vector<16x32xf32>
    %180 = arith.addf %178, %179 : vector<16x32xf32>
    %cst_102 = arith.constant dense<0.000000e+00> : vector<32x32xf32>
    %181 = tpu.matmul %1, %167, %cst_102 {dimension_numbers = #tpu.dot_dimension_numbers<[1], [0], [0], [1], [0, 0, 1, 1], [], []>} : vector<32x32xf32>, vector<32x32xf32>, vector<32x32xf32> -> vector<32x32xf32>
    %182 = vector.broadcast %169 : vector<1x32xf32> to vector<32x32xf32>
    %183 = arith.addf %181, %182 : vector<32x32xf32>
    %cst_103 = arith.constant dense<0.000000e+00> : vector<32x32xf32>
    %184 = tpu.matmul %1, %171, %cst_103 {dimension_numbers = #tpu.dot_dimension_numbers<[1], [0], [0], [1], [0, 0, 1, 1], [], []>} : vector<32x32xf32>, vector<32x32xf32>, vector<32x32xf32> -> vector<32x32xf32>
    %185 = vector.broadcast %173 : vector<1x32xf32> to vector<32x32xf32>
    %186 = arith.addf %184, %185 : vector<32x32xf32>
    %187 = vector.extract_strided_slice %180 {offsets = [0, 0], sizes = [16, 8], strides = [1, 1]} : vector<16x32xf32> to vector<16x8xf32>
    %188 = vector.shape_cast %187 : vector<16x8xf32> to vector<2x8x8xf32>
    %189 = vector.extract_strided_slice %183 {offsets = [0, 0], sizes = [32, 8], strides = [1, 1]} : vector<32x32xf32> to vector<32x8xf32>
    %190 = vector.shape_cast %189 : vector<32x8xf32> to vector<2x16x8xf32>
    %191 = vector.extract_strided_slice %186 {offsets = [0, 0], sizes = [32, 8], strides = [1, 1]} : vector<32x32xf32> to vector<32x8xf32>
    %192 = vector.shape_cast %191 : vector<32x8xf32> to vector<2x16x8xf32>
    "tpu.trace_start"() <{level = 10 : i32, message = "bqd,bkd->bqk"}> : () -> ()
    %cst_104 = arith.constant dense<0.000000e+00> : vector<2x8x16xf32>
    %193 = tpu.matmul %188, %190, %cst_104 {dimension_numbers = #tpu.dot_dimension_numbers<[2], [2], [1], [1], [0, 0, 0, 1, 1, 1], [0], [0]>} : vector<2x8x8xf32>, vector<2x16x8xf32>, vector<2x8x16xf32> -> vector<2x8x16xf32>
    "tpu.trace_stop"() : () -> ()
    %194 = arith.addf %193, %3 : vector<2x8x16xf32>
    %cst_105 = arith.constant dense<0xFF800000> : vector<2x8xf32>
    %195 = vector.multi_reduction <maximumf>, %194, %cst_105 [2] : vector<2x8x16xf32> to vector<2x8xf32>
    %196 = vector.shape_cast %195 : vector<2x8xf32> to vector<2x8x1xf32>
    %197 = vector.broadcast %196 : vector<2x8x1xf32> to vector<2x8x16xf32>
    %198 = arith.subf %194, %197 : vector<2x8x16xf32>
    %199 = math.exp %198 : vector<2x8x16xf32>
    %cst_106 = arith.constant dense<0.000000e+00> : vector<2x8xf32>
    %200 = vector.multi_reduction <add>, %199, %cst_106 [2] : vector<2x8x16xf32> to vector<2x8xf32>
    %201 = vector.shape_cast %200 : vector<2x8xf32> to vector<2x8x1xf32>
    %202 = vector.broadcast %201 : vector<2x8x1xf32> to vector<2x8x16xf32>
    %203 = arith.divf %199, %202 : vector<2x8x16xf32>
    "tpu.trace_start"() <{level = 10 : i32, message = "bqk,bkd->bqd"}> : () -> ()
    %cst_107 = arith.constant dense<0.000000e+00> : vector<2x8x8xf32>
    %204 = tpu.matmul %203, %192, %cst_107 {dimension_numbers = #tpu.dot_dimension_numbers<[2], [1], [1], [2], [0, 0, 0, 1, 1, 2], [0], [0]>} : vector<2x8x16xf32>, vector<2x16x8xf32>, vector<2x8x8xf32> -> vector<2x8x8xf32>
    "tpu.trace_stop"() : () -> ()
    %205 = vector.extract_strided_slice %180 {offsets = [0, 8], sizes = [16, 8], strides = [1, 1]} : vector<16x32xf32> to vector<16x8xf32>
    %206 = vector.shape_cast %205 : vector<16x8xf32> to vector<2x8x8xf32>
    %207 = vector.extract_strided_slice %183 {offsets = [0, 8], sizes = [32, 8], strides = [1, 1]} : vector<32x32xf32> to vector<32x8xf32>
    %208 = vector.shape_cast %207 : vector<32x8xf32> to vector<2x16x8xf32>
    %209 = vector.extract_strided_slice %186 {offsets = [0, 8], sizes = [32, 8], strides = [1, 1]} : vector<32x32xf32> to vector<32x8xf32>
    %210 = vector.shape_cast %209 : vector<32x8xf32> to vector<2x16x8xf32>
    "tpu.trace_start"() <{level = 10 : i32, message = "bqd,bkd->bqk"}> : () -> ()
    %cst_108 = arith.constant dense<0.000000e+00> : vector<2x8x16xf32>
    %211 = tpu.matmul %206, %208, %cst_108 {dimension_numbers = #tpu.dot_dimension_numbers<[2], [2], [1], [1], [0, 0, 0, 1, 1, 1], [0], [0]>} : vector<2x8x8xf32>, vector<2x16x8xf32>, vector<2x8x16xf32> -> vector<2x8x16xf32>
    "tpu.trace_stop"() : () -> ()
    %212 = arith.addf %211, %3 : vector<2x8x16xf32>
    %cst_109 = arith.constant dense<0xFF800000> : vector<2x8xf32>
    %213 = vector.multi_reduction <maximumf>, %212, %cst_109 [2] : vector<2x8x16xf32> to vector<2x8xf32>
    %214 = vector.shape_cast %213 : vector<2x8xf32> to vector<2x8x1xf32>
    %215 = vector.broadcast %214 : vector<2x8x1xf32> to vector<2x8x16xf32>
    %216 = arith.subf %212, %215 : vector<2x8x16xf32>
    %217 = math.exp %216 : vector<2x8x16xf32>
    %cst_110 = arith.constant dense<0.000000e+00> : vector<2x8xf32>
    %218 = vector.multi_reduction <add>, %217, %cst_110 [2] : vector<2x8x16xf32> to vector<2x8xf32>
    %219 = vector.shape_cast %218 : vector<2x8xf32> to vector<2x8x1xf32>
    %220 = vector.broadcast %219 : vector<2x8x1xf32> to vector<2x8x16xf32>
    %221 = arith.divf %217, %220 : vector<2x8x16xf32>
    "tpu.trace_start"() <{level = 10 : i32, message = "bqk,bkd->bqd"}> : () -> ()
    %cst_111 = arith.constant dense<0.000000e+00> : vector<2x8x8xf32>
    %222 = tpu.matmul %221, %210, %cst_111 {dimension_numbers = #tpu.dot_dimension_numbers<[2], [1], [1], [2], [0, 0, 0, 1, 1, 2], [0], [0]>} : vector<2x8x16xf32>, vector<2x16x8xf32>, vector<2x8x8xf32> -> vector<2x8x8xf32>
    "tpu.trace_stop"() : () -> ()
    %223 = vector.extract_strided_slice %180 {offsets = [0, 16], sizes = [16, 8], strides = [1, 1]} : vector<16x32xf32> to vector<16x8xf32>
    %224 = vector.shape_cast %223 : vector<16x8xf32> to vector<2x8x8xf32>
    %225 = vector.extract_strided_slice %183 {offsets = [0, 16], sizes = [32, 8], strides = [1, 1]} : vector<32x32xf32> to vector<32x8xf32>
    %226 = vector.shape_cast %225 : vector<32x8xf32> to vector<2x16x8xf32>
    %227 = vector.extract_strided_slice %186 {offsets = [0, 16], sizes = [32, 8], strides = [1, 1]} : vector<32x32xf32> to vector<32x8xf32>
    %228 = vector.shape_cast %227 : vector<32x8xf32> to vector<2x16x8xf32>
    "tpu.trace_start"() <{level = 10 : i32, message = "bqd,bkd->bqk"}> : () -> ()
    %cst_112 = arith.constant dense<0.000000e+00> : vector<2x8x16xf32>
    %229 = tpu.matmul %224, %226, %cst_112 {dimension_numbers = #tpu.dot_dimension_numbers<[2], [2], [1], [1], [0, 0, 0, 1, 1, 1], [0], [0]>} : vector<2x8x8xf32>, vector<2x16x8xf32>, vector<2x8x16xf32> -> vector<2x8x16xf32>
    "tpu.trace_stop"() : () -> ()
    %230 = arith.addf %229, %3 : vector<2x8x16xf32>
    %cst_113 = arith.constant dense<0xFF800000> : vector<2x8xf32>
    %231 = vector.multi_reduction <maximumf>, %230, %cst_113 [2] : vector<2x8x16xf32> to vector<2x8xf32>
    %232 = vector.shape_cast %231 : vector<2x8xf32> to vector<2x8x1xf32>
    %233 = vector.broadcast %232 : vector<2x8x1xf32> to vector<2x8x16xf32>
    %234 = arith.subf %230, %233 : vector<2x8x16xf32>
    %235 = math.exp %234 : vector<2x8x16xf32>
    %cst_114 = arith.constant dense<0.000000e+00> : vector<2x8xf32>
    %236 = vector.multi_reduction <add>, %235, %cst_114 [2] : vector<2x8x16xf32> to vector<2x8xf32>
    %237 = vector.shape_cast %236 : vector<2x8xf32> to vector<2x8x1xf32>
    %238 = vector.broadcast %237 : vector<2x8x1xf32> to vector<2x8x16xf32>
    %239 = arith.divf %235, %238 : vector<2x8x16xf32>
    "tpu.trace_start"() <{level = 10 : i32, message = "bqk,bkd->bqd"}> : () -> ()
    %cst_115 = arith.constant dense<0.000000e+00> : vector<2x8x8xf32>
    %240 = tpu.matmul %239, %228, %cst_115 {dimension_numbers = #tpu.dot_dimension_numbers<[2], [1], [1], [2], [0, 0, 0, 1, 1, 2], [0], [0]>} : vector<2x8x16xf32>, vector<2x16x8xf32>, vector<2x8x8xf32> -> vector<2x8x8xf32>
    "tpu.trace_stop"() : () -> ()
    %241 = vector.extract_strided_slice %180 {offsets = [0, 24], sizes = [16, 8], strides = [1, 1]} : vector<16x32xf32> to vector<16x8xf32>
    %242 = vector.shape_cast %241 : vector<16x8xf32> to vector<2x8x8xf32>
    %243 = vector.extract_strided_slice %183 {offsets = [0, 24], sizes = [32, 8], strides = [1, 1]} : vector<32x32xf32> to vector<32x8xf32>
    %244 = vector.shape_cast %243 : vector<32x8xf32> to vector<2x16x8xf32>
    %245 = vector.extract_strided_slice %186 {offsets = [0, 24], sizes = [32, 8], strides = [1, 1]} : vector<32x32xf32> to vector<32x8xf32>
    %246 = vector.shape_cast %245 : vector<32x8xf32> to vector<2x16x8xf32>
    "tpu.trace_start"() <{level = 10 : i32, message = "bqd,bkd->bqk"}> : () -> ()
    %cst_116 = arith.constant dense<0.000000e+00> : vector<2x8x16xf32>
    %247 = tpu.matmul %242, %244, %cst_116 {dimension_numbers = #tpu.dot_dimension_numbers<[2], [2], [1], [1], [0, 0, 0, 1, 1, 1], [0], [0]>} : vector<2x8x8xf32>, vector<2x16x8xf32>, vector<2x8x16xf32> -> vector<2x8x16xf32>
    "tpu.trace_stop"() : () -> ()
    %248 = arith.addf %247, %3 : vector<2x8x16xf32>
    %cst_117 = arith.constant dense<0xFF800000> : vector<2x8xf32>
    %249 = vector.multi_reduction <maximumf>, %248, %cst_117 [2] : vector<2x8x16xf32> to vector<2x8xf32>
    %250 = vector.shape_cast %249 : vector<2x8xf32> to vector<2x8x1xf32>
    %251 = vector.broadcast %250 : vector<2x8x1xf32> to vector<2x8x16xf32>
    %252 = arith.subf %248, %251 : vector<2x8x16xf32>
    %253 = math.exp %252 : vector<2x8x16xf32>
    %cst_118 = arith.constant dense<0.000000e+00> : vector<2x8xf32>
    %254 = vector.multi_reduction <add>, %253, %cst_118 [2] : vector<2x8x16xf32> to vector<2x8xf32>
    %255 = vector.shape_cast %254 : vector<2x8xf32> to vector<2x8x1xf32>
    %256 = vector.broadcast %255 : vector<2x8x1xf32> to vector<2x8x16xf32>
    %257 = arith.divf %253, %256 : vector<2x8x16xf32>
    "tpu.trace_start"() <{level = 10 : i32, message = "bqk,bkd->bqd"}> : () -> ()
    %cst_119 = arith.constant dense<0.000000e+00> : vector<2x8x8xf32>
    %258 = tpu.matmul %257, %246, %cst_119 {dimension_numbers = #tpu.dot_dimension_numbers<[2], [1], [1], [2], [0, 0, 0, 1, 1, 2], [0], [0]>} : vector<2x8x16xf32>, vector<2x16x8xf32>, vector<2x8x8xf32> -> vector<2x8x8xf32>
    "tpu.trace_stop"() : () -> ()
    %259 = tpu.concatenate %204, %222, %240, %258 in 2 : vector<2x8x8xf32>, vector<2x8x8xf32>, vector<2x8x8xf32>, vector<2x8x8xf32> -> vector<2x8x32xf32>
    %260 = vector.shape_cast %259 : vector<2x8x32xf32> to vector<16x32xf32>
    %cst_120 = arith.constant dense<0.000000e+00> : vector<16x32xf32>
    %261 = tpu.matmul %260, %175, %cst_120 {dimension_numbers = #tpu.dot_dimension_numbers<[1], [0], [0], [1], [0, 0, 1, 1], [], []>} : vector<16x32xf32>, vector<32x32xf32>, vector<16x32xf32> -> vector<16x32xf32>
    %262 = vector.broadcast %177 : vector<1x32xf32> to vector<16x32xf32>
    %263 = arith.addf %261, %262 : vector<16x32xf32>
    %264 = tpu.concatenate %203, %221, %239, %257 in 2 : vector<2x8x16xf32>, vector<2x8x16xf32>, vector<2x8x16xf32>, vector<2x8x16xf32> -> vector<2x8x64xf32>
    %c0_121 = arith.constant 0 : index
    %c0_122 = arith.constant 0 : index
    %c0_123 = arith.constant 0 : index
    %c0_124 = arith.constant 0 : index
    %265 = vector.load %arg33[%c0_121, %c0_122, %c0_123, %c0_124] : memref<2x2x8x64xf32, #tpu.memory_space<vmem>>, vector<1x2x8x64xf32>
    %266 = vector.shape_cast %265 : vector<1x2x8x64xf32> to vector<2x8x64xf32>
    %267 = vector.shape_cast %264 : vector<2x8x64xf32> to vector<1x2x8x64xf32>
    tpu.vector_store %arg33[%c0_121, %c0_122, %c0_123, %c0_124], %267 {strides = array<i32>} : memref<2x2x8x64xf32, #tpu.memory_space<vmem>>, vector<1x2x8x64xf32>,
    %268 = arith.addf %263, %135 : vector<16x32xf32>
    %c0_125 = arith.constant 0 : index
    %c0_126 = arith.constant 0 : index
    %c0_127 = arith.constant 0 : index
    %269 = vector.load %arg24[%c0_125, %c0_126, %c0_127] : memref<2x1x32xf32, #tpu.memory_space<vmem>>, vector<1x1x32xf32>
    %270 = vector.shape_cast %269 : vector<1x1x32xf32> to vector<1x32xf32>
    %c0_128 = arith.constant 0 : index
    %c0_129 = arith.constant 0 : index
    %c0_130 = arith.constant 0 : index
    %271 = vector.load %arg25[%c0_128, %c0_129, %c0_130] : memref<2x1x32xf32, #tpu.memory_space<vmem>>, vector<1x1x32xf32>
    %272 = vector.shape_cast %271 : vector<1x1x32xf32> to vector<1x32xf32>
    %cst_131 = arith.constant dense<0.000000e+00> : vector<16xf32>
    %273 = vector.multi_reduction <add>, %268, %cst_131 [1] : vector<16x32xf32> to vector<16xf32>
    %274 = vector.shape_cast %273 : vector<16xf32> to vector<16x1xf32>
    %cst_132 = arith.constant 3.200000e+01 : f32
    %275 = vector.broadcast %cst_132 : f32 to vector<16x1xf32>
    %276 = arith.divf %274, %275 : vector<16x1xf32>
    %277 = vector.broadcast %276 : vector<16x1xf32> to vector<16x32xf32>
    %278 = arith.subf %268, %277 : vector<16x32xf32>
    %279 = arith.mulf %278, %278 : vector<16x32xf32>
    %cst_133 = arith.constant dense<0.000000e+00> : vector<16xf32>
    %280 = vector.multi_reduction <add>, %279, %cst_133 [1] : vector<16x32xf32> to vector<16xf32>
    %281 = vector.shape_cast %280 : vector<16xf32> to vector<16x1xf32>
    %cst_134 = arith.constant 3.200000e+01 : f32
    %282 = vector.broadcast %cst_134 : f32 to vector<16x1xf32>
    %283 = arith.divf %281, %282 : vector<16x1xf32>
    %284 = vector.broadcast %276 : vector<16x1xf32> to vector<16x32xf32>
    %285 = arith.subf %268, %284 : vector<16x32xf32>
    %cst_135 = arith.constant 9.99999997E-7 : f32
    %286 = vector.broadcast %cst_135 : f32 to vector<16x1xf32>
    %287 = arith.addf %283, %286 : vector<16x1xf32>
    %288 = math.rsqrt %287 : vector<16x1xf32>
    %289 = vector.broadcast %288 : vector<16x1xf32> to vector<16x32xf32>
    %290 = arith.mulf %285, %289 : vector<16x32xf32>
    %291 = vector.broadcast %270 : vector<1x32xf32> to vector<16x32xf32>
    %292 = arith.mulf %290, %291 : vector<16x32xf32>
    %293 = vector.broadcast %272 : vector<1x32xf32> to vector<16x32xf32>
    %294 = arith.addf %292, %293 : vector<16x32xf32>
    %c0_136 = arith.constant 0 : index
    %c0_137 = arith.constant 0 : index
    %c0_138 = arith.constant 0 : index
    %295 = vector.load %arg26[%c0_136, %c0_137, %c0_138] : memref<2x32x64xf32, #tpu.memory_space<vmem>>, vector<1x32x64xf32>
    %296 = vector.shape_cast %295 : vector<1x32x64xf32> to vector<32x64xf32>
    %cst_139 = arith.constant dense<0.000000e+00> : vector<16x64xf32>
    %297 = tpu.matmul %294, %296, %cst_139 {dimension_numbers = #tpu.dot_dimension_numbers<[1], [0], [0], [1], [0, 0, 1, 1], [], []>} : vector<16x32xf32>, vector<32x64xf32>, vector<16x64xf32> -> vector<16x64xf32>
    %c0_140 = arith.constant 0 : index
    %c0_141 = arith.constant 0 : index
    %c0_142 = arith.constant 0 : index
    %298 = vector.load %arg27[%c0_140, %c0_141, %c0_142] : memref<2x1x64xf32, #tpu.memory_space<vmem>>, vector<1x1x64xf32>
    %299 = vector.shape_cast %298 : vector<1x1x64xf32> to vector<1x64xf32>
    %300 = vector.broadcast %299 : vector<1x64xf32> to vector<16x64xf32>
    %301 = arith.addf %297, %300 : vector<16x64xf32>
    %cst_143 = arith.constant 5.000000e-01 : f32
    %302 = vector.broadcast %cst_143 : f32 to vector<16x64xf32>
    %303 = arith.mulf %302, %301 : vector<16x64xf32>
    %cst_144 = arith.constant 4.471500e-02 : f32
    %304 = vector.broadcast %cst_144 : f32 to vector<16x64xf32>
    %305 = arith.mulf %304, %301 : vector<16x64xf32>
    %306 = arith.mulf %305, %301 : vector<16x64xf32>
    %307 = arith.mulf %306, %301 : vector<16x64xf32>
    %308 = arith.addf %301, %307 : vector<16x64xf32>
    %cst_145 = arith.constant 0.797884583 : f32
    %309 = vector.broadcast %cst_145 : f32 to vector<16x64xf32>
    %310 = arith.mulf %309, %308 : vector<16x64xf32>
    %311 = math.tanh %310 : vector<16x64xf32>
    %cst_146 = arith.constant 1.000000e+00 : f32
    %312 = vector.broadcast %cst_146 : f32 to vector<16x64xf32>
    %313 = arith.addf %312, %311 : vector<16x64xf32>
    %314 = arith.mulf %303, %313 : vector<16x64xf32>
    %c0_147 = arith.constant 0 : index
    %c0_148 = arith.constant 0 : index
    %c0_149 = arith.constant 0 : index
    %315 = vector.load %arg28[%c0_147, %c0_148, %c0_149] : memref<2x64x32xf32, #tpu.memory_space<vmem>>, vector<1x64x32xf32>
    %316 = vector.shape_cast %315 : vector<1x64x32xf32> to vector<64x32xf32>
    %cst_150 = arith.constant dense<0.000000e+00> : vector<16x32xf32>
    %317 = tpu.matmul %314, %316, %cst_150 {dimension_numbers = #tpu.dot_dimension_numbers<[1], [0], [0], [1], [0, 0, 1, 1], [], []>} : vector<16x64xf32>, vector<64x32xf32>, vector<16x32xf32> -> vector<16x32xf32>
    %c0_151 = arith.constant 0 : index
    %c0_152 = arith.constant 0 : index
    %c0_153 = arith.constant 0 : index
    %318 = vector.load %arg29[%c0_151, %c0_152, %c0_153] : memref<2x1x32xf32, #tpu.memory_space<vmem>>, vector<1x1x32xf32>
    %319 = vector.shape_cast %318 : vector<1x1x32xf32> to vector<1x32xf32>
    %320 = vector.broadcast %319 : vector<1x32xf32> to vector<16x32xf32>
    %321 = arith.addf %317, %320 : vector<16x32xf32>
    %322 = arith.addf %321, %268 : vector<16x32xf32>
    %c1 = arith.constant 1 : index
    %c0_154 = arith.constant 0 : index
    %c0_155 = arith.constant 0 : index
    %323 = vector.load %arg4[%c1, %c0_154, %c0_155] : memref<2x1x32xf32, #tpu.memory_space<vmem>>, vector<1x1x32xf32>
    %324 = vector.shape_cast %323 : vector<1x1x32xf32> to vector<1x32xf32>
    %c1_156 = arith.constant 1 : index
    %c0_157 = arith.constant 0 : index
    %c0_158 = arith.constant 0 : index
    %325 = vector.load %arg5[%c1_156, %c0_157, %c0_158] : memref<2x1x32xf32, #tpu.memory_space<vmem>>, vector<1x1x32xf32>
    %326 = vector.shape_cast %325 : vector<1x1x32xf32> to vector<1x32xf32>
    %cst_159 = arith.constant dense<0.000000e+00> : vector<16xf32>
    %327 = vector.multi_reduction <add>, %322, %cst_159 [1] : vector<16x32xf32> to vector<16xf32>
    %328 = vector.shape_cast %327 : vector<16xf32> to vector<16x1xf32>
    %cst_160 = arith.constant 3.200000e+01 : f32
    %329 = vector.broadcast %cst_160 : f32 to vector<16x1xf32>
    %330 = arith.divf %328, %329 : vector<16x1xf32>
    %331 = vector.broadcast %330 : vector<16x1xf32> to vector<16x32xf32>
    %332 = arith.subf %322, %331 : vector<16x32xf32>
    %333 = arith.mulf %332, %332 : vector<16x32xf32>
    %cst_161 = arith.constant dense<0.000000e+00> : vector<16xf32>
    %334 = vector.multi_reduction <add>, %333, %cst_161 [1] : vector<16x32xf32> to vector<16xf32>
    %335 = vector.shape_cast %334 : vector<16xf32> to vector<16x1xf32>
    %cst_162 = arith.constant 3.200000e+01 : f32
    %336 = vector.broadcast %cst_162 : f32 to vector<16x1xf32>
    %337 = arith.divf %335, %336 : vector<16x1xf32>
    %338 = vector.broadcast %330 : vector<16x1xf32> to vector<16x32xf32>
    %339 = arith.subf %322, %338 : vector<16x32xf32>
    %cst_163 = arith.constant 9.99999997E-7 : f32
    %340 = vector.broadcast %cst_163 : f32 to vector<16x1xf32>
    %341 = arith.addf %337, %340 : vector<16x1xf32>
    %342 = math.rsqrt %341 : vector<16x1xf32>
    %343 = vector.broadcast %342 : vector<16x1xf32> to vector<16x32xf32>
    %344 = arith.mulf %339, %343 : vector<16x32xf32>
    %345 = vector.broadcast %324 : vector<1x32xf32> to vector<16x32xf32>
    %346 = arith.mulf %344, %345 : vector<16x32xf32>
    %347 = vector.broadcast %326 : vector<1x32xf32> to vector<16x32xf32>
    %348 = arith.addf %346, %347 : vector<16x32xf32>
    %c1_164 = arith.constant 1 : index
    %c0_165 = arith.constant 0 : index
    %c0_166 = arith.constant 0 : index
    %349 = vector.load %arg34[%c1_164, %c0_165, %c0_166] : memref<2x16x32xf32, #tpu.memory_space<vmem>>, vector<1x16x32xf32>
    %350 = vector.shape_cast %349 : vector<1x16x32xf32> to vector<16x32xf32>
    %351 = vector.shape_cast %348 : vector<16x32xf32> to vector<1x16x32xf32>
    tpu.vector_store %arg34[%c1_164, %c0_165, %c0_166], %351 {strides = array<i32>} : memref<2x16x32xf32, #tpu.memory_space<vmem>>, vector<1x16x32xf32>,
    %c1_167 = arith.constant 1 : index
    %c0_168 = arith.constant 0 : index
    %c0_169 = arith.constant 0 : index
    %352 = vector.load %arg6[%c1_167, %c0_168, %c0_169] : memref<2x32x32xf32, #tpu.memory_space<vmem>>, vector<1x32x32xf32>
    %353 = vector.shape_cast %352 : vector<1x32x32xf32> to vector<32x32xf32>
    %c1_170 = arith.constant 1 : index
    %c0_171 = arith.constant 0 : index
    %c0_172 = arith.constant 0 : index
    %354 = vector.load %arg7[%c1_170, %c0_171, %c0_172] : memref<2x1x32xf32, #tpu.memory_space<vmem>>, vector<1x1x32xf32>
    %355 = vector.shape_cast %354 : vector<1x1x32xf32> to vector<1x32xf32>
    %c1_173 = arith.constant 1 : index
    %c0_174 = arith.constant 0 : index
    %c0_175 = arith.constant 0 : index
    %356 = vector.load %arg8[%c1_173, %c0_174, %c0_175] : memref<2x32x32xf32, #tpu.memory_space<vmem>>, vector<1x32x32xf32>
    %357 = vector.shape_cast %356 : vector<1x32x32xf32> to vector<32x32xf32>
    %c1_176 = arith.constant 1 : index
    %c0_177 = arith.constant 0 : index
    %c0_178 = arith.constant 0 : index
    %358 = vector.load %arg9[%c1_176, %c0_177, %c0_178] : memref<2x1x32xf32, #tpu.memory_space<vmem>>, vector<1x1x32xf32>
    %359 = vector.shape_cast %358 : vector<1x1x32xf32> to vector<1x32xf32>
    %c1_179 = arith.constant 1 : index
    %c0_180 = arith.constant 0 : index
    %c0_181 = arith.constant 0 : index
    %360 = vector.load %arg10[%c1_179, %c0_180, %c0_181] : memref<2x32x32xf32, #tpu.memory_space<vmem>>, vector<1x32x32xf32>
    %361 = vector.shape_cast %360 : vector<1x32x32xf32> to vector<32x32xf32>
    %c1_182 = arith.constant 1 : index
    %c0_183 = arith.constant 0 : index
    %c0_184 = arith.constant 0 : index
    %362 = vector.load %arg11[%c1_182, %c0_183, %c0_184] : memref<2x1x32xf32, #tpu.memory_space<vmem>>, vector<1x1x32xf32>
    %363 = vector.shape_cast %362 : vector<1x1x32xf32> to vector<1x32xf32>
    %c1_185 = arith.constant 1 : index
    %c0_186 = arith.constant 0 : index
    %c0_187 = arith.constant 0 : index
    %364 = vector.load %arg12[%c1_185, %c0_186, %c0_187] : memref<2x32x32xf32, #tpu.memory_space<vmem>>, vector<1x32x32xf32>
    %365 = vector.shape_cast %364 : vector<1x32x32xf32> to vector<32x32xf32>
    %c1_188 = arith.constant 1 : index
    %c0_189 = arith.constant 0 : index
    %c0_190 = arith.constant 0 : index
    %366 = vector.load %arg13[%c1_188, %c0_189, %c0_190] : memref<2x1x32xf32, #tpu.memory_space<vmem>>, vector<1x1x32xf32>
    %367 = vector.shape_cast %366 : vector<1x1x32xf32> to vector<1x32xf32>
    %cst_191 = arith.constant dense<0.000000e+00> : vector<16x32xf32>
    %368 = tpu.matmul %348, %353, %cst_191 {dimension_numbers = #tpu.dot_dimension_numbers<[1], [0], [0], [1], [0, 0, 1, 1], [], []>} : vector<16x32xf32>, vector<32x32xf32>, vector<16x32xf32> -> vector<16x32xf32>
    %369 = vector.broadcast %355 : vector<1x32xf32> to vector<16x32xf32>
    %370 = arith.addf %368, %369 : vector<16x32xf32>
    %cst_192 = arith.constant dense<0.000000e+00> : vector<16x32xf32>
    %371 = tpu.matmul %348, %357, %cst_192 {dimension_numbers = #tpu.dot_dimension_numbers<[1], [0], [0], [1], [0, 0, 1, 1], [], []>} : vector<16x32xf32>, vector<32x32xf32>, vector<16x32xf32> -> vector<16x32xf32>
    %372 = vector.broadcast %359 : vector<1x32xf32> to vector<16x32xf32>
    %373 = arith.addf %371, %372 : vector<16x32xf32>
    %cst_193 = arith.constant dense<0.000000e+00> : vector<16x32xf32>
    %374 = tpu.matmul %348, %361, %cst_193 {dimension_numbers = #tpu.dot_dimension_numbers<[1], [0], [0], [1], [0, 0, 1, 1], [], []>} : vector<16x32xf32>, vector<32x32xf32>, vector<16x32xf32> -> vector<16x32xf32>
    %375 = vector.broadcast %363 : vector<1x32xf32> to vector<16x32xf32>
    %376 = arith.addf %374, %375 : vector<16x32xf32>
    %377 = vector.extract_strided_slice %370 {offsets = [0, 0], sizes = [16, 8], strides = [1, 1]} : vector<16x32xf32> to vector<16x8xf32>
    %378 = vector.shape_cast %377 : vector<16x8xf32> to vector<2x8x8xf32>
    %379 = vector.extract_strided_slice %373 {offsets = [0, 0], sizes = [16, 8], strides = [1, 1]} : vector<16x32xf32> to vector<16x8xf32>
    %380 = vector.shape_cast %379 : vector<16x8xf32> to vector<2x8x8xf32>
    %381 = vector.extract_strided_slice %376 {offsets = [0, 0], sizes = [16, 8], strides = [1, 1]} : vector<16x32xf32> to vector<16x8xf32>
    %382 = vector.shape_cast %381 : vector<16x8xf32> to vector<2x8x8xf32>
    "tpu.trace_start"() <{level = 10 : i32, message = "bqd,bkd->bqk"}> : () -> ()
    %cst_194 = arith.constant dense<0.000000e+00> : vector<2x8x8xf32>
    %383 = tpu.matmul %378, %380, %cst_194 {dimension_numbers = #tpu.dot_dimension_numbers<[2], [2], [1], [1], [0, 0, 0, 1, 1, 1], [0], [0]>} : vector<2x8x8xf32>, vector<2x8x8xf32>, vector<2x8x8xf32> -> vector<2x8x8xf32>
    "tpu.trace_stop"() : () -> ()
    %384 = arith.addf %383, %2 : vector<2x8x8xf32>
    %cst_195 = arith.constant dense<0xFF800000> : vector<2x8xf32>
    %385 = vector.multi_reduction <maximumf>, %384, %cst_195 [2] : vector<2x8x8xf32> to vector<2x8xf32>
    %386 = vector.shape_cast %385 : vector<2x8xf32> to vector<2x8x1xf32>
    %387 = vector.broadcast %386 : vector<2x8x1xf32> to vector<2x8x8xf32>
    %388 = arith.subf %384, %387 : vector<2x8x8xf32>
    %389 = math.exp %388 : vector<2x8x8xf32>
    %cst_196 = arith.constant dense<0.000000e+00> : vector<2x8xf32>
    %390 = vector.multi_reduction <add>, %389, %cst_196 [2] : vector<2x8x8xf32> to vector<2x8xf32>
    %391 = vector.shape_cast %390 : vector<2x8xf32> to vector<2x8x1xf32>
    %392 = vector.broadcast %391 : vector<2x8x1xf32> to vector<2x8x8xf32>
    %393 = arith.divf %389, %392 : vector<2x8x8xf32>
    "tpu.trace_start"() <{level = 10 : i32, message = "bqk,bkd->bqd"}> : () -> ()
    %cst_197 = arith.constant dense<0.000000e+00> : vector<2x8x8xf32>
    %394 = tpu.matmul %393, %382, %cst_197 {dimension_numbers = #tpu.dot_dimension_numbers<[2], [1], [1], [2], [0, 0, 0, 1, 1, 2], [0], [0]>} : vector<2x8x8xf32>, vector<2x8x8xf32>, vector<2x8x8xf32> -> vector<2x8x8xf32>
    "tpu.trace_stop"() : () -> ()
    %395 = vector.extract_strided_slice %370 {offsets = [0, 8], sizes = [16, 8], strides = [1, 1]} : vector<16x32xf32> to vector<16x8xf32>
    %396 = vector.shape_cast %395 : vector<16x8xf32> to vector<2x8x8xf32>
    %397 = vector.extract_strided_slice %373 {offsets = [0, 8], sizes = [16, 8], strides = [1, 1]} : vector<16x32xf32> to vector<16x8xf32>
    %398 = vector.shape_cast %397 : vector<16x8xf32> to vector<2x8x8xf32>
    %399 = vector.extract_strided_slice %376 {offsets = [0, 8], sizes = [16, 8], strides = [1, 1]} : vector<16x32xf32> to vector<16x8xf32>
    %400 = vector.shape_cast %399 : vector<16x8xf32> to vector<2x8x8xf32>
    "tpu.trace_start"() <{level = 10 : i32, message = "bqd,bkd->bqk"}> : () -> ()
    %cst_198 = arith.constant dense<0.000000e+00> : vector<2x8x8xf32>
    %401 = tpu.matmul %396, %398, %cst_198 {dimension_numbers = #tpu.dot_dimension_numbers<[2], [2], [1], [1], [0, 0, 0, 1, 1, 1], [0], [0]>} : vector<2x8x8xf32>, vector<2x8x8xf32>, vector<2x8x8xf32> -> vector<2x8x8xf32>
    "tpu.trace_stop"() : () -> ()
    %402 = arith.addf %401, %2 : vector<2x8x8xf32>
    %cst_199 = arith.constant dense<0xFF800000> : vector<2x8xf32>
    %403 = vector.multi_reduction <maximumf>, %402, %cst_199 [2] : vector<2x8x8xf32> to vector<2x8xf32>
    %404 = vector.shape_cast %403 : vector<2x8xf32> to vector<2x8x1xf32>
    %405 = vector.broadcast %404 : vector<2x8x1xf32> to vector<2x8x8xf32>
    %406 = arith.subf %402, %405 : vector<2x8x8xf32>
    %407 = math.exp %406 : vector<2x8x8xf32>
    %cst_200 = arith.constant dense<0.000000e+00> : vector<2x8xf32>
    %408 = vector.multi_reduction <add>, %407, %cst_200 [2] : vector<2x8x8xf32> to vector<2x8xf32>
    %409 = vector.shape_cast %408 : vector<2x8xf32> to vector<2x8x1xf32>
    %410 = vector.broadcast %409 : vector<2x8x1xf32> to vector<2x8x8xf32>
    %411 = arith.divf %407, %410 : vector<2x8x8xf32>
    "tpu.trace_start"() <{level = 10 : i32, message = "bqk,bkd->bqd"}> : () -> ()
    %cst_201 = arith.constant dense<0.000000e+00> : vector<2x8x8xf32>
    %412 = tpu.matmul %411, %400, %cst_201 {dimension_numbers = #tpu.dot_dimension_numbers<[2], [1], [1], [2], [0, 0, 0, 1, 1, 2], [0], [0]>} : vector<2x8x8xf32>, vector<2x8x8xf32>, vector<2x8x8xf32> -> vector<2x8x8xf32>
    "tpu.trace_stop"() : () -> ()
    %413 = vector.extract_strided_slice %370 {offsets = [0, 16], sizes = [16, 8], strides = [1, 1]} : vector<16x32xf32> to vector<16x8xf32>
    %414 = vector.shape_cast %413 : vector<16x8xf32> to vector<2x8x8xf32>
    %415 = vector.extract_strided_slice %373 {offsets = [0, 16], sizes = [16, 8], strides = [1, 1]} : vector<16x32xf32> to vector<16x8xf32>
    %416 = vector.shape_cast %415 : vector<16x8xf32> to vector<2x8x8xf32>
    %417 = vector.extract_strided_slice %376 {offsets = [0, 16], sizes = [16, 8], strides = [1, 1]} : vector<16x32xf32> to vector<16x8xf32>
    %418 = vector.shape_cast %417 : vector<16x8xf32> to vector<2x8x8xf32>
    "tpu.trace_start"() <{level = 10 : i32, message = "bqd,bkd->bqk"}> : () -> ()
    %cst_202 = arith.constant dense<0.000000e+00> : vector<2x8x8xf32>
    %419 = tpu.matmul %414, %416, %cst_202 {dimension_numbers = #tpu.dot_dimension_numbers<[2], [2], [1], [1], [0, 0, 0, 1, 1, 1], [0], [0]>} : vector<2x8x8xf32>, vector<2x8x8xf32>, vector<2x8x8xf32> -> vector<2x8x8xf32>
    "tpu.trace_stop"() : () -> ()
    %420 = arith.addf %419, %2 : vector<2x8x8xf32>
    %cst_203 = arith.constant dense<0xFF800000> : vector<2x8xf32>
    %421 = vector.multi_reduction <maximumf>, %420, %cst_203 [2] : vector<2x8x8xf32> to vector<2x8xf32>
    %422 = vector.shape_cast %421 : vector<2x8xf32> to vector<2x8x1xf32>
    %423 = vector.broadcast %422 : vector<2x8x1xf32> to vector<2x8x8xf32>
    %424 = arith.subf %420, %423 : vector<2x8x8xf32>
    %425 = math.exp %424 : vector<2x8x8xf32>
    %cst_204 = arith.constant dense<0.000000e+00> : vector<2x8xf32>
    %426 = vector.multi_reduction <add>, %425, %cst_204 [2] : vector<2x8x8xf32> to vector<2x8xf32>
    %427 = vector.shape_cast %426 : vector<2x8xf32> to vector<2x8x1xf32>
    %428 = vector.broadcast %427 : vector<2x8x1xf32> to vector<2x8x8xf32>
    %429 = arith.divf %425, %428 : vector<2x8x8xf32>
    "tpu.trace_start"() <{level = 10 : i32, message = "bqk,bkd->bqd"}> : () -> ()
    %cst_205 = arith.constant dense<0.000000e+00> : vector<2x8x8xf32>
    %430 = tpu.matmul %429, %418, %cst_205 {dimension_numbers = #tpu.dot_dimension_numbers<[2], [1], [1], [2], [0, 0, 0, 1, 1, 2], [0], [0]>} : vector<2x8x8xf32>, vector<2x8x8xf32>, vector<2x8x8xf32> -> vector<2x8x8xf32>
    "tpu.trace_stop"() : () -> ()
    %431 = vector.extract_strided_slice %370 {offsets = [0, 24], sizes = [16, 8], strides = [1, 1]} : vector<16x32xf32> to vector<16x8xf32>
    %432 = vector.shape_cast %431 : vector<16x8xf32> to vector<2x8x8xf32>
    %433 = vector.extract_strided_slice %373 {offsets = [0, 24], sizes = [16, 8], strides = [1, 1]} : vector<16x32xf32> to vector<16x8xf32>
    %434 = vector.shape_cast %433 : vector<16x8xf32> to vector<2x8x8xf32>
    %435 = vector.extract_strided_slice %376 {offsets = [0, 24], sizes = [16, 8], strides = [1, 1]} : vector<16x32xf32> to vector<16x8xf32>
    %436 = vector.shape_cast %435 : vector<16x8xf32> to vector<2x8x8xf32>
    "tpu.trace_start"() <{level = 10 : i32, message = "bqd,bkd->bqk"}> : () -> ()
    %cst_206 = arith.constant dense<0.000000e+00> : vector<2x8x8xf32>
    %437 = tpu.matmul %432, %434, %cst_206 {dimension_numbers = #tpu.dot_dimension_numbers<[2], [2], [1], [1], [0, 0, 0, 1, 1, 1], [0], [0]>} : vector<2x8x8xf32>, vector<2x8x8xf32>, vector<2x8x8xf32> -> vector<2x8x8xf32>
    "tpu.trace_stop"() : () -> ()
    %438 = arith.addf %437, %2 : vector<2x8x8xf32>
    %cst_207 = arith.constant dense<0xFF800000> : vector<2x8xf32>
    %439 = vector.multi_reduction <maximumf>, %438, %cst_207 [2] : vector<2x8x8xf32> to vector<2x8xf32>
    %440 = vector.shape_cast %439 : vector<2x8xf32> to vector<2x8x1xf32>
    %441 = vector.broadcast %440 : vector<2x8x1xf32> to vector<2x8x8xf32>
    %442 = arith.subf %438, %441 : vector<2x8x8xf32>
    %443 = math.exp %442 : vector<2x8x8xf32>
    %cst_208 = arith.constant dense<0.000000e+00> : vector<2x8xf32>
    %444 = vector.multi_reduction <add>, %443, %cst_208 [2] : vector<2x8x8xf32> to vector<2x8xf32>
    %445 = vector.shape_cast %444 : vector<2x8xf32> to vector<2x8x1xf32>
    %446 = vector.broadcast %445 : vector<2x8x1xf32> to vector<2x8x8xf32>
    %447 = arith.divf %443, %446 : vector<2x8x8xf32>
    "tpu.trace_start"() <{level = 10 : i32, message = "bqk,bkd->bqd"}> : () -> ()
    %cst_209 = arith.constant dense<0.000000e+00> : vector<2x8x8xf32>
    %448 = tpu.matmul %447, %436, %cst_209 {dimension_numbers = #tpu.dot_dimension_numbers<[2], [1], [1], [2], [0, 0, 0, 1, 1, 2], [0], [0]>} : vector<2x8x8xf32>, vector<2x8x8xf32>, vector<2x8x8xf32> -> vector<2x8x8xf32>
    "tpu.trace_stop"() : () -> ()
    %449 = tpu.concatenate %394, %412, %430, %448 in 2 : vector<2x8x8xf32>, vector<2x8x8xf32>, vector<2x8x8xf32>, vector<2x8x8xf32> -> vector<2x8x32xf32>
    %450 = vector.shape_cast %449 : vector<2x8x32xf32> to vector<16x32xf32>
    %cst_210 = arith.constant dense<0.000000e+00> : vector<16x32xf32>
    %451 = tpu.matmul %450, %365, %cst_210 {dimension_numbers = #tpu.dot_dimension_numbers<[1], [0], [0], [1], [0, 0, 1, 1], [], []>} : vector<16x32xf32>, vector<32x32xf32>, vector<16x32xf32> -> vector<16x32xf32>
    %452 = vector.broadcast %367 : vector<1x32xf32> to vector<16x32xf32>
    %453 = arith.addf %451, %452 : vector<16x32xf32>
    %454 = arith.addf %453, %322 : vector<16x32xf32>
    %c1_211 = arith.constant 1 : index
    %c0_212 = arith.constant 0 : index
    %c0_213 = arith.constant 0 : index
    %455 = vector.load %arg14[%c1_211, %c0_212, %c0_213] : memref<2x1x32xf32, #tpu.memory_space<vmem>>, vector<1x1x32xf32>
    %456 = vector.shape_cast %455 : vector<1x1x32xf32> to vector<1x32xf32>
    %c1_214 = arith.constant 1 : index
    %c0_215 = arith.constant 0 : index
    %c0_216 = arith.constant 0 : index
    %457 = vector.load %arg15[%c1_214, %c0_215, %c0_216] : memref<2x1x32xf32, #tpu.memory_space<vmem>>, vector<1x1x32xf32>
    %458 = vector.shape_cast %457 : vector<1x1x32xf32> to vector<1x32xf32>
    %cst_217 = arith.constant dense<0.000000e+00> : vector<16xf32>
    %459 = vector.multi_reduction <add>, %454, %cst_217 [1] : vector<16x32xf32> to vector<16xf32>
    %460 = vector.shape_cast %459 : vector<16xf32> to vector<16x1xf32>
    %cst_218 = arith.constant 3.200000e+01 : f32
    %461 = vector.broadcast %cst_218 : f32 to vector<16x1xf32>
    %462 = arith.divf %460, %461 : vector<16x1xf32>
    %463 = vector.broadcast %462 : vector<16x1xf32> to vector<16x32xf32>
    %464 = arith.subf %454, %463 : vector<16x32xf32>
    %465 = arith.mulf %464, %464 : vector<16x32xf32>
    %cst_219 = arith.constant dense<0.000000e+00> : vector<16xf32>
    %466 = vector.multi_reduction <add>, %465, %cst_219 [1] : vector<16x32xf32> to vector<16xf32>
    %467 = vector.shape_cast %466 : vector<16xf32> to vector<16x1xf32>
    %cst_220 = arith.constant 3.200000e+01 : f32
    %468 = vector.broadcast %cst_220 : f32 to vector<16x1xf32>
    %469 = arith.divf %467, %468 : vector<16x1xf32>
    %470 = vector.broadcast %462 : vector<16x1xf32> to vector<16x32xf32>
    %471 = arith.subf %454, %470 : vector<16x32xf32>
    %cst_221 = arith.constant 9.99999997E-7 : f32
    %472 = vector.broadcast %cst_221 : f32 to vector<16x1xf32>
    %473 = arith.addf %469, %472 : vector<16x1xf32>
    %474 = math.rsqrt %473 : vector<16x1xf32>
    %475 = vector.broadcast %474 : vector<16x1xf32> to vector<16x32xf32>
    %476 = arith.mulf %471, %475 : vector<16x32xf32>
    %477 = vector.broadcast %456 : vector<1x32xf32> to vector<16x32xf32>
    %478 = arith.mulf %476, %477 : vector<16x32xf32>
    %479 = vector.broadcast %458 : vector<1x32xf32> to vector<16x32xf32>
    %480 = arith.addf %478, %479 : vector<16x32xf32>
    %c1_222 = arith.constant 1 : index
    %c0_223 = arith.constant 0 : index
    %c0_224 = arith.constant 0 : index
    %481 = vector.load %arg16[%c1_222, %c0_223, %c0_224] : memref<2x32x32xf32, #tpu.memory_space<vmem>>, vector<1x32x32xf32>
    %482 = vector.shape_cast %481 : vector<1x32x32xf32> to vector<32x32xf32>
    %c1_225 = arith.constant 1 : index
    %c0_226 = arith.constant 0 : index
    %c0_227 = arith.constant 0 : index
    %483 = vector.load %arg17[%c1_225, %c0_226, %c0_227] : memref<2x1x32xf32, #tpu.memory_space<vmem>>, vector<1x1x32xf32>
    %484 = vector.shape_cast %483 : vector<1x1x32xf32> to vector<1x32xf32>
    %c1_228 = arith.constant 1 : index
    %c0_229 = arith.constant 0 : index
    %c0_230 = arith.constant 0 : index
    %485 = vector.load %arg18[%c1_228, %c0_229, %c0_230] : memref<2x32x32xf32, #tpu.memory_space<vmem>>, vector<1x32x32xf32>
    %486 = vector.shape_cast %485 : vector<1x32x32xf32> to vector<32x32xf32>
    %c1_231 = arith.constant 1 : index
    %c0_232 = arith.constant 0 : index
    %c0_233 = arith.constant 0 : index
    %487 = vector.load %arg19[%c1_231, %c0_232, %c0_233] : memref<2x1x32xf32, #tpu.memory_space<vmem>>, vector<1x1x32xf32>
    %488 = vector.shape_cast %487 : vector<1x1x32xf32> to vector<1x32xf32>
    %c1_234 = arith.constant 1 : index
    %c0_235 = arith.constant 0 : index
    %c0_236 = arith.constant 0 : index
    %489 = vector.load %arg20[%c1_234, %c0_235, %c0_236] : memref<2x32x32xf32, #tpu.memory_space<vmem>>, vector<1x32x32xf32>
    %490 = vector.shape_cast %489 : vector<1x32x32xf32> to vector<32x32xf32>
    %c1_237 = arith.constant 1 : index
    %c0_238 = arith.constant 0 : index
    %c0_239 = arith.constant 0 : index
    %491 = vector.load %arg21[%c1_237, %c0_238, %c0_239] : memref<2x1x32xf32, #tpu.memory_space<vmem>>, vector<1x1x32xf32>
    %492 = vector.shape_cast %491 : vector<1x1x32xf32> to vector<1x32xf32>
    %c1_240 = arith.constant 1 : index
    %c0_241 = arith.constant 0 : index
    %c0_242 = arith.constant 0 : index
    %493 = vector.load %arg22[%c1_240, %c0_241, %c0_242] : memref<2x32x32xf32, #tpu.memory_space<vmem>>, vector<1x32x32xf32>
    %494 = vector.shape_cast %493 : vector<1x32x32xf32> to vector<32x32xf32>
    %c1_243 = arith.constant 1 : index
    %c0_244 = arith.constant 0 : index
    %c0_245 = arith.constant 0 : index
    %495 = vector.load %arg23[%c1_243, %c0_244, %c0_245] : memref<2x1x32xf32, #tpu.memory_space<vmem>>, vector<1x1x32xf32>
    %496 = vector.shape_cast %495 : vector<1x1x32xf32> to vector<1x32xf32>
    %cst_246 = arith.constant dense<0.000000e+00> : vector<16x32xf32>
    %497 = tpu.matmul %480, %482, %cst_246 {dimension_numbers = #tpu.dot_dimension_numbers<[1], [0], [0], [1], [0, 0, 1, 1], [], []>} : vector<16x32xf32>, vector<32x32xf32>, vector<16x32xf32> -> vector<16x32xf32>
    %498 = vector.broadcast %484 : vector<1x32xf32> to vector<16x32xf32>
    %499 = arith.addf %497, %498 : vector<16x32xf32>
    %cst_247 = arith.constant dense<0.000000e+00> : vector<32x32xf32>
    %500 = tpu.matmul %1, %486, %cst_247 {dimension_numbers = #tpu.dot_dimension_numbers<[1], [0], [0], [1], [0, 0, 1, 1], [], []>} : vector<32x32xf32>, vector<32x32xf32>, vector<32x32xf32> -> vector<32x32xf32>
    %501 = vector.broadcast %488 : vector<1x32xf32> to vector<32x32xf32>
    %502 = arith.addf %500, %501 : vector<32x32xf32>
    %cst_248 = arith.constant dense<0.000000e+00> : vector<32x32xf32>
    %503 = tpu.matmul %1, %490, %cst_248 {dimension_numbers = #tpu.dot_dimension_numbers<[1], [0], [0], [1], [0, 0, 1, 1], [], []>} : vector<32x32xf32>, vector<32x32xf32>, vector<32x32xf32> -> vector<32x32xf32>
    %504 = vector.broadcast %492 : vector<1x32xf32> to vector<32x32xf32>
    %505 = arith.addf %503, %504 : vector<32x32xf32>
    %506 = vector.extract_strided_slice %499 {offsets = [0, 0], sizes = [16, 8], strides = [1, 1]} : vector<16x32xf32> to vector<16x8xf32>
    %507 = vector.shape_cast %506 : vector<16x8xf32> to vector<2x8x8xf32>
    %508 = vector.extract_strided_slice %502 {offsets = [0, 0], sizes = [32, 8], strides = [1, 1]} : vector<32x32xf32> to vector<32x8xf32>
    %509 = vector.shape_cast %508 : vector<32x8xf32> to vector<2x16x8xf32>
    %510 = vector.extract_strided_slice %505 {offsets = [0, 0], sizes = [32, 8], strides = [1, 1]} : vector<32x32xf32> to vector<32x8xf32>
    %511 = vector.shape_cast %510 : vector<32x8xf32> to vector<2x16x8xf32>
    "tpu.trace_start"() <{level = 10 : i32, message = "bqd,bkd->bqk"}> : () -> ()
    %cst_249 = arith.constant dense<0.000000e+00> : vector<2x8x16xf32>
    %512 = tpu.matmul %507, %509, %cst_249 {dimension_numbers = #tpu.dot_dimension_numbers<[2], [2], [1], [1], [0, 0, 0, 1, 1, 1], [0], [0]>} : vector<2x8x8xf32>, vector<2x16x8xf32>, vector<2x8x16xf32> -> vector<2x8x16xf32>
    "tpu.trace_stop"() : () -> ()
    %513 = arith.addf %512, %3 : vector<2x8x16xf32>
    %cst_250 = arith.constant dense<0xFF800000> : vector<2x8xf32>
    %514 = vector.multi_reduction <maximumf>, %513, %cst_250 [2] : vector<2x8x16xf32> to vector<2x8xf32>
    %515 = vector.shape_cast %514 : vector<2x8xf32> to vector<2x8x1xf32>
    %516 = vector.broadcast %515 : vector<2x8x1xf32> to vector<2x8x16xf32>
    %517 = arith.subf %513, %516 : vector<2x8x16xf32>
    %518 = math.exp %517 : vector<2x8x16xf32>
    %cst_251 = arith.constant dense<0.000000e+00> : vector<2x8xf32>
    %519 = vector.multi_reduction <add>, %518, %cst_251 [2] : vector<2x8x16xf32> to vector<2x8xf32>
    %520 = vector.shape_cast %519 : vector<2x8xf32> to vector<2x8x1xf32>
    %521 = vector.broadcast %520 : vector<2x8x1xf32> to vector<2x8x16xf32>
    %522 = arith.divf %518, %521 : vector<2x8x16xf32>
    "tpu.trace_start"() <{level = 10 : i32, message = "bqk,bkd->bqd"}> : () -> ()
    %cst_252 = arith.constant dense<0.000000e+00> : vector<2x8x8xf32>
    %523 = tpu.matmul %522, %511, %cst_252 {dimension_numbers = #tpu.dot_dimension_numbers<[2], [1], [1], [2], [0, 0, 0, 1, 1, 2], [0], [0]>} : vector<2x8x16xf32>, vector<2x16x8xf32>, vector<2x8x8xf32> -> vector<2x8x8xf32>
    "tpu.trace_stop"() : () -> ()
    %524 = vector.extract_strided_slice %499 {offsets = [0, 8], sizes = [16, 8], strides = [1, 1]} : vector<16x32xf32> to vector<16x8xf32>
    %525 = vector.shape_cast %524 : vector<16x8xf32> to vector<2x8x8xf32>
    %526 = vector.extract_strided_slice %502 {offsets = [0, 8], sizes = [32, 8], strides = [1, 1]} : vector<32x32xf32> to vector<32x8xf32>
    %527 = vector.shape_cast %526 : vector<32x8xf32> to vector<2x16x8xf32>
    %528 = vector.extract_strided_slice %505 {offsets = [0, 8], sizes = [32, 8], strides = [1, 1]} : vector<32x32xf32> to vector<32x8xf32>
    %529 = vector.shape_cast %528 : vector<32x8xf32> to vector<2x16x8xf32>
    "tpu.trace_start"() <{level = 10 : i32, message = "bqd,bkd->bqk"}> : () -> ()
    %cst_253 = arith.constant dense<0.000000e+00> : vector<2x8x16xf32>
    %530 = tpu.matmul %525, %527, %cst_253 {dimension_numbers = #tpu.dot_dimension_numbers<[2], [2], [1], [1], [0, 0, 0, 1, 1, 1], [0], [0]>} : vector<2x8x8xf32>, vector<2x16x8xf32>, vector<2x8x16xf32> -> vector<2x8x16xf32>
    "tpu.trace_stop"() : () -> ()
    %531 = arith.addf %530, %3 : vector<2x8x16xf32>
    %cst_254 = arith.constant dense<0xFF800000> : vector<2x8xf32>
    %532 = vector.multi_reduction <maximumf>, %531, %cst_254 [2] : vector<2x8x16xf32> to vector<2x8xf32>
    %533 = vector.shape_cast %532 : vector<2x8xf32> to vector<2x8x1xf32>
    %534 = vector.broadcast %533 : vector<2x8x1xf32> to vector<2x8x16xf32>
    %535 = arith.subf %531, %534 : vector<2x8x16xf32>
    %536 = math.exp %535 : vector<2x8x16xf32>
    %cst_255 = arith.constant dense<0.000000e+00> : vector<2x8xf32>
    %537 = vector.multi_reduction <add>, %536, %cst_255 [2] : vector<2x8x16xf32> to vector<2x8xf32>
    %538 = vector.shape_cast %537 : vector<2x8xf32> to vector<2x8x1xf32>
    %539 = vector.broadcast %538 : vector<2x8x1xf32> to vector<2x8x16xf32>
    %540 = arith.divf %536, %539 : vector<2x8x16xf32>
    "tpu.trace_start"() <{level = 10 : i32, message = "bqk,bkd->bqd"}> : () -> ()
    %cst_256 = arith.constant dense<0.000000e+00> : vector<2x8x8xf32>
    %541 = tpu.matmul %540, %529, %cst_256 {dimension_numbers = #tpu.dot_dimension_numbers<[2], [1], [1], [2], [0, 0, 0, 1, 1, 2], [0], [0]>} : vector<2x8x16xf32>, vector<2x16x8xf32>, vector<2x8x8xf32> -> vector<2x8x8xf32>
    "tpu.trace_stop"() : () -> ()
    %542 = vector.extract_strided_slice %499 {offsets = [0, 16], sizes = [16, 8], strides = [1, 1]} : vector<16x32xf32> to vector<16x8xf32>
    %543 = vector.shape_cast %542 : vector<16x8xf32> to vector<2x8x8xf32>
    %544 = vector.extract_strided_slice %502 {offsets = [0, 16], sizes = [32, 8], strides = [1, 1]} : vector<32x32xf32> to vector<32x8xf32>
    %545 = vector.shape_cast %544 : vector<32x8xf32> to vector<2x16x8xf32>
    %546 = vector.extract_strided_slice %505 {offsets = [0, 16], sizes = [32, 8], strides = [1, 1]} : vector<32x32xf32> to vector<32x8xf32>
    %547 = vector.shape_cast %546 : vector<32x8xf32> to vector<2x16x8xf32>
    "tpu.trace_start"() <{level = 10 : i32, message = "bqd,bkd->bqk"}> : () -> ()
    %cst_257 = arith.constant dense<0.000000e+00> : vector<2x8x16xf32>
    %548 = tpu.matmul %543, %545, %cst_257 {dimension_numbers = #tpu.dot_dimension_numbers<[2], [2], [1], [1], [0, 0, 0, 1, 1, 1], [0], [0]>} : vector<2x8x8xf32>, vector<2x16x8xf32>, vector<2x8x16xf32> -> vector<2x8x16xf32>
    "tpu.trace_stop"() : () -> ()
    %549 = arith.addf %548, %3 : vector<2x8x16xf32>
    %cst_258 = arith.constant dense<0xFF800000> : vector<2x8xf32>
    %550 = vector.multi_reduction <maximumf>, %549, %cst_258 [2] : vector<2x8x16xf32> to vector<2x8xf32>
    %551 = vector.shape_cast %550 : vector<2x8xf32> to vector<2x8x1xf32>
    %552 = vector.broadcast %551 : vector<2x8x1xf32> to vector<2x8x16xf32>
    %553 = arith.subf %549, %552 : vector<2x8x16xf32>
    %554 = math.exp %553 : vector<2x8x16xf32>
    %cst_259 = arith.constant dense<0.000000e+00> : vector<2x8xf32>
    %555 = vector.multi_reduction <add>, %554, %cst_259 [2] : vector<2x8x16xf32> to vector<2x8xf32>
    %556 = vector.shape_cast %555 : vector<2x8xf32> to vector<2x8x1xf32>
    %557 = vector.broadcast %556 : vector<2x8x1xf32> to vector<2x8x16xf32>
    %558 = arith.divf %554, %557 : vector<2x8x16xf32>
    "tpu.trace_start"() <{level = 10 : i32, message = "bqk,bkd->bqd"}> : () -> ()
    %cst_260 = arith.constant dense<0.000000e+00> : vector<2x8x8xf32>
    %559 = tpu.matmul %558, %547, %cst_260 {dimension_numbers = #tpu.dot_dimension_numbers<[2], [1], [1], [2], [0, 0, 0, 1, 1, 2], [0], [0]>} : vector<2x8x16xf32>, vector<2x16x8xf32>, vector<2x8x8xf32> -> vector<2x8x8xf32>
    "tpu.trace_stop"() : () -> ()
    %560 = vector.extract_strided_slice %499 {offsets = [0, 24], sizes = [16, 8], strides = [1, 1]} : vector<16x32xf32> to vector<16x8xf32>
    %561 = vector.shape_cast %560 : vector<16x8xf32> to vector<2x8x8xf32>
    %562 = vector.extract_strided_slice %502 {offsets = [0, 24], sizes = [32, 8], strides = [1, 1]} : vector<32x32xf32> to vector<32x8xf32>
    %563 = vector.shape_cast %562 : vector<32x8xf32> to vector<2x16x8xf32>
    %564 = vector.extract_strided_slice %505 {offsets = [0, 24], sizes = [32, 8], strides = [1, 1]} : vector<32x32xf32> to vector<32x8xf32>
    %565 = vector.shape_cast %564 : vector<32x8xf32> to vector<2x16x8xf32>
    "tpu.trace_start"() <{level = 10 : i32, message = "bqd,bkd->bqk"}> : () -> ()
    %cst_261 = arith.constant dense<0.000000e+00> : vector<2x8x16xf32>
    %566 = tpu.matmul %561, %563, %cst_261 {dimension_numbers = #tpu.dot_dimension_numbers<[2], [2], [1], [1], [0, 0, 0, 1, 1, 1], [0], [0]>} : vector<2x8x8xf32>, vector<2x16x8xf32>, vector<2x8x16xf32> -> vector<2x8x16xf32>
    "tpu.trace_stop"() : () -> ()
    %567 = arith.addf %566, %3 : vector<2x8x16xf32>
    %cst_262 = arith.constant dense<0xFF800000> : vector<2x8xf32>
    %568 = vector.multi_reduction <maximumf>, %567, %cst_262 [2] : vector<2x8x16xf32> to vector<2x8xf32>
    %569 = vector.shape_cast %568 : vector<2x8xf32> to vector<2x8x1xf32>
    %570 = vector.broadcast %569 : vector<2x8x1xf32> to vector<2x8x16xf32>
    %571 = arith.subf %567, %570 : vector<2x8x16xf32>
    %572 = math.exp %571 : vector<2x8x16xf32>
    %cst_263 = arith.constant dense<0.000000e+00> : vector<2x8xf32>
    %573 = vector.multi_reduction <add>, %572, %cst_263 [2] : vector<2x8x16xf32> to vector<2x8xf32>
    %574 = vector.shape_cast %573 : vector<2x8xf32> to vector<2x8x1xf32>
    %575 = vector.broadcast %574 : vector<2x8x1xf32> to vector<2x8x16xf32>
    %576 = arith.divf %572, %575 : vector<2x8x16xf32>
    "tpu.trace_start"() <{level = 10 : i32, message = "bqk,bkd->bqd"}> : () -> ()
    %cst_264 = arith.constant dense<0.000000e+00> : vector<2x8x8xf32>
    %577 = tpu.matmul %576, %565, %cst_264 {dimension_numbers = #tpu.dot_dimension_numbers<[2], [1], [1], [2], [0, 0, 0, 1, 1, 2], [0], [0]>} : vector<2x8x16xf32>, vector<2x16x8xf32>, vector<2x8x8xf32> -> vector<2x8x8xf32>
    "tpu.trace_stop"() : () -> ()
    %578 = tpu.concatenate %523, %541, %559, %577 in 2 : vector<2x8x8xf32>, vector<2x8x8xf32>, vector<2x8x8xf32>, vector<2x8x8xf32> -> vector<2x8x32xf32>
    %579 = vector.shape_cast %578 : vector<2x8x32xf32> to vector<16x32xf32>
    %cst_265 = arith.constant dense<0.000000e+00> : vector<16x32xf32>
    %580 = tpu.matmul %579, %494, %cst_265 {dimension_numbers = #tpu.dot_dimension_numbers<[1], [0], [0], [1], [0, 0, 1, 1], [], []>} : vector<16x32xf32>, vector<32x32xf32>, vector<16x32xf32> -> vector<16x32xf32>
    %581 = vector.broadcast %496 : vector<1x32xf32> to vector<16x32xf32>
    %582 = arith.addf %580, %581 : vector<16x32xf32>
    %583 = tpu.concatenate %522, %540, %558, %576 in 2 : vector<2x8x16xf32>, vector<2x8x16xf32>, vector<2x8x16xf32>, vector<2x8x16xf32> -> vector<2x8x64xf32>
    %c1_266 = arith.constant 1 : index
    %c0_267 = arith.constant 0 : index
    %c0_268 = arith.constant 0 : index
    %c0_269 = arith.constant 0 : index
    %584 = vector.load %arg33[%c1_266, %c0_267, %c0_268, %c0_269] : memref<2x2x8x64xf32, #tpu.memory_space<vmem>>, vector<1x2x8x64xf32>
    %585 = vector.shape_cast %584 : vector<1x2x8x64xf32> to vector<2x8x64xf32>
    %586 = vector.shape_cast %583 : vector<2x8x64xf32> to vector<1x2x8x64xf32>
    tpu.vector_store %arg33[%c1_266, %c0_267, %c0_268, %c0_269], %586 {strides = array<i32>} : memref<2x2x8x64xf32, #tpu.memory_space<vmem>>, vector<1x2x8x64xf32>,
    %587 = arith.addf %582, %454 : vector<16x32xf32>
    %c1_270 = arith.constant 1 : index
    %c0_271 = arith.constant 0 : index
    %c0_272 = arith.constant 0 : index
    %588 = vector.load %arg24[%c1_270, %c0_271, %c0_272] : memref<2x1x32xf32, #tpu.memory_space<vmem>>, vector<1x1x32xf32>
    %589 = vector.shape_cast %588 : vector<1x1x32xf32> to vector<1x32xf32>
    %c1_273 = arith.constant 1 : index
    %c0_274 = arith.constant 0 : index
    %c0_275 = arith.constant 0 : index
    %590 = vector.load %arg25[%c1_273, %c0_274, %c0_275] : memref<2x1x32xf32, #tpu.memory_space<vmem>>, vector<1x1x32xf32>
    %591 = vector.shape_cast %590 : vector<1x1x32xf32> to vector<1x32xf32>
    %cst_276 = arith.constant dense<0.000000e+00> : vector<16xf32>
    %592 = vector.multi_reduction <add>, %587, %cst_276 [1] : vector<16x32xf32> to vector<16xf32>
    %593 = vector.shape_cast %592 : vector<16xf32> to vector<16x1xf32>
    %cst_277 = arith.constant 3.200000e+01 : f32
    %594 = vector.broadcast %cst_277 : f32 to vector<16x1xf32>
    %595 = arith.divf %593, %594 : vector<16x1xf32>
    %596 = vector.broadcast %595 : vector<16x1xf32> to vector<16x32xf32>
    %597 = arith.subf %587, %596 : vector<16x32xf32>
    %598 = arith.mulf %597, %597 : vector<16x32xf32>
    %cst_278 = arith.constant dense<0.000000e+00> : vector<16xf32>
    %599 = vector.multi_reduction <add>, %598, %cst_278 [1] : vector<16x32xf32> to vector<16xf32>
    %600 = vector.shape_cast %599 : vector<16xf32> to vector<16x1xf32>
    %cst_279 = arith.constant 3.200000e+01 : f32
    %601 = vector.broadcast %cst_279 : f32 to vector<16x1xf32>
    %602 = arith.divf %600, %601 : vector<16x1xf32>
    %603 = vector.broadcast %595 : vector<16x1xf32> to vector<16x32xf32>
    %604 = arith.subf %587, %603 : vector<16x32xf32>
    %cst_280 = arith.constant 9.99999997E-7 : f32
    %605 = vector.broadcast %cst_280 : f32 to vector<16x1xf32>
    %606 = arith.addf %602, %605 : vector<16x1xf32>
    %607 = math.rsqrt %606 : vector<16x1xf32>
    %608 = vector.broadcast %607 : vector<16x1xf32> to vector<16x32xf32>
    %609 = arith.mulf %604, %608 : vector<16x32xf32>
    %610 = vector.broadcast %589 : vector<1x32xf32> to vector<16x32xf32>
    %611 = arith.mulf %609, %610 : vector<16x32xf32>
    %612 = vector.broadcast %591 : vector<1x32xf32> to vector<16x32xf32>
    %613 = arith.addf %611, %612 : vector<16x32xf32>
    %c1_281 = arith.constant 1 : index
    %c0_282 = arith.constant 0 : index
    %c0_283 = arith.constant 0 : index
    %614 = vector.load %arg26[%c1_281, %c0_282, %c0_283] : memref<2x32x64xf32, #tpu.memory_space<vmem>>, vector<1x32x64xf32>
    %615 = vector.shape_cast %614 : vector<1x32x64xf32> to vector<32x64xf32>
    %cst_284 = arith.constant dense<0.000000e+00> : vector<16x64xf32>
    %616 = tpu.matmul %613, %615, %cst_284 {dimension_numbers = #tpu.dot_dimension_numbers<[1], [0], [0], [1], [0, 0, 1, 1], [], []>} : vector<16x32xf32>, vector<32x64xf32>, vector<16x64xf32> -> vector<16x64xf32>
    %c1_285 = arith.constant 1 : index
    %c0_286 = arith.constant 0 : index
    %c0_287 = arith.constant 0 : index
    %617 = vector.load %arg27[%c1_285, %c0_286, %c0_287] : memref<2x1x64xf32, #tpu.memory_space<vmem>>, vector<1x1x64xf32>
    %618 = vector.shape_cast %617 : vector<1x1x64xf32> to vector<1x64xf32>
    %619 = vector.broadcast %618 : vector<1x64xf32> to vector<16x64xf32>
    %620 = arith.addf %616, %619 : vector<16x64xf32>
    %cst_288 = arith.constant 5.000000e-01 : f32
    %621 = vector.broadcast %cst_288 : f32 to vector<16x64xf32>
    %622 = arith.mulf %621, %620 : vector<16x64xf32>
    %cst_289 = arith.constant 4.471500e-02 : f32
    %623 = vector.broadcast %cst_289 : f32 to vector<16x64xf32>
    %624 = arith.mulf %623, %620 : vector<16x64xf32>
    %625 = arith.mulf %624, %620 : vector<16x64xf32>
    %626 = arith.mulf %625, %620 : vector<16x64xf32>
    %627 = arith.addf %620, %626 : vector<16x64xf32>
    %cst_290 = arith.constant 0.797884583 : f32
    %628 = vector.broadcast %cst_290 : f32 to vector<16x64xf32>
    %629 = arith.mulf %628, %627 : vector<16x64xf32>
    %630 = math.tanh %629 : vector<16x64xf32>
    %cst_291 = arith.constant 1.000000e+00 : f32
    %631 = vector.broadcast %cst_291 : f32 to vector<16x64xf32>
    %632 = arith.addf %631, %630 : vector<16x64xf32>
    %633 = arith.mulf %622, %632 : vector<16x64xf32>
    %c1_292 = arith.constant 1 : index
    %c0_293 = arith.constant 0 : index
    %c0_294 = arith.constant 0 : index
    %634 = vector.load %arg28[%c1_292, %c0_293, %c0_294] : memref<2x64x32xf32, #tpu.memory_space<vmem>>, vector<1x64x32xf32>
    %635 = vector.shape_cast %634 : vector<1x64x32xf32> to vector<64x32xf32>
    %cst_295 = arith.constant dense<0.000000e+00> : vector<16x32xf32>
    %636 = tpu.matmul %633, %635, %cst_295 {dimension_numbers = #tpu.dot_dimension_numbers<[1], [0], [0], [1], [0, 0, 1, 1], [], []>} : vector<16x64xf32>, vector<64x32xf32>, vector<16x32xf32> -> vector<16x32xf32>
    %c1_296 = arith.constant 1 : index
    %c0_297 = arith.constant 0 : index
    %c0_298 = arith.constant 0 : index
    %637 = vector.load %arg29[%c1_296, %c0_297, %c0_298] : memref<2x1x32xf32, #tpu.memory_space<vmem>>, vector<1x1x32xf32>
    %638 = vector.shape_cast %637 : vector<1x1x32xf32> to vector<1x32xf32>
    %639 = vector.broadcast %638 : vector<1x32xf32> to vector<16x32xf32>
    %640 = arith.addf %636, %639 : vector<16x32xf32>
    %641 = arith.addf %640, %587 : vector<16x32xf32>
    %c0_299 = arith.constant 0 : index
    %c0_300 = arith.constant 0 : index
    %642 = vector.load %arg30[%c0_299, %c0_300] : memref<1x32xf32, #tpu.memory_space<vmem>>, vector<1x32xf32>
    %c0_301 = arith.constant 0 : index
    %c0_302 = arith.constant 0 : index
    %643 = vector.load %arg31[%c0_301, %c0_302] : memref<1x32xf32, #tpu.memory_space<vmem>>, vector<1x32xf32>
    %cst_303 = arith.constant dense<0.000000e+00> : vector<16xf32>
    %644 = vector.multi_reduction <add>, %641, %cst_303 [1] : vector<16x32xf32> to vector<16xf32>
    %645 = vector.shape_cast %644 : vector<16xf32> to vector<16x1xf32>
    %cst_304 = arith.constant 3.200000e+01 : f32
    %646 = vector.broadcast %cst_304 : f32 to vector<16x1xf32>
    %647 = arith.divf %645, %646 : vector<16x1xf32>
    %648 = vector.broadcast %647 : vector<16x1xf32> to vector<16x32xf32>
    %649 = arith.subf %641, %648 : vector<16x32xf32>
    %650 = arith.mulf %649, %649 : vector<16x32xf32>
    %cst_305 = arith.constant dense<0.000000e+00> : vector<16xf32>
    %651 = vector.multi_reduction <add>, %650, %cst_305 [1] : vector<16x32xf32> to vector<16xf32>
    %652 = vector.shape_cast %651 : vector<16xf32> to vector<16x1xf32>
    %cst_306 = arith.constant 3.200000e+01 : f32
    %653 = vector.broadcast %cst_306 : f32 to vector<16x1xf32>
    %654 = arith.divf %652, %653 : vector<16x1xf32>
    %655 = vector.broadcast %647 : vector<16x1xf32> to vector<16x32xf32>
    %656 = arith.subf %641, %655 : vector<16x32xf32>
    %cst_307 = arith.constant 9.99999997E-7 : f32
    %657 = vector.broadcast %cst_307 : f32 to vector<16x1xf32>
    %658 = arith.addf %654, %657 : vector<16x1xf32>
    %659 = math.rsqrt %658 : vector<16x1xf32>
    %660 = vector.broadcast %659 : vector<16x1xf32> to vector<16x32xf32>
    %661 = arith.mulf %656, %660 : vector<16x32xf32>
    %662 = vector.broadcast %642 : vector<1x32xf32> to vector<16x32xf32>
    %663 = arith.mulf %661, %662 : vector<16x32xf32>
    %664 = vector.broadcast %643 : vector<1x32xf32> to vector<16x32xf32>
    %665 = arith.addf %663, %664 : vector<16x32xf32>
    %c0_308 = arith.constant 0 : index
    %c0_309 = arith.constant 0 : index
    %666 = vector.load %arg32[%c0_308, %c0_309] : memref<16x32xf32, #tpu.memory_space<vmem>>, vector<16x32xf32>
    tpu.vector_store %arg32[%c0_308, %c0_309], %665 {strides = array<i32>} : memref<16x32xf32, #tpu.memory_space<vmem>>, vector<16x32xf32>,
    return
  }
}

</mosaic_0001>

<bundles_post_ra>
// kernel: tpu_custom_call.1
= control target key start
LH: loop header
LB: loop body
LE: loop exit
PB: predicated region body
PF: predicated region fallthrough
CT: control target
= control target key end

     0   :  { %s10242_s6 = smov 1   ;;  %s10243_s10 = smov 2   ;;  %s11670_s0 = inlined_call_operand.smem [shape: u32[35], index: -1, kind: input, shape index: {}] }
   0x1   :  { %s10309_s5 = sld [smem:[%s11670_s0]]   ;;  %s10244_s14 = smov 3  }
   0x2   :  { %s10314_s9 = sld [smem:[%s11670_s0 + %s10242_s6]]   ;;  %s10245_s18 = smov 4  }
   0x3   :  { %s10319_s13 = sld [smem:[%s11670_s0 + %s10243_s10]]   ;;  %s10246_s22 = smov 5  }
   0x4   :  { %s10324_s17 = sld [smem:[%s11670_s0 + %s10244_s14]]   ;;  %s10247_s26 = smov 6  }
   0x5   :  { %s10329_s21 = sld [smem:[%s11670_s0 + %s10245_s18]]   ;;  %s10248_s30 = smov 7  }
   0x6   :  { %s10334_s25 = sld [smem:[%s11670_s0 + %s10246_s22]]   ;;  %s10249_s4 = smov 8  }
   0x7   :  { %s10339_s29 = sld [smem:[%s11670_s0 + %s10247_s26]]   ;;  %s10250_s10 = smov 9  }
   0x8   :  { %s10344_s3 = sld [smem:[%s11670_s0 + %s10248_s30]]   ;;  %s10251_s15 = smov 10  }
   0x9   :  { %s10349_s8 = sld [smem:[%s11670_s0 + %s10249_s4]]   ;;  %s10252_s20 = smov 11  }
   0xa   :  { %s10354_s14 = sld [smem:[%s11670_s0 + %s10250_s10]]   ;;  %s10253_s26 = smov 12  }
   0xb   :  { %s10359_s19 = sld [smem:[%s11670_s0 + %s10251_s15]]   ;;  %s10254_s1 = smov 13  }
   0xc   :  { %11687 = sst [smem:[#allocation31_spill]] %s10334_s25  ;;  %s10255_s7 = smov 14  }
   0xd   :  { %s10364_s24 = sld [smem:[%s11670_s0 + %s10252_s20]]   ;;  %s10256_s15 = smov 15  }
   0xe   :  { %11688 = sst [smem:[#allocation32_spill]] %s10344_s3  ;;  %s10257_s22 = smov 16  }
   0xf   :  { %s10369_s30 = sld [smem:[%s11670_s0 + %s10253_s26]]   ;;  %s10258_s28 = smov 17  }
  0x10   :  { %11689 = sst [smem:[#allocation33_spill]] %s10354_s14 }
  0x11   :  { %s10374_s6 = sld [smem:[%s11670_s0 + %s10254_s1]]  }
  0x12   :  { %s10379_s12 = sld [smem:[%s11670_s0 + %s10255_s7]]   ;;  %s10259_s7 = smov 18  }
  0x13   :  { %11690 = sst [smem:[#allocation34_spill]] %s10364_s24 }
  0x14   :  { %s10384_s20 = sld [smem:[%s11670_s0 + %s10256_s15]]   ;;  %s10260_s15 = smov 19  }
  0x15   :  { %s10389_s27 = sld [smem:[%s11670_s0 + %s10257_s22]]   ;;  %s10261_s22 = smov 20  }
  0x16   :  { %s10394_s4 = sld [smem:[%s11670_s0 + %s10258_s28]]   ;;  %s10262_s28 = smov 21  }
  0x17   :  { %11691 = sst [smem:[#allocation35_spill]] %s10374_s6 }
  0x18   :  { %11692 = sst [smem:[#allocation36_spill]] %s10379_s12 }
  0x19   :  { %s10399_s12 = sld [smem:[%s11670_s0 + %s10259_s7]]   ;;  %s10263_s7 = smov 22  }
  0x1a   :  { %11693 = sst [smem:[#allocation37_spill]] %s10384_s20 }
  0x1b   :  { %s10404_s20 = sld [smem:[%s11670_s0 + %s10260_s15]]   ;;  %s10264_s15 = smov 23  }
  0x1c   :  { %11694 = sst [smem:[#allocation38_spill]] %s10394_s4 }
  0x1d   :  { %s10409_s6 = sld [smem:[%s11670_s0 + %s10261_s22]]   ;;  %s10265_s22 = smov 24  }
  0x1e   :  { %s10414_s4 = sld [smem:[%s11670_s0 + %s10262_s28]]   ;;  %s10266_s28 = smov 25  }
  0x1f   :  { %s10419_s3 = sld [smem:[%s11670_s0 + %s10263_s7]]   ;;  %s10267_s7 = smov 26  }
  0x20   :  { %s10429_s14 = sld [smem:[%s11670_s0 + %s10265_s22]]   ;;  %s10269_s22 = smov 28  }
  0x21   :  { %11695 = sst [smem:[#allocation39_spill]] %s10404_s20 }
  0x22   :  { %s10424_s20 = sld [smem:[%s11670_s0 + %s10264_s15]]   ;;  %s10268_s15 = smov 27  }
  0x23   :  { %s10439_s24 = sld [smem:[%s11670_s0 + %s10267_s7]]   ;;  %s10271_s7 = smov 30  }
  0x24   :  { %11696 = sst [smem:[#allocation40_spill]] %s10414_s4 }
  0x25   :  { %s10434_s4 = sld [smem:[%s11670_s0 + %s10266_s28]]   ;;  %s10270_s28 = smov 29  }
  0x26   :  { %11698 = sst [smem:[#allocation42_spill]] %s10429_s14 }
  0x27   :  { %s10449_s14 = sld [smem:[%s11670_s0 + %s10269_s22]]   ;;  %s10273_s22 = smov 32  }
  0x28   :  { %11697 = sst [smem:[#allocation41_spill]] %s10424_s20 }
  0x29   :  { %s10444_s20 = sld [smem:[%s11670_s0 + %s10268_s15]]   ;;  %s10272_s15 = smov 31  }
  0x2a   :  { %s10459_s25 = sld [smem:[%s11670_s0 + %s10271_s7]]   ;;  %s10275_s7 = smov 34  }
  0x2b   :  { %11699 = sst [smem:[#allocation43_spill]] %s10434_s4 }
  0x2c   :  { %s10454_s4 = sld [smem:[%s11670_s0 + %s10270_s28]]   ;;  %s10274_s28 = smov 33  }
  0x2d   :  { %11701 = sst [smem:[#allocation45_spill]] %s10449_s14 }
  0x2e   :  { %s10469_s14 = sld [smem:[%s11670_s0 + %s10273_s22]]  }
  0x2f   :  { %11700 = sst [smem:[#allocation44_spill]] %s10444_s20 }
  0x30   :  { %11703 = sst [smem:[#allocation47_spill]] %s10459_s25 }
  0x31   :  { %s10464_s20 = sld [smem:[%s11670_s0 + %s10272_s15]]  }
  0x32   :  { %11702 = sst [smem:[#allocation46_spill]] %s10454_s4 }
  0x33   :  { %s10474_s4 = sld [smem:[%s11670_s0 + %s10274_s28]]  }
  0x34   :  { %s10479_s25 = sld [smem:[%s11670_s0 + %s10275_s7]]  }
  0x35   :  { %75 = vsyncpa [#allocation3], 0 }
  0x36   :  { %76 = vsyncpa [#allocation6], 0 }
  0x37   :  { %77 = vsyncpa [#allocation9], 0 }
  0x38   :  { %78 = vsyncpa [#allocation12], 0 }
  0x39   :  { %79 = vsyncpa [#allocation15], 0 }
  0x3a   :  { %80 = vsyncpa [#allocation18], 0 }
  0x3b   :  { %81 = vsyncpa [#allocation4], 0 }
  0x3c   :  { %82 = vsyncpa [#allocation21], 0  ;;  %s10276_s15 = smov [#allocation5]   ;;  %s10277_s18 = smov [#allocation8]  }
  0x3d   :  { %s100_s16 = sshll.u32 %s10276_s15, 4  ;;  %s124_s22 = sshll.u32 %s10277_s18, 4  ;;  %s101_s16 = int_to_ptr.vmem [resolvable:$true] %s100_s16  ;;  %s10481_s22 = int_to_ptr.vmem [resolvable:$true] %s124_s22 }
  0x3e   :  { %s9940_s0 = scalar_lea.hbm %s10314_s9, 512 }
  0x3f   :  { %p9941_p0 = scmp.ne.s32.totalorder %s10314_s9, %s9940_s0  ;;  %p9944_p1 = scmp.lt.u32.totalorder %s9940_s0, %s10314_s9 }
  0x41   :  { %p9946_p2 = pnand %p9944_p1, %p9941_p0 }
  0x43   :  { %9949 = shalt.err (!%p9946_p2)
}
  0x44   :  { %s9950_s23 = scalar_lea.vmem %s101_s16, 512  ;;  %p9955_p4 = scmp.lt.s32.totalorder %s101_s16, %s101_s16 }
  0x45   :  { %p9951_p3 = scmp.ne.s32.totalorder %s101_s16, %s9950_s23  ;;  %p9956_p5 = scmp.lt.s32.totalorder %s9950_s23, %s9950_s23 }
  0x47   :  { %p9957_p6 = por %p9956_p5, %p9955_p4 }
  0x49   :  { %p9958_p7 = pnand %p9957_p6, %p9951_p3 }
  0x4b   :  { %9961 = shalt.err (!%p9958_p7)
}
  0x4c   :  { %s10278_s26 = smov 128   ;;  %s10279_s28 = smov 8  }
  0x4d   :  { %106 = dma.hbm_to_vmem [thread:$0]  %s10314_s9, 512, %s101_s16, [#allocation6], %s10278_s26, %s10278_s26, %s10279_s28  }
  0x4e   :  { %s9962_s1 = scalar_lea.hbm %s10324_s17, 256 }
  0x4f   :  { %p9963_p8 = scmp.ne.s32.totalorder %s10324_s17, %s9962_s1  ;;  %p9966_p9 = scmp.lt.u32.totalorder %s9962_s1, %s10324_s17 }
  0x51   :  { %p9968_p10 = pnand %p9966_p9, %p9963_p8 }
  0x53   :  { %9971 = shalt.err (!%p9968_p10)
}
  0x54   :  { %s9972_s2 = scalar_lea.vmem %s10481_s22, 256  ;;  %p9977_p12 = scmp.lt.s32.totalorder %s10481_s22, %s10481_s22 }
  0x55   :  { %p9973_p11 = scmp.ne.s32.totalorder %s10481_s22, %s9972_s2  ;;  %p9978_p13 = scmp.lt.s32.totalorder %s9972_s2, %s9972_s2 }
  0x57   :  { %p9979_p0 = por %p9978_p13, %p9977_p12 }
  0x59   :  { %p9980_p1 = pnand %p9979_p0, %p9973_p11 }
  0x5b   :  { %9983 = shalt.err (!%p9980_p1)
}
  0x5c   :  { %130 = dma.hbm_to_vmem [thread:$0]  %s10324_s17, 256, %s10481_s22, [#allocation9], %s10278_s26, %s10278_s26, %s10279_s28  }
  0x5d   :  { %s10280_s9 = smov [#allocation11]   ;;  %s10281_s10 = smov [#allocation14]  }
  0x5e   :  { %s170_s7 = sshll.u32 %s10280_s9, 4  ;;  %s198_s11 = sshll.u32 %s10281_s10, 4  ;;  %s171_s7 = int_to_ptr.vmem [resolvable:$true] %s170_s7  ;;  %s10502_s11 = int_to_ptr.vmem [resolvable:$true] %s198_s11 }
  0x5f   :  { %s9984_s15 = scalar_lea.hbm %s10389_s27, 1024 }
  0x60   :  { %p9985_p2 = scmp.ne.s32.totalorder %s10389_s27, %s9984_s15  ;;  %p9988_p3 = scmp.lt.u32.totalorder %s9984_s15, %s10389_s27 }
  0x62   :  { %p9990_p4 = pnand %p9988_p3, %p9985_p2 }
  0x64   :  { %9993 = shalt.err (!%p9990_p4)
}
  0x65   :  { %s9994_s16 = scalar_lea.vmem %s171_s7, 1024  ;;  %p9999_p6 = scmp.lt.s32.totalorder %s171_s7, %s171_s7 }
  0x66   :  { %p9995_p5 = scmp.ne.s32.totalorder %s171_s7, %s9994_s16  ;;  %p10000_p7 = scmp.lt.s32.totalorder %s9994_s16, %s9994_s16 }
  0x68   :  { %p10001_p8 = por %p10000_p7, %p9999_p6 }
  0x6a   :  { %p10002_p9 = pnand %p10001_p8, %p9995_p5 }
  0x6c   :  { %10005 = shalt.err (!%p10002_p9)
}
  0x6d   :  { %176 = dma.hbm_to_vmem [thread:$0]  %s10389_s27, 1024, %s171_s7, [#allocation12], %s10278_s26, %s10278_s26, %s10279_s28  }
  0x6e   :  { %s10006_s17 = scalar_lea.hbm %s10409_s6, 1024 }
  0x6f   :  { %p10007_p10 = scmp.ne.s32.totalorder %s10409_s6, %s10006_s17  ;;  %p10010_p11 = scmp.lt.u32.totalorder %s10006_s17, %s10409_s6 }
  0x71   :  { %p10012_p12 = pnand %p10010_p11, %p10007_p10 }
  0x73   :  { %10015 = shalt.err (!%p10012_p12)
}
  0x74   :  { %s10016_s18 = scalar_lea.vmem %s10502_s11, 1024  ;;  %p10021_p0 = scmp.lt.s32.totalorder %s10502_s11, %s10502_s11 }
  0x75   :  { %p10017_p13 = scmp.ne.s32.totalorder %s10502_s11, %s10016_s18  ;;  %p10022_p1 = scmp.lt.s32.totalorder %s10016_s18, %s10016_s18 }
  0x77   :  { %p10023_p2 = por %p10022_p1, %p10021_p0 }
  0x79   :  { %p10024_p3 = pnand %p10023_p2, %p10017_p13 }
  0x7b   :  { %10027 = shalt.err (!%p10024_p3)
}
  0x7c   :  { %204 = dma.hbm_to_vmem [thread:$0]  %s10409_s6, 1024, %s10502_s11, [#allocation15], %s10278_s26, %s10278_s26, %s10279_s28  }
  0x7d   :  { %s10282_s27 = smov [#allocation2]   ;;  %s10283_s0 = smov [#allocation7]  }
  0x7e   :  { %s88_s22 = sshll.u32 %s10282_s27, 4  ;;  %s112_s23 = sshll.u32 %s10283_s0, 4  ;;  %s89_s22 = int_to_ptr.vmem [resolvable:$true] %s88_s22  ;;  %s10523_s23 = int_to_ptr.vmem [resolvable:$true] %s112_s23 }
  0x7f   :  { %s10028_s1 = scalar_lea.hbm %s10309_s5, 256 }
  0x80   :  { %p10029_p4 = scmp.ne.s32.totalorder %s10309_s5, %s10028_s1  ;;  %p10032_p5 = scmp.lt.u32.totalorder %s10028_s1, %s10309_s5 }
  0x82   :  { %p10034_p6 = pnand %p10032_p5, %p10029_p4 }
  0x84   :  { %10037 = shalt.err (!%p10034_p6)
}
  0x85   :  { %s10038_s2 = scalar_lea.vmem %s89_s22, 256  ;;  %p10043_p8 = scmp.lt.s32.totalorder %s89_s22, %s89_s22 }
  0x86   :  { %p10039_p7 = scmp.ne.s32.totalorder %s89_s22, %s10038_s2  ;;  %p10044_p9 = scmp.lt.s32.totalorder %s10038_s2, %s10038_s2 }
  0x88   :  { %p10045_p10 = por %p10044_p9, %p10043_p8 }
  0x8a   :  { %p10046_p11 = pnand %p10045_p10, %p10039_p7 }
  0x8c   :  { %10049 = shalt.err (!%p10046_p11)
}
  0x8d   :  { %94 = dma.hbm_to_vmem [thread:$0]  %s10309_s5, 256, %s89_s22, [#allocation3], %s10278_s26, %s10278_s26, %s10279_s28  }
  0x8e   :  { %s10050_s6 = scalar_lea.hbm %s10319_s13, 256 }
  0x8f   :  { %p10051_p12 = scmp.ne.s32.totalorder %s10319_s13, %s10050_s6  ;;  %p10054_p13 = scmp.lt.u32.totalorder %s10050_s6, %s10319_s13 }
  0x91   :  { %p10056_p0 = pnand %p10054_p13, %p10051_p12 }
  0x93   :  { %10059 = shalt.err (!%p10056_p0)
}
  0x94   :  { %s10060_s9 = scalar_lea.vmem %s10523_s23, 256  ;;  %p10065_p2 = scmp.lt.s32.totalorder %s10523_s23, %s10523_s23 }
  0x95   :  { %p10061_p1 = scmp.ne.s32.totalorder %s10523_s23, %s10060_s9  ;;  %p10066_p3 = scmp.lt.s32.totalorder %s10060_s9, %s10060_s9 }
  0x97   :  { %p10067_p4 = por %p10066_p3, %p10065_p2 }
  0x99   :  { %p10068_p5 = pnand %p10067_p4, %p10061_p1 }
  0x9b   :  { %10071 = shalt.err (!%p10068_p5)
}
  0x9c   :  { %118 = dma.hbm_to_vmem [thread:$0]  %s10319_s13, 256, %s10523_s23, [#allocation6], %s10278_s26, %s10278_s26, %s10279_s28  }
  0x9d   :  { %s10284_s5 = smov [#allocation10]   ;;  %s10285_s10 = smov [#allocation13]  }
  0x9e   :  { %s152_s7 = sshll.u32 %s10284_s5, 4  ;;  %s184_s11 = sshll.u32 %s10285_s10, 4  ;;  %s153_s7 = int_to_ptr.vmem [resolvable:$true] %s152_s7  ;;  %s10544_s11 = int_to_ptr.vmem [resolvable:$true] %s184_s11 }
  0x9f   :  { %s10072_s15 = scalar_lea.hbm %s10369_s30, 1024 }
  0xa0   :  { %p10073_p6 = scmp.ne.s32.totalorder %s10369_s30, %s10072_s15  ;;  %p10076_p7 = scmp.lt.u32.totalorder %s10072_s15, %s10369_s30 }
  0xa2   :  { %p10078_p8 = pnand %p10076_p7, %p10073_p6 }
  0xa4   :  { %10081 = shalt.err (!%p10078_p8)
}
  0xa5   :  { %s10082_s16 = scalar_lea.vmem %s153_s7, 1024  ;;  %p10087_p10 = scmp.lt.s32.totalorder %s153_s7, %s153_s7 }
  0xa6   :  { %p10083_p9 = scmp.ne.s32.totalorder %s153_s7, %s10082_s16  ;;  %p10088_p11 = scmp.lt.s32.totalorder %s10082_s16, %s10082_s16 }
  0xa8   :  { %p10089_p12 = por %p10088_p11, %p10087_p10 }
  0xaa   :  { %p10090_p13 = pnand %p10089_p12, %p10083_p9 }
  0xac   :  { %10093 = shalt.err (!%p10090_p13)
}
  0xad   :  { %158 = dma.hbm_to_vmem [thread:$0]  %s10369_s30, 1024, %s153_s7, [#allocation9], %s10278_s26, %s10278_s26, %s10279_s28  }
  0xae   :  { %s10094_s13 = scalar_lea.hbm %s10399_s12, 1024 }
  0xaf   :  { %p10095_p0 = scmp.ne.s32.totalorder %s10399_s12, %s10094_s13  ;;  %p10098_p1 = scmp.lt.u32.totalorder %s10094_s13, %s10399_s12 }
  0xb1   :  { %p10100_p2 = pnand %p10098_p1, %p10095_p0 }
  0xb3   :  { %10103 = shalt.err (!%p10100_p2)
}
  0xb4   :  { %s10104_s17 = scalar_lea.vmem %s10544_s11, 1024  ;;  %p10109_p4 = scmp.lt.s32.totalorder %s10544_s11, %s10544_s11 }
  0xb5   :  { %p10105_p3 = scmp.ne.s32.totalorder %s10544_s11, %s10104_s17  ;;  %p10110_p5 = scmp.lt.s32.totalorder %s10104_s17, %s10104_s17 }
  0xb7   :  { %p10111_p6 = por %p10110_p5, %p10109_p4 }
  0xb9   :  { %p10112_p7 = pnand %p10111_p6, %p10105_p3 }
  0xbb   :  { %10115 = shalt.err (!%p10112_p7)
}
  0xbc   :  { %190 = dma.hbm_to_vmem [thread:$0]  %s10399_s12, 1024, %s10544_s11, [#allocation12], %s10278_s26, %s10278_s26, %s10279_s28  }
  0xbd   :  { %s10286_s30 = smov [#allocation16]   ;;  %s10287_s27 = smov [#allocation17]  }
  0xbe   :  { %s212_s18 = sshll.u32 %s10286_s30, 4  ;;  %s230_s22 = sshll.u32 %s10287_s27, 4  ;;  %s213_s18 = int_to_ptr.vmem [resolvable:$true] %s212_s18  ;;  %s10565_s22 = int_to_ptr.vmem [resolvable:$true] %s230_s22 }
  0xbf   :  { %s10116_s0 = scalar_lea.hbm %s10419_s3, 1024 }
  0xc0   :  { %p10117_p8 = scmp.ne.s32.totalorder %s10419_s3, %s10116_s0  ;;  %p10120_p9 = scmp.lt.u32.totalorder %s10116_s0, %s10419_s3 }
  0xc2   :  { %p10122_p10 = pnand %p10120_p9, %p10117_p8 }
  0xc4   :  { %10125 = shalt.err (!%p10122_p10)
}
  0xc5   :  { %s10126_s23 = scalar_lea.vmem %s213_s18, 1024  ;;  %p10131_p12 = scmp.lt.s32.totalorder %s213_s18, %s213_s18 }
  0xc6   :  { %p10127_p11 = scmp.ne.s32.totalorder %s213_s18, %s10126_s23  ;;  %p10132_p13 = scmp.lt.s32.totalorder %s10126_s23, %s10126_s23 }
  0xc8   :  { %p10133_p0 = por %p10132_p13, %p10131_p12 }
  0xca   :  { %p10134_p1 = pnand %p10133_p0, %p10127_p11 }
  0xcc   :  { %10137 = shalt.err (!%p10134_p1)
}
  0xcd   :  { %218 = dma.hbm_to_vmem [thread:$0]  %s10419_s3, 1024, %s213_s18, [#allocation15], %s10278_s26, %s10278_s26, %s10279_s28  }
  0xce   :  { %s10138_s12 = scalar_lea.hbm %s10439_s24, 1024 }
  0xcf   :  { %p10139_p2 = scmp.ne.s32.totalorder %s10439_s24, %s10138_s12  ;;  %p10142_p3 = scmp.lt.u32.totalorder %s10138_s12, %s10439_s24 }
  0xd1   :  { %p10144_p4 = pnand %p10142_p3, %p10139_p2 }
  0xd3   :  { %10147 = shalt.err (!%p10144_p4)
}
  0xd4   :  { %s10148_s1 = scalar_lea.vmem %s10565_s22, 1024  ;;  %p10153_p6 = scmp.lt.s32.totalorder %s10565_s22, %s10565_s22 }
  0xd5   :  { %p10149_p5 = scmp.ne.s32.totalorder %s10565_s22, %s10148_s1  ;;  %p10154_p7 = scmp.lt.s32.totalorder %s10148_s1, %s10148_s1 }
  0xd7   :  { %p10155_p8 = por %p10154_p7, %p10153_p6 }
  0xd9   :  { %p10156_p9 = pnand %p10155_p8, %p10149_p5 }
  0xdb   :  { %10159 = shalt.err (!%p10156_p9)
}
  0xdc   :  { %236 = dma.hbm_to_vmem [thread:$0]  %s10439_s24, 1024, %s10565_s22, [#allocation18], %s10278_s26, %s10278_s26, %s10279_s28  }
  0xdd   :  { %10226 = dma.done.wait [#allocation3], 256  }
  0xde   :  { %10227 = vsyncadd [#allocation3], 4294967040 }
  0xdf   :  { %10228 = dma.done.wait [#allocation6], 768  }
  0xe0   :  { %10229 = vsyncadd [#allocation6], 4294966528 }
  0xe1   :  { %10230 = dma.done.wait [#allocation9], 1280  }
  0xe2   :  { %10231 = vsyncadd [#allocation9], 4294966016 }
  0xe3   :  { %10232 = dma.done.wait [#allocation12], 2048  }
  0xe4   :  { %10233 = vsyncadd [#allocation12], 4294965248 }
  0xe5   :  { %10234 = dma.done.wait [#allocation15], 2048  }
  0xe6   :  { %10235 = vsyncadd [#allocation15], 4294965248 }
  0xe7   :  { %10236 = dma.done.wait [#allocation18], 1024  }
  0xe8   :  { %10237 = vsyncadd [#allocation18], 4294966272  ;;  %vm289_vm0 = vcmask 261120   ;;  %v10586_v0 = vld [vmem:[#allocation2] sm:$0xff]  ;;  %v10588_v1 = vld [vmem:[#allocation2 + $0x8] sm:$0xff]  ;;  %s11704_s3 = sld [smem:[#allocation31_spill]] }
  0xe9   :  { %v290_v2 = vsel %vm289_vm0, %v10586_v0, 0.0  ;;  %v293_v3 = vsel %vm289_vm0, %v10588_v1, 0.0  ;;  %v335_v14 = vld [vmem:[%s10339_s29] sm:$0xff]  ;;  %v336_v15 = vld [vmem:[%s10339_s29 + $0x8] sm:$0xff]  ;;  %v337_v19 = vld [vmem:[%s10339_s29 + $0x10] sm:$0xff]  ;;  %s11705_s24 = sld [smem:[#allocation34_spill]] }
  0xea   :  { %291 = vadd.xlane.f32.xlu0 %v290_v2  ;;  %v345_v16 = vld [vmem:[%s10359_s19] sm:$0xff]  ;;  %v9301_v17 = vpack.c.bf16 %v336_v15, %v335_v14  ;;  %v346_v18 = vld [vmem:[%s10359_s19 + $0x8] sm:$0xff]  ;;  %v338_v20 = vld [vmem:[%s10339_s29 + $0x18] sm:$0xff]  ;;  %s11706_s2 = sld [smem:[#allocation33_spill]]  ;;  %v10288_v48 = vmov 0.0   ;;  %s11707_s6 = sld [smem:[#allocation32_spill]] }
  0xeb   :  { %v9317_v21 = vpack.c.bf16 %v346_v18, %v345_v16  ;;  %v9305_v22 = vpack.c.bf16 %v338_v20, %v337_v19  ;;  %v347_v23 = vld [vmem:[%s10359_s19 + $0x10] sm:$0xff]  ;;  %v348_v24 = vld [vmem:[%s10359_s19 + $0x18] sm:$0xff]  ;;  %v340_v26 = vld [vmem:[%s10349_s8] sm:$0xff]  ;;  %vm10289_vm1 = vmmov 0   ;;  %vm604_vm2 = vcmask 64512   ;;  %s10290_s9 = smov 120  }
  0xec   :  { %9302 = vmatprep.subr.bf16.mxu1 %v9301_v17  ;;  %v9321_v25 = vpack.c.bf16 %v348_v24, %v347_v23  ;;  %v341_v27 = vld [vmem:[%s10349_s8 + $0x8] sm:$0xff]  ;;  %v8143_v36 = vld [vmem:[%s10329_s21] ss:$0 sm:$0xff]  ;;  %v342_v43 = vld [vmem:[%s10349_s8 + $0x10] sm:$0xff]  ;;  %s10291_s5 = smov 112   ;;  %s10292_s7 = smov 104  }
  0xed   :  { %9304 = vmatpush3.bf16.msra.mxu1 %v9301_v17  ;;  %9318 = vmatprep.subr.bf16.mxu0 %v9317_v21  ;;  %v9309_v28 = vpack.c.bf16 %v341_v27, %v340_v26  ;;  %v343_v44 = vld [vmem:[%s10349_s8 + $0x18] sm:$0xff]  ;;  %v10659_v2 = vld [vmem:[#allocation7] sm:$0xff]  ;;  %s10293_s10 = smov 16   ;;  %s10294_s11 = smov 24   ;;  %vm1946_vm3 = vcmask 195584   ;;  %vm1943_vm4 = vcmask 130048   ;;  %vm10839_vm5 = vmpackc.low %vm604_vm2, %vm604_vm2 }
  0xee   :  { %294 = vadd.xlane.f32.xlu0 %v293_v3  ;;  %9320 = vmatpush3.bf16.msra.mxu0 %v9317_v21  ;;  %v8144_v38 = vld [vmem:[%s11704_s3] ss:$0 sm:$0xff]  ;;  %v9313_v47 = vpack.c.bf16 %v343_v44, %v342_v43  ;;  %s11708_s15 = sld [smem:[#allocation35_spill]]  ;;  %s11709_s16 = sld [smem:[#allocation36_spill]]  ;;  %vm3887_vm6 = vcmask 523264   ;;  %vm3884_vm7 = vcmask 392192  }
  0xef   :  { %9306 = vmatprep.subr.bf16.mxu1 %v9305_v22  ;;  %9322 = vmatprep.subr.bf16.mxu0 %v9321_v25  ;;  %v8151_v49 = vld [vmem:[%s11705_s24] ss:$0 sm:$0xff]  ;;  %s11710_s13 = sld [smem:[#allocation37_spill]]  ;;  %s11711_s17 = sld [smem:[#allocation39_spill]] }
  0xf0   :  { %v8148_v55 = vld [vmem:[%s11706_s2] ss:$0 sm:$0xff]  ;;  %s11712_s30 = sld [smem:[#allocation38_spill]]  ;;  %s11715_s18 = sld [smem:[#allocation40_spill]] }
  0xf1   :  { %9308 = vmatpush3.bf16.msra.mxu1 %v9305_v22  ;;  %v8145_v58 = vld [vmem:[%s11707_s6] ss:$0 sm:$0xff]  ;;  %s11716_s27 = sld [smem:[#allocation41_spill]]  ;;  %s11717_s22 = sld [smem:[#allocation42_spill]] }
  0xf2   :  { %9324 = vmatpush3.bf16.msra.mxu0 %v9321_v25  ;;  %9310 = vmatprep.subr.bf16.mxu1 %v9309_v28  ;;  %s11718_s0 = sld [smem:[#allocation43_spill]]  ;;  %s11719_s23 = sld [smem:[#allocation45_spill]] }
  0xf3   :  { %8712 = vmatprep.subr.mxu0 %v10288_v48  ;;  %s11720_s12 = sld [smem:[#allocation44_spill]]  ;;  %s11721_s1 = sld [smem:[#allocation46_spill]] }
 0x177   :  { %v292_v4 = vpop.xlane.xlu0 %291 }
 0x178   :  { %v297_v5 = vmul.f32 0.03125, %v292_v4 }
 0x17a   :  { %v299_v6 = vsub.f32 %v10586_v0, %v297_v5 }
 0x17b   :  { %v295_v7 = vpop.xlane.xlu0 %294 }
 0x17c   :  { %v298_v8 = vmul.f32 0.03125, %v295_v7  ;;  %v301_v9 = vmul.f32 %v299_v6, %v299_v6 }
 0x17e   :  { %v300_v10 = vsub.f32 %v10588_v1, %v298_v8  ;;  %v303_v11 = vsel %vm289_vm0, %v301_v9, 0.0 }
 0x17f   :  { %304 = vadd.xlane.f32.xlu1 %v303_v11 }
 0x180   :  { %v302_v12 = vmul.f32 %v300_v10, %v300_v10 }
 0x182   :  { %v306_v13 = vsel %vm289_vm0, %v302_v12, 0.0 }
 0x183   :  { %307 = vadd.xlane.f32.xlu1 %v306_v13 }
 0x20c   :  { %v305_v29 = vpop.xlane.xlu1 %304 }
 0x20d   :  { %v309_v30 = vmul.f32 0.03125, %v305_v29 }
 0x20f   :  { %v311_v31 = vadd.f32 1e-06, %v309_v30 }
 0x210   :  { %v308_v32 = vpop.xlane.xlu1 %307 }
 0x211   :  { %9768 = vrsqrt.f32 %v311_v31  ;;  %v310_v33 = vmul.f32 0.03125, %v308_v32 }
 0x213   :  { %v312_v34 = vadd.f32 1e-06, %v310_v33 }
 0x215   :  { %9770 = vrsqrt.f32 %v312_v34 }
 0x21b   :  { %v9769_v35 = vpop.eup %9768 }
 0x21c   :  { %v315_v37 = vmul.f32 %v9769_v35, %v299_v6  ;;  %v10662_v6 = vld [vmem:[#allocation7 + $0x8] sm:$0xff] }
 0x21e   :  { %v323_v39 = vmul.f32 %v8143_v36, %v315_v37 }
 0x21f   :  { %v9771_v40 = vpop.eup %9770 }
 0x220   :  { %v331_v41 = vadd.f32 %v8144_v38, %v323_v39  ;;  %v316_v42 = vmul.f32 %v9771_v40, %v300_v10 }
 0x222   :  { %8677 = vmatprep.mubr.msk.f32.mxu1 %vm289_vm0, %v331_v41  ;;  %333 = vst.msk [vmem:[#allocation22] sm:$0xff] %vm289_vm0, %v331_v41  ;;  %8699 = vmatprep.mubr.msk.f32.mxu0 %vm289_vm0, %v331_v41  ;;  %v324_v45 = vmul.f32 %v8143_v36, %v316_v42 }
 0x224   :  { %v332_v46 = vadd.f32 %v8144_v38, %v324_v45 }
 0x226   :  { %8678 = vmatmul.mubr.msk.f32.vlgmr.msra.gmra.mrb[0].mxu1 %vm289_vm0, %v332_v46  ;;  %334 = vst.msk [vmem:[#allocation22 + $0x8] sm:$0xff] %vm289_vm0, %v332_v46  ;;  %8700 = vmatmul.mubr.msk.f32.vlgmr.msra.gmra.mrb[0].mxu0 %vm289_vm0, %v332_v46 }
 0x227   :  { %9312 = vmatpush3.bf16.msra.mxu1 %v9309_v28  ;;  %8688 = vmatprep.mubr.msk.f32.mxu1 %vm289_vm0, %v331_v41 }
 0x228   :  { %9314 = vmatprep.subr.bf16.mxu1 %v9313_v47  ;;  %8714 = vmatprep.mubr.msk.f32.mxu0 %vm10289_vm1, %v10288_v48 }
 0x22b   :  { %9316 = vmatpush3.bf16.msra.mxu1 %v9313_v47 }
 0x22c   :  { %8702 = vmatprep.subr.mxu1 %v10288_v48 }
 0x22e   :  { %8689 = vmatmul.mubr.msk.f32.vlgmr.msra.gmra.mrb[2].mxu1 %vm289_vm0, %v332_v46 }
 0x22f   :  { %8704 = vmatprep.mubr.msk.f32.mxu1 %vm10289_vm1, %v10288_v48 }
 0x2f9   :  { %v8679_v50 = vpop.f32.mrb[0].mxu1  ;;  %v8701_v51 = vpop.f32.mrb[0].mxu0 }
 0x2fa   :  { %v433_v52 = vpop.f32.mrb[1].mxu1  ;;  %v595_v53 = vpop.f32.mrb[1].mxu0  ;;  %v10648_v62 = vadd.f32 %v8679_v50, %v8145_v58  ;;  %v10651_v63 = vadd.f32 %v8701_v51, %v8151_v49 }
 0x2fb   :  { %v10627_v54 = vadd.f32 %v8151_v49, %v595_v53  ;;  %v10637_v60 = vadd.f32 %v8145_v58, %v433_v52 }
 0x2fd   :  { %8713 = vmatpush3.msra.mxu0 %v10627_v54 }
 0x2fe   :  { %8722 = vmatprep.subr.mxu0 %v10288_v48 }
 0x301   :  { %v8690_v56 = vpop.f32.mrb[2].mxu1 }
 0x302   :  { %v514_v57 = vpop.f32.mrb[3].mxu1  ;;  %v10640_v61 = vadd.f32 %v8690_v56, %v8148_v55 }
 0x303   :  { %v10633_v59 = vadd.f32 %v8148_v55, %v514_v57 }
 0x305   :  { %8703 = vmatpush3.xpose.msk.msra.mxu1 %vm604_vm2, %v10633_v59 }
 0x306   :  { %8707 = vmatprep.subr.mxu1 %v10288_v48 }
 0x308   :  { %8705 = vmatmul.mubr.msk.f32.vlgmr.msra.gmra.mrb[4].mxu1 %vm604_vm2, %v10637_v60 }
 0x309   :  { %8708 = vmatpush3.xpose.msk.msra.mxu1 %vm604_vm2, %v10640_v61  ;;  %8709 = vmatprep.mubr.msk.f32.mxu1 %vm10289_vm1, %v10288_v48 }
 0x30a   :  { %8717 = vmatprep.subr.mxu1 %v10288_v48 }
 0x30c   :  { %8710 = vmatmul.mubr.msk.f32.vlgmr.msra.gmra.mrb[6].mxu1 %vm604_vm2, %v10648_v62 }
 0x30d   :  { %8718 = vmatpush3.msra.mxu1 %v10651_v63  ;;  %8719 = vmatprep.mubr.msk.f32.mxu1 %vm10289_vm1, %v10288_v48 }
 0x30e   :  { %8727 = vmatprep.subr.mxu1 %v10288_v48 }
 0x3db   :  { %v677_v3 = vpop.f32.mrb[4].mxu1 }
 0x3dc   :  { %v678_v4 = vadd.f32 %v677_v3, %v10659_v2  ;;  %v8706_v5 = vpop.f32.mrb[5].mxu1 }
 0x3de   :  { %v757_v7 = vsel %vm604_vm2, %v678_v4, -inf }
 0x3df   :  { %758 = vmax.xlane.f32.xlu0 %v757_v7  ;;  %v753_v8 = vpop.f32.mrb[6].mxu1 }
 0x3e0   :  { %v754_v9 = vadd.f32 %v753_v8, %v10662_v6  ;;  %v8711_v10 = vpop.f32.mrb[7].mxu1 }
 0x3e2   :  { %v760_v11 = vsel %vm604_vm2, %v754_v9, -inf }
 0x3e3   :  { %761 = vmax.xlane.f32.xlu1 %v760_v11 }
 0x3f4   :  { %1005 = vrot.lane.b32.xlu1 %v10640_v61, %s10290_s9 }
 0x3f8   :  { %925 = vrot.lane.b32.xlu1 %v10637_v60, %s10290_s9 }
 0x46c   :  { %v759_v12 = vpop.xlane.xlu0 %758 }
 0x46d   :  { %v763_v13 = vsub.f32 %v678_v4, %v759_v12 }
 0x46f   :  { %v765_v14 = vmul.f32 1.442695, %v763_v13 }
 0x470   :  { %v762_v15 = vpop.xlane.xlu1 %761 }
 0x471   :  { %9772 = vpow2.f32 %v765_v14  ;;  %v764_v16 = vsub.f32 %v754_v9, %v762_v15 }
 0x473   :  { %v767_v17 = vmul.f32 1.442695, %v764_v16 }
 0x474   :  { %v1006_v22 = vpop.permute.xlu1 %1005 }
 0x475   :  { %9774 = vpow2.f32 %v767_v17 }
 0x478   :  { %v926_v23 = vpop.permute.xlu1 %925 }
 0x47b   :  { %v9773_v18 = vpop.eup %9772 }
 0x47c   :  { %v769_v19 = vsel %vm604_vm2, %v9773_v18, 0.0 }
 0x47d   :  { %770 = vadd.xlane.f32.xlu0 %v769_v19 }
 0x47f   :  { %v9775_v20 = vpop.eup %9774 }
 0x480   :  { %v772_v21 = vsel %vm604_vm2, %v9775_v20, 0.0 }
 0x481   :  { %773 = vadd.xlane.f32.xlu1 %v772_v21 }
 0x492   :  { %1003 = vrot.lane.b32.xlu1 %v10648_v62, %s10290_s9 }
 0x493   :  { %927 = vrot.lane.b32.xlu0 %v10633_v59, %s10290_s9 }
 0x50a   :  { %v771_v24 = vpop.xlane.xlu0 %770 }
 0x50b   :  { %9776 = vrcp.f32 %v771_v24 }
 0x50e   :  { %v774_v25 = vpop.xlane.xlu1 %773  ;;  %v928_v28 = vpop.permute.xlu0 %927 }
 0x50f   :  { %9778 = vrcp.f32 %v774_v25 }
 0x512   :  { %v1004_v31 = vpop.permute.xlu1 %1003 }
 0x515   :  { %v9777_v26 = vpop.eup %9776 }
 0x516   :  { %v776_v27 = vmul.f32 %v9777_v26, %v9773_v18 }
 0x518   :  { %8715 = vmatmul.mubr.msk.f32.vlgmr.msra.gmra.mrb[2].mxu0 %vm604_vm2, %v776_v27 }
 0x519   :  { %v9779_v29 = vpop.eup %9778  ;;  %8723 = vmatpush3.xpose.msk.msra.mxu0 %vm604_vm2, %v928_v28  ;;  %8724 = vmatprep.mubr.msk.f32.mxu0 %vm10289_vm1, %v10288_v48 }
 0x51a   :  { %v778_v30 = vmul.f32 %v9779_v29, %v9775_v20  ;;  %8732 = vmatprep.subr.mxu0 %v10288_v48 }
 0x51c   :  { %8720 = vmatmul.mubr.msk.f32.vlgmr.msra.gmra.mrb[8].mxu1 %vm604_vm2, %v778_v30  ;;  %8725 = vmatmul.mubr.msk.f32.vlgmr.msra.gmra.mrb[4].mxu0 %vm604_vm2, %v926_v23 }
 0x51d   :  { %8728 = vmatpush3.xpose.msk.msra.mxu1 %vm604_vm2, %v1006_v22  ;;  %8729 = vmatprep.mubr.msk.f32.mxu1 %vm10289_vm1, %v10288_v48 }
 0x51e   :  { %8737 = vmatprep.subr.mxu1 %v10288_v48  ;;  %8734 = vmatprep.mubr.msk.f32.mxu0 %vm10289_vm1, %v10288_v48 }
 0x520   :  { %8730 = vmatmul.mubr.msk.f32.vlgmr.msra.gmra.mrb[10].mxu1 %vm604_vm2, %v1004_v31 }
 0x521   :  { %8739 = vmatprep.mubr.msk.f32.mxu1 %vm10289_vm1, %v10288_v48 }
 0x5eb   :  { %v10693_v32 = vpop.f32.mrb[2].mxu0 }
 0x5ec   :  { %v8716_v33 = vpop.f32.mrb[3].mxu0 }
 0x5ef   :  { %v10695_v34 = vpop.f32.mrb[8].mxu1  ;;  %v999_v35 = vpop.f32.mrb[4].mxu0 }
 0x5f0   :  { %v1000_v36 = vadd.f32 %v999_v35, %v10659_v2  ;;  %v8721_v37 = vpop.f32.mrb[9].mxu1  ;;  %v8726_v38 = vpop.f32.mrb[5].mxu0 }
 0x5f2   :  { %v1081_v39 = vsel %vm604_vm2, %v1000_v36, -inf }
 0x5f3   :  { %1082 = vmax.xlane.f32.xlu0 %v1081_v39  ;;  %v1077_v40 = vpop.f32.mrb[10].mxu1 }
 0x5f4   :  { %v1078_v41 = vadd.f32 %v1077_v40, %v10662_v6  ;;  %v8731_v42 = vpop.f32.mrb[11].mxu1 }
 0x5f6   :  { %v1084_v43 = vsel %vm604_vm2, %v1078_v41, -inf }
 0x5f7   :  { %1085 = vmax.xlane.f32.xlu1 %v1084_v43 }
 0x608   :  { %1181 = vrot.lane.b32.xlu1 %v10651_v63, %s10290_s9 }
 0x609   :  { %1104 = vrot.lane.b32.xlu0 %v10627_v54, %s10290_s9 }
 0x60c   :  { %1259 = vrot.lane.b32.xlu1 %v10633_v59, %s10291_s5 }
 0x610   :  { %1337 = vrot.lane.b32.xlu1 %v10640_v61, %s10291_s5 }
 0x614   :  { %1335 = vrot.lane.b32.xlu1 %v10648_v62, %s10291_s5 }
 0x680   :  { %v1083_v44 = vpop.xlane.xlu0 %1082 }
 0x681   :  { %v1087_v45 = vsub.f32 %v1000_v36, %v1083_v44 }
 0x683   :  { %v1089_v46 = vmul.f32 1.442695, %v1087_v45 }
 0x684   :  { %v1105_v47 = vpop.permute.xlu0 %1104  ;;  %v1086_v49 = vpop.xlane.xlu1 %1085 }
 0x685   :  { %9780 = vpow2.f32 %v1089_v46  ;;  %v1088_v50 = vsub.f32 %v1078_v41, %v1086_v49  ;;  %8733 = vmatpush3.msra.mxu0 %v1105_v47 }
 0x686   :  { %8742 = vmatprep.subr.mxu0 %v10288_v48 }
 0x687   :  { %v1091_v51 = vmul.f32 1.442695, %v1088_v50 }
 0x688   :  { %v1182_v52 = vpop.permute.xlu1 %1181 }
 0x689   :  { %9782 = vpow2.f32 %v1091_v51  ;;  %8738 = vmatpush3.msra.mxu1 %v1182_v52 }
 0x68a   :  { %8747 = vmatprep.subr.mxu1 %v10288_v48 }
 0x68c   :  { %v1260_v4 = vpop.permute.xlu1 %1259 }
 0x68f   :  { %v9781_v53 = vpop.eup %9780 }
 0x690   :  { %v1093_v55 = vsel %vm604_vm2, %v9781_v53, 0.0  ;;  %v1338_v9 = vpop.permute.xlu1 %1337 }
 0x691   :  { %1094 = vadd.xlane.f32.xlu0 %v1093_v55 }
 0x693   :  { %v9783_v56 = vpop.eup %9782 }
 0x694   :  { %v1096_v57 = vsel %vm604_vm2, %v9783_v56, 0.0  ;;  %v1336_v12 = vpop.permute.xlu1 %1335 }
 0x695   :  { %1097 = vadd.xlane.f32.xlu0 %v1096_v57 }
 0x6ab   :  { %1257 = vrot.lane.b32.xlu0 %v10637_v60, %s10291_s5 }
 0x71e   :  { %v1095_v58 = vpop.xlane.xlu0 %1094 }
 0x71f   :  { %9784 = vrcp.f32 %v1095_v58 }
 0x722   :  { %v1098_v3 = vpop.xlane.xlu0 %1097 }
 0x723   :  { %9786 = vrcp.f32 %v1098_v3 }
 0x726   :  { %v1258_v11 = vpop.permute.xlu0 %1257 }
 0x729   :  { %v9785_v5 = vpop.eup %9784 }
 0x72a   :  { %v1100_v7 = vmul.f32 %v9785_v5, %v9781_v53 }
 0x72c   :  { %8735 = vmatmul.mubr.msk.f32.vlgmr.msra.gmra.mrb[6].mxu0 %vm604_vm2, %v1100_v7 }
 0x72d   :  { %v9787_v8 = vpop.eup %9786  ;;  %8743 = vmatpush3.xpose.msk.msra.mxu0 %vm604_vm2, %v1260_v4  ;;  %8744 = vmatprep.mubr.msk.f32.mxu0 %vm10289_vm1, %v10288_v48 }
 0x72e   :  { %v1102_v10 = vmul.f32 %v9787_v8, %v9783_v56  ;;  %8752 = vmatprep.subr.mxu0 %v10288_v48 }
 0x730   :  { %8740 = vmatmul.mubr.msk.f32.vlgmr.msra.gmra.mrb[12].mxu1 %vm604_vm2, %v1102_v10  ;;  %8745 = vmatmul.mubr.msk.f32.vlgmr.msra.gmra.mrb[8].mxu0 %vm604_vm2, %v1258_v11 }
 0x731   :  { %8748 = vmatpush3.xpose.msk.msra.mxu1 %vm604_vm2, %v1338_v9  ;;  %8749 = vmatprep.mubr.msk.f32.mxu1 %vm10289_vm1, %v10288_v48 }
 0x732   :  { %8757 = vmatprep.subr.mxu1 %v10288_v48  ;;  %8754 = vmatprep.mubr.msk.f32.mxu0 %vm10289_vm1, %v10288_v48 }
 0x734   :  { %8750 = vmatmul.mubr.msk.f32.vlgmr.msra.gmra.mrb[14].mxu1 %vm604_vm2, %v1336_v12 }
 0x735   :  { %8759 = vmatprep.mubr.msk.f32.mxu1 %vm10289_vm1, %v10288_v48 }
 0x7ff   :  { %v10733_v13 = vpop.f32.mrb[6].mxu0 }
 0x800   :  { %v8736_v14 = vpop.f32.mrb[7].mxu0 }
 0x803   :  { %v10735_v15 = vpop.f32.mrb[12].mxu1  ;;  %v1331_v16 = vpop.f32.mrb[8].mxu0 }
 0x804   :  { %v1332_v17 = vadd.f32 %v1331_v16, %v10659_v2  ;;  %v8741_v18 = vpop.f32.mrb[13].mxu1  ;;  %v8746_v19 = vpop.f32.mrb[9].mxu0 }
 0x805   :  { %v350_v19 = vld [vmem:[#allocation10] sm:$0xff] }
 0x806   :  { %v1413_v20 = vsel %vm604_vm2, %v1332_v17, -inf }
 0x807   :  { %1414 = vmax.xlane.f32.xlu0 %v1413_v20  ;;  %v1409_v21 = vpop.f32.mrb[14].mxu1  ;;  %v351_v20 = vld [vmem:[#allocation10 + $0x8] sm:$0xff] }
 0x808   :  { %v1410_v22 = vadd.f32 %v1409_v21, %v10662_v6  ;;  %v8751_v23 = vpop.f32.mrb[15].mxu1  ;;  %v9325_v21 = vpack.c.bf16 %v351_v20, %v350_v19 }
 0x80a   :  { %v1416_v24 = vsel %vm604_vm2, %v1410_v22, -inf }
 0x80b   :  { %1417 = vmax.xlane.f32.xlu1 %v1416_v24 }
 0x81c   :  { %1511 = vrot.lane.b32.xlu1 %v10651_v63, %s10291_s5 }
 0x81d   :  { %1435 = vrot.lane.b32.xlu0 %v10627_v54, %s10291_s5 }
 0x820   :  { %1589 = vrot.lane.b32.xlu1 %v10633_v59, %s10292_s7 }
 0x824   :  { %1667 = vrot.lane.b32.xlu1 %v10640_v61, %s10292_s7 }
 0x828   :  { %1665 = vrot.lane.b32.xlu1 %v10648_v62, %s10292_s7 }
 0x894   :  { %v1415_v25 = vpop.xlane.xlu0 %1414 }
 0x895   :  { %v1419_v26 = vsub.f32 %v1332_v17, %v1415_v25 }
 0x897   :  { %v1421_v27 = vmul.f32 1.442695, %v1419_v26 }
 0x898   :  { %v1436_v28 = vpop.permute.xlu0 %1435  ;;  %v1418_v29 = vpop.xlane.xlu1 %1417 }
 0x899   :  { %9788 = vpow2.f32 %v1421_v27  ;;  %v1420_v30 = vsub.f32 %v1410_v22, %v1418_v29  ;;  %8753 = vmatpush3.msra.mxu0 %v1436_v28  ;;  %v353_v22 = vld [vmem:[#allocation10 + $0x18] sm:$0xff] }
 0x89a   :  { %8762 = vmatprep.subr.mxu0 %v10288_v48 }
 0x89b   :  { %v1423_v31 = vmul.f32 1.442695, %v1420_v30 }
 0x89c   :  { %v1512_v33 = vpop.permute.xlu1 %1511 }
 0x89d   :  { %9790 = vpow2.f32 %v1423_v31  ;;  %8758 = vmatpush3.msra.mxu1 %v1512_v33 }
 0x89e   :  { %8767 = vmatprep.subr.mxu1 %v10288_v48 }
 0x8a0   :  { %v1590_v38 = vpop.permute.xlu1 %1589 }
 0x8a3   :  { %v9789_v59 = vpop.eup %9788 }
 0x8a4   :  { %v1425_v61 = vsel %vm604_vm2, %v9789_v59, 0.0  ;;  %v1668_v42 = vpop.permute.xlu1 %1667 }
 0x8a5   :  { %1426 = vadd.xlane.f32.xlu0 %v1425_v61 }
 0x8a7   :  { %v9791_v62 = vpop.eup %9790 }
 0x8a8   :  { %v1428_v35 = vsel %vm604_vm2, %v9791_v62, 0.0  ;;  %v1666_v44 = vpop.permute.xlu1 %1665 }
 0x8a9   :  { %1429 = vadd.xlane.f32.xlu0 %v1428_v35 }
 0x8bf   :  { %1587 = vrot.lane.b32.xlu0 %v10637_v60, %s10292_s7 }
 0x932   :  { %v1427_v36 = vpop.xlane.xlu0 %1426 }
 0x933   :  { %9792 = vrcp.f32 %v1427_v36 }
 0x936   :  { %v1430_v37 = vpop.xlane.xlu0 %1429 }
 0x937   :  { %9794 = vrcp.f32 %v1430_v37 }
 0x93a   :  { %v1588_v60 = vpop.permute.xlu0 %1587 }
 0x93d   :  { %v9793_v39 = vpop.eup %9792 }
 0x93e   :  { %v1432_v40 = vmul.f32 %v9793_v39, %v9789_v59 }
 0x940   :  { %8755 = vmatmul.mubr.msk.f32.vlgmr.msra.gmra.mrb[10].mxu0 %vm604_vm2, %v1432_v40 }
 0x941   :  { %v9795_v41 = vpop.eup %9794  ;;  %8763 = vmatpush3.xpose.msk.msra.mxu0 %vm604_vm2, %v1590_v38  ;;  %8764 = vmatprep.mubr.msk.f32.mxu0 %vm10289_vm1, %v10288_v48 }
 0x942   :  { %v1434_v43 = vmul.f32 %v9795_v41, %v9791_v62  ;;  %8772 = vmatprep.subr.mxu0 %v10288_v48 }
 0x944   :  { %8760 = vmatmul.mubr.msk.f32.vlgmr.msra.gmra.mrb[16].mxu1 %vm604_vm2, %v1434_v43  ;;  %8765 = vmatmul.mubr.msk.f32.vlgmr.msra.gmra.mrb[12].mxu0 %vm604_vm2, %v1588_v60 }
 0x945   :  { %8768 = vmatpush3.xpose.msk.msra.mxu1 %vm604_vm2, %v1668_v42  ;;  %8769 = vmatprep.mubr.msk.f32.mxu1 %vm10289_vm1, %v10288_v48 }
 0x946   :  { %8777 = vmatprep.subr.mxu1 %v10288_v48  ;;  %8774 = vmatprep.mubr.msk.f32.mxu0 %vm10289_vm1, %v10288_v48 }
 0x948   :  { %8770 = vmatmul.mubr.msk.f32.vlgmr.msra.gmra.mrb[18].mxu1 %vm604_vm2, %v1666_v44 }
 0x949   :  { %8779 = vmatprep.mubr.msk.f32.mxu1 %vm10289_vm1, %v10288_v48 }
 0xa13   :  { %v1507_v45 = vpop.f32.mrb[10].mxu0 }
 0xa14   :  { %v8756_v46 = vpop.f32.mrb[11].mxu0 }
 0xa17   :  { %v1583_v47 = vpop.f32.mrb[16].mxu1  ;;  %v1661_v49 = vpop.f32.mrb[12].mxu0 }
 0xa18   :  { %v1662_v50 = vadd.f32 %v1661_v49, %v10659_v2  ;;  %v8761_v51 = vpop.f32.mrb[17].mxu1  ;;  %v8766_v52 = vpop.f32.mrb[13].mxu0 }
 0xa1a   :  { %v1743_v53 = vsel %vm604_vm2, %v1662_v50, -inf }
 0xa1b   :  { %1744 = vmax.xlane.f32.xlu0 %v1743_v53  ;;  %v1739_v55 = vpop.f32.mrb[18].mxu1 }
 0xa1c   :  { %v1740_v56 = vadd.f32 %v1739_v55, %v10662_v6  ;;  %v8771_v57 = vpop.f32.mrb[19].mxu1  ;;  %v2087_v55 = vld [vmem:[#allocation13] sm:$0xff] }
 0xa1e   :  { %v1746_v58 = vsel %vm604_vm2, %v1740_v56, -inf }
 0xa1f   :  { %1747 = vmax.xlane.f32.xlu1 %v1746_v58  ;;  %v2089_v58 = vld [vmem:[#allocation13 + $0x10] sm:$0xff] }
 0xa30   :  { %1841 = vrot.lane.b32.xlu1 %v10651_v63, %s10292_s7 }
 0xa34   :  { %1919 = vrot.lane.b32.xlu1 %v10733_v13, %s10279_s28 }
 0xa38   :  { %1921 = vrot.lane.b32.xlu1 %v10735_v15, %s10279_s28 }
 0xa3c   :  { %1929 = vrot.lane.b32.xlu1 %v1583_v47, %s10293_s10 }
 0xaa8   :  { %v1745_v2 = vpop.xlane.xlu0 %1744 }
 0xaa9   :  { %v1749_v3 = vsub.f32 %v1662_v50, %v1745_v2  ;;  %v2090_v2 = vld [vmem:[#allocation13 + $0x18] sm:$0xff] }
 0xaab   :  { %v1751_v4 = vmul.f32 1.442695, %v1749_v3  ;;  %v9345_v3 = vpack.c.bf16 %v2090_v2, %v2089_v58 }
 0xaac   :  { %v1748_v6 = vpop.xlane.xlu1 %1747 }
 0xaad   :  { %9796 = vpow2.f32 %v1751_v4  ;;  %v1750_v5 = vsub.f32 %v1740_v56, %v1748_v6  ;;  %v2088_v56 = vld [vmem:[#allocation13 + $0x8] sm:$0xff]  ;;  %v279_v4 = vld [vmem:[#allocation5] sm:$0xff] }
 0xaae   :  { %v9341_v57 = vpack.c.bf16 %v2088_v56, %v2087_v55  ;;  %v280_v6 = vld [vmem:[#allocation5 + $0x8] sm:$0xff] }
 0xaaf   :  { %v1753_v7 = vmul.f32 1.442695, %v1750_v5  ;;  %v281_v5 = vld [vmem:[#allocation5 + $0x10] sm:$0xff] }
 0xab0   :  { %v1842_v8 = vpop.permute.xlu1 %1841 }
 0xab1   :  { %9798 = vpow2.f32 %v1753_v7  ;;  %8778 = vmatpush3.msra.mxu1 %v1842_v8  ;;  %v2082_v7 = vld [vmem:[#allocation11] sm:$0xff]  ;;  %v2083_v8 = vld [vmem:[#allocation11 + $0x8] sm:$0xff] }
 0xab4   :  { %v1920_v28 = vpop.permute.xlu1 %1919 }
 0xab5   :  { %v1941_v31 = vsel %vm604_vm2, %v10693_v32, %v1920_v28  ;;  %v8178_v32 = vld [vmem:[%s11708_s15] ss:$0 sm:$0xff] }
 0xab7   :  { %v9797_v63 = vpop.eup %9796 }
 0xab8   :  { %v1755_v9 = vsel %vm604_vm2, %v9797_v63, 0.0  ;;  %v1922_v29 = vpop.permute.xlu1 %1921 }
 0xab9   :  { %1756 = vadd.xlane.f32.xlu0 %v1755_v9  ;;  %v1942_v35 = vsel %vm604_vm2, %v10695_v34, %v1922_v29  ;;  %v2084_v9 = vld [vmem:[#allocation11 + $0x10] sm:$0xff] }
 0xabb   :  { %v9799_v10 = vpop.eup %9798 }
 0xabc   :  { %v1758_v11 = vsel %vm604_vm2, %v9799_v10, 0.0  ;;  %v1930_v33 = vpop.permute.xlu1 %1929 }
 0xabd   :  { %1759 = vadd.xlane.f32.xlu0 %v1758_v11  ;;  %v1945_v36 = vsel %vm1943_vm4, %v1942_v35, %v1930_v33 }
 0xad3   :  { %1765 = vrot.lane.b32.xlu0 %v10627_v54, %s10292_s7  ;;  %v352_v54 = vld [vmem:[#allocation10 + $0x10] sm:$0xff] }
 0xad4   :  { %v9329_v23 = vpack.c.bf16 %v353_v22, %v352_v54 }
 0xad7   :  { %1927 = vrot.lane.b32.xlu0 %v1507_v45, %s10293_s10 }
 0xb46   :  { %v1757_v12 = vpop.xlane.xlu0 %1756 }
 0xb47   :  { %9800 = vrcp.f32 %v1757_v12  ;;  %v282_v12 = vld [vmem:[#allocation5 + $0x18] sm:$0xff] }
 0xb4a   :  { %v1760_v13 = vpop.xlane.xlu0 %1759 }
 0xb4b   :  { %9802 = vrcp.f32 %v1760_v13  ;;  %v2092_v13 = vld [vmem:[#allocation14] sm:$0xff] }
 0xb4e   :  { %v1766_v14 = vpop.permute.xlu0 %1765 }
 0xb4f   :  { %8773 = vmatpush3.msra.mxu0 %v1766_v14  ;;  %v2093_v14 = vld [vmem:[#allocation14 + $0x8] sm:$0xff] }
 0xb50   :  { %9326 = vmatprep.subr.bf16.mxu0 %v9325_v21 }
 0xb51   :  { %v9801_v15 = vpop.eup %9800 }
 0xb52   :  { %v1762_v16 = vmul.f32 %v9801_v15, %v9797_v63  ;;  %v1928_v30 = vpop.permute.xlu0 %1927  ;;  %v9333_v63 = vpack.c.bf16 %v2083_v8, %v2082_v7  ;;  %v9349_v15 = vpack.c.bf16 %v2093_v14, %v2092_v13  ;;  %v10877_v7 = vld [vmem:[#allocation8 + $0x8] sm:$0xff]  ;;  %v10879_v8 = vld [vmem:[#allocation8] sm:$0xff] }
 0xb53   :  { %v1944_v59 = vsel %vm1943_vm4, %v1941_v31, %v1928_v30  ;;  %v2094_v30 = vld [vmem:[#allocation14 + $0x10] sm:$0xff]  ;;  %v2095_v31 = vld [vmem:[#allocation14 + $0x18] sm:$0xff] }
 0xb54   :  { %8775 = vmatmul.mubr.msk.f32.vlgmr.msra.gmra.mrb[14].mxu0 %vm604_vm2, %v1762_v16  ;;  %9334 = vmatprep.subr.bf16.mxu1 %v9333_v63  ;;  %v10295_v16 = vmov 0.0|0.0  }
 0xb55   :  { %v9803_v17 = vpop.eup %9802  ;;  %9328 = vmatpush3.bf16.msra.mxu0 %v9325_v21 }
 0xb56   :  { %v1764_v18 = vmul.f32 %v9803_v17, %v9799_v10  ;;  %9330 = vmatprep.subr.bf16.mxu0 %v9329_v23  ;;  %v2085_v10 = vld [vmem:[#allocation11 + $0x18] sm:$0xff] }
 0xb57   :  { %v9337_v11 = vpack.c.bf16 %v2085_v10, %v2084_v9 }
 0xb58   :  { %8780 = vmatmul.mubr.msk.f32.vlgmr.msra.gmra.mrb[20].mxu1 %vm604_vm2, %v1764_v18 }
 0xb59   :  { %9332 = vmatpush3.bf16.msra.mxu0 %v9329_v23  ;;  %9336 = vmatpush3.bf16.msra.mxu1 %v9333_v63  ;;  %v8181_v23 = vld [vmem:[%s11709_s16] ss:$0 sm:$0xff] }
 0xb5a   :  { %9342 = vmatprep.subr.bf16.mxu0 %v9341_v57  ;;  %9338 = vmatprep.subr.bf16.mxu1 %v9337_v11 }
 0xb5d   :  { %9340 = vmatpush3.bf16.msra.mxu1 %v9337_v11 }
 0xb5e   :  { %9350 = vmatprep.subr.bf16.mxu1 %v9349_v15 }
 0xc27   :  { %v1837_v24 = vpop.f32.mrb[14].mxu0 }
 0xc28   :  { %1935 = vrot.lane.b32.xlu0 %v1837_v24, %s10294_s11  ;;  %v8776_v25 = vpop.f32.mrb[15].mxu0 }
 0xc29   :  { %v8182_v25 = vld [vmem:[%s11710_s13] ss:$0 sm:$0xff] }
 0xc2b   :  { %v1913_v26 = vpop.f32.mrb[20].mxu1 }
 0xc2c   :  { %1937 = vrot.lane.b32.xlu1 %v1913_v26, %s10294_s11  ;;  %v8781_v27 = vpop.f32.mrb[21].mxu1 }
 0xc9a   :  { %v1936_v61 = vpop.permute.xlu0 %1935 }
 0xc9b   :  { %v1947_v62 = vsel %vm1946_vm3, %v1944_v59, %v1936_v61  ;;  %v9353_v61 = vpack.c.bf16 %v2095_v31, %v2094_v30 }
 0xc9c   :  { %8790 = vmatprep.mubr.msk.f32.mxu0 %vm289_vm0, %v1947_v62  ;;  %v8186_v62 = vld [vmem:[%s11711_s17] ss:$0 sm:$0xff] }
 0xc9e   :  { %v1938_v37 = vpop.permute.xlu1 %1937 }
 0xc9f   :  { %v1948_v38 = vsel %vm1946_vm3, %v1945_v36, %v1938_v37 }
 0xca0   :  { %8791 = vmatmul.mubr.msk.f32.vlgmr.msra.gmra.mrb[16].mxu0 %vm289_vm0, %v1948_v38 }
 0xca1   :  { %9344 = vmatpush3.bf16.msra.mxu0 %v9341_v57  ;;  %8812 = vmatprep.mubr.msk.f32.mxu0 %vm289_vm0, %v279_v4 }
 0xca2   :  { %9346 = vmatprep.subr.bf16.mxu0 %v9345_v3 }
 0xca5   :  { %9348 = vmatpush3.bf16.msra.mxu0 %v9345_v3 }
 0xca6   :  { %9357 = vmatprep.subr.bf16.mxu0 %v10295_v16 }
 0xca8   :  { %8813 = vmatmul.mubr.msk.f32.vlgmr.msra.gmra.mrb[18].mxu0 %vm289_vm0, %v280_v6 }
 0xca9   :  { %8815 = vmatprep.mubr.msk.f32.mxu0 %vm289_vm0, %v281_v5 }
 0xcac   :  { %8816 = vmatmul.mubr.msk.f32.gmra.mrb[20].mxu0 %vm289_vm0, %v282_v12 }
 0xcad   :  { %8836 = vmatprep.mubr.msk.f32.mxu0 %vm10289_vm1, %v10288_v48 }
 0xd73   :  { %v8792_v39 = vpop.f32.mrb[16].mxu0 }
 0xd74   :  { %v2033_v40 = vadd.f32 %v8792_v39, %v8178_v32  ;;  %v2027_v41 = vpop.f32.mrb[17].mxu0 }
 0xd75   :  { %v2028_v42 = vadd.f32 %v8178_v32, %v2027_v41 }
 0xd76   :  { %v10805_v43 = vadd.f32 %v2033_v40, %v10588_v1 }
 0xd77   :  { %v10808_v60 = vadd.f32 %v2028_v42, %v10586_v0 }
 0xd78   :  { %v2043_v34 = vsel %vm289_vm0, %v10805_v43, 0.0 }
 0xd79   :  { %2044 = vadd.xlane.f32.xlu1 %v2043_v34  ;;  %v2040_v44 = vsel %vm289_vm0, %v10808_v60, 0.0 }
 0xd7a   :  { %2041 = vadd.xlane.f32.xlu0 %v2040_v44 }
 0xd7b   :  { %v8814_v35 = vpop.f32.mrb[18].mxu0 }
 0xd7c   :  { %v2279_v36 = vadd.f32 %v8814_v35, %v8186_v62  ;;  %v2273_v37 = vpop.f32.mrb[19].mxu0 }
 0xd7d   :  { %v2274_v38 = vadd.f32 %v8186_v62, %v2273_v37 }
 0xd7f   :  { %v9358_v39 = vpack.c.bf16 %v2279_v36, %v2274_v38  ;;  %v8817_v40 = vpop.f32.mrb[20].mxu0  ;;  %v10843_v41 = vpack.i.bf16 %v2279_v36, %v2274_v38 }
 0xd80   :  { %v2289_v42 = vadd.f32 %v8817_v40, %v8186_v62  ;;  %v2283_v34 = vpop.f32.mrb[21].mxu0 }
 0xd81   :  { %v2284_v44 = vadd.f32 %v8186_v62, %v2283_v34  ;;  %9360 = vmatpush3.bf16.xpose.msk.msra.mxu0 %vm10839_vm5, %v9358_v39 }
 0xd82   :  { %9365 = vmatprep.subr.bf16.mxu0 %v10295_v16 }
 0xe06   :  { %v2045_v45 = vpop.xlane.xlu1 %2044 }
 0xe07   :  { %v2047_v46 = vmul.f32 0.03125, %v2045_v45  ;;  %v2042_v47 = vpop.xlane.xlu0 %2041  ;;  %v9362_v45 = vpack.c.bf16 %v2289_v42, %v2284_v44 }
 0xe08   :  { %v2046_v49 = vmul.f32 0.03125, %v2042_v47  ;;  %v8183_v47 = vld [vmem:[%s11712_s30] ss:$0 sm:$0xff] }
 0xe09   :  { %v2049_v50 = vsub.f32 %v10805_v43, %v2047_v46  ;;  %v10848_v46 = vpack.i.bf16 %v2289_v42, %v2284_v44 }
 0xe0a   :  { %v2048_v1 = vsub.f32 %v10808_v60, %v2046_v49 }
 0xe0b   :  { %v2051_v52 = vmul.f32 %v2049_v50, %v2049_v50 }
 0xe0c   :  { %v2050_v51 = vmul.f32 %v2048_v1, %v2048_v1 }
 0xe0d   :  { %v2055_v53 = vsel %vm289_vm0, %v2051_v52, 0.0 }
 0xe0e   :  { %v2052_v0 = vsel %vm289_vm0, %v2050_v51, 0.0 }
 0xe0f   :  { %2053 = vadd.xlane.f32.xlu0 %v2052_v0  ;;  %v8191_v0 = vld [vmem:[%s11715_s18] ss:$0 sm:$0xff] }
 0xe13   :  { %2056 = vadd.xlane.f32.xlu0 %v2055_v53 }
 0xe9c   :  { %v2054_v17 = vpop.xlane.xlu0 %2053 }
 0xe9d   :  { %v2058_v18 = vmul.f32 0.03125, %v2054_v17 }
 0xe9f   :  { %v2060_v19 = vadd.f32 1e-06, %v2058_v18 }
 0xea0   :  { %v2057_v20 = vpop.xlane.xlu0 %2056 }
 0xea1   :  { %9804 = vrsqrt.f32 %v2060_v19  ;;  %v2059_v21 = vmul.f32 0.03125, %v2057_v20 }
 0xea3   :  { %v2061_v54 = vadd.f32 1e-06, %v2059_v21 }
 0xea5   :  { %9806 = vrsqrt.f32 %v2061_v54 }
 0xeab   :  { %v9805_v22 = vpop.eup %9804 }
 0xeac   :  { %v2064_v24 = vmul.f32 %v9805_v22, %v2048_v1 }
 0xeae   :  { %v2072_v26 = vmul.f32 %v8181_v23, %v2064_v24 }
 0xeaf   :  { %v9807_v27 = vpop.eup %9806 }
 0xeb0   :  { %v2065_v28 = vmul.f32 %v9807_v27, %v2049_v50  ;;  %v2080_v29 = vadd.f32 %v8182_v25, %v2072_v26 }
 0xeb2   :  { %v2073_v33 = vmul.f32 %v8181_v23, %v2065_v28  ;;  %8801 = vmatprep.mubr.msk.f32.mxu1 %vm289_vm0, %v2080_v29 }
 0xeb4   :  { %v2081_v59 = vadd.f32 %v8182_v25, %v2073_v33 }
 0xeb6   :  { %8802 = vmatmul.mubr.msk.f32.vlgmr.msra.gmra.mrb[22].mxu1 %vm289_vm0, %v2081_v59 }
 0xeb7   :  { %9352 = vmatpush3.bf16.msra.mxu1 %v9349_v15  ;;  %8826 = vmatprep.mubr.msk.f32.mxu1 %vm289_vm0, %v279_v4 }
 0xeb8   :  { %9354 = vmatprep.subr.bf16.mxu1 %v9353_v61 }
 0xebb   :  { %9356 = vmatpush3.bf16.msra.mxu1 %v9353_v61 }
 0xebc   :  { %9361 = vmatprep.subr.bf16.mxu1 %v10295_v16 }
 0xebe   :  { %8827 = vmatmul.mubr.msk.f32.vlgmr.msra.gmra.mrb[24].mxu1 %vm289_vm0, %v280_v6 }
 0xebf   :  { %8829 = vmatprep.mubr.msk.f32.mxu1 %vm289_vm0, %v281_v5 }
 0xec2   :  { %8830 = vmatmul.mubr.msk.f32.gmra.mrb[26].mxu1 %vm289_vm0, %v282_v12 }
 0xec3   :  { %8843 = vmatprep.mubr.msk.f32.mxu1 %vm10289_vm1, %v10288_v48 }
 0xec4   :  { %9364 = vmatpush3.bf16.xpose.msk.msra.mxu1 %vm10839_vm5, %v9362_v45 }
 0xec5   :  { %9368 = vmatprep.subr.bf16.mxu1 %v10295_v16 }
 0xf89   :  { %v8803_v49 = vpop.f32.mrb[22].mxu1 }
 0xf8a   :  { %v10854_v50 = vadd.f32 %v8803_v49, %v8183_v47  ;;  %v2180_v1 = vpop.f32.mrb[23].mxu1 }
 0xf8b   :  { %v10856_v51 = vadd.f32 %v8183_v47, %v2180_v1 }
 0xf8c   :  { %8844 = vmatmul.mubr.msk.f32.vlgmr.msra.gmra.mrb[28].mxu1 %vm604_vm2, %v10854_v50 }
 0xf8d   :  { %8837 = vmatmul.mubr.msk.f32.vlgmr.msra.gmra.mrb[22].mxu0 %vm604_vm2, %v10856_v51  ;;  %8857 = vmatprep.mubr.msk.f32.mxu1 %vm10289_vm1, %v10288_v48 }
 0xf8e   :  { %8850 = vmatprep.mubr.msk.f32.mxu0 %vm10289_vm1, %v10288_v48 }
 0xf91   :  { %v8828_v52 = vpop.f32.mrb[24].mxu1 }
 0xf92   :  { %v10867_v53 = vadd.f32 %v8828_v52, %v8191_v0  ;;  %v2364_v55 = vpop.f32.mrb[25].mxu1 }
 0xf93   :  { %v10869_v56 = vadd.f32 %v8191_v0, %v2364_v55 }
 0xf95   :  { %v8831_v57 = vpop.f32.mrb[26].mxu1  ;;  %v9366_v58 = vpack.c.bf16 %v10867_v53, %v10869_v56 }
 0xf96   :  { %v2380_v2 = vadd.f32 %v8831_v57, %v8191_v0  ;;  %v2374_v3 = vpop.f32.mrb[27].mxu1 }
 0xf97   :  { %v2375_v4 = vadd.f32 %v8191_v0, %v2374_v3  ;;  %9367 = vmatpush3.bf16.msra.mxu0 %v9366_v58 }
 0xf98   :  { %9371 = vmatprep.subr.bf16.mxu0 %v10295_v16 }
 0xf99   :  { %v9369_v6 = vpack.c.bf16 %v2380_v2, %v2375_v4  ;;  %v10874_v5 = vpack.i.bf16 %v2380_v2, %v2375_v4 }
 0xf9b   :  { %9370 = vmatpush3.bf16.msra.mxu1 %v9369_v6 }
 0xf9c   :  { %9375 = vmatprep.subr.bf16.mxu1 %v10295_v16 }
0x105f   :  { %v2537_v63 = vpop.f32.mrb[28].mxu1 }
0x1060   :  { %v2538_v9 = vadd.f32 %v2537_v63, %v10877_v7  ;;  %v2458_v10 = vpop.f32.mrb[22].mxu0  ;;  %v8845_v11 = vpop.f32.mrb[29].mxu1 }
0x1061   :  { %v2459_v12 = vadd.f32 %v2458_v10, %v10879_v8  ;;  %v8838_v13 = vpop.f32.mrb[23].mxu0 }
0x1062   :  { %v2544_v14 = vsel %vm1943_vm4, %v2538_v9, -inf }
0x1063   :  { %2545 = vmax.xlane.f32.xlu1 %v2544_v14  ;;  %v2541_v15 = vsel %vm1943_vm4, %v2459_v12, -inf }
0x1064   :  { %2542 = vmax.xlane.f32.xlu0 %v2541_v15 }
0x10f0   :  { %v2546_v17 = vpop.xlane.xlu1 %2545 }
0x10f1   :  { %v2548_v18 = vsub.f32 %v2538_v9, %v2546_v17  ;;  %v2543_v19 = vpop.xlane.xlu0 %2542 }
0x10f2   :  { %v2547_v20 = vsub.f32 %v2459_v12, %v2543_v19  ;;  %v10940_v19 = vpack.i.bf16 %v10867_v53, %v10869_v56 }
0x10f3   :  { %v2551_v21 = vmul.f32 1.442695, %v2548_v18 }
0x10f4   :  { %v2549_v54 = vmul.f32 1.442695, %v2547_v20 }
0x10f5   :  { %9808 = vpow2.f32 %v2551_v21 }
0x10f6   :  { %9810 = vpow2.f32 %v2549_v54 }
0x10ff   :  { %v9809_v22 = vpop.eup %9808 }
0x1100   :  { %v9811_v23 = vpop.eup %9810  ;;  %v2556_v24 = vsel %vm1943_vm4, %v9809_v22, 0.0 }
0x1101   :  { %2557 = vadd.xlane.f32.xlu1 %v2556_v24  ;;  %v2553_v25 = vsel %vm1943_vm4, %v9811_v23, 0.0 }
0x1102   :  { %2554 = vadd.xlane.f32.xlu0 %v2553_v25 }
0x1112   :  { %9654 = vrot.lane.b32.xlu1 %v10848_v46, %s10290_s9 }
0x1116   :  { %2709 = vrot.lane.b32.xlu1 %v10856_v51, %s10290_s9 }
0x1118   :  { %9649 = vrot.lane.b32.xlu0 %v10843_v41, %s10290_s9 }
0x111a   :  { %2791 = vrot.lane.b32.xlu1 %v10854_v50, %s10290_s9 }
0x118e   :  { %v2558_v26 = vpop.xlane.xlu1 %2557 }
0x118f   :  { %9812 = vrcp.f32 %v2558_v26  ;;  %v2555_v27 = vpop.xlane.xlu0 %2554 }
0x1190   :  { %9814 = vrcp.f32 %v2555_v27 }
0x1192   :  { %v9655_v28 = vpop.permute.xlu1 %9654 }
0x1193   :  { %v9650_v29 = vpop.permute.xlu0 %9649  ;;  %v9657_v30 = vunpack.i.h.bf16 %v9655_v28  ;;  %v9656_v31 = vunpack.i.l.bf16 %v9655_v28 }
0x1194   :  { %v9652_v33 = vunpack.i.h.bf16 %v9650_v29  ;;  %v9651_v59 = vunpack.i.l.bf16 %v9650_v29 }
0x1195   :  { %v9376_v36 = vpack.c.bf16 %v9657_v30, %v9656_v31 }
0x1196   :  { %v9372_v38 = vpack.c.bf16 %v9652_v33, %v9651_v59  ;;  %v2710_v39 = vpop.permute.xlu1 %2709 }
0x1199   :  { %v9813_v61 = vpop.eup %9812 }
0x119a   :  { %v9815_v62 = vpop.eup %9814  ;;  %v10895_v35 = vmul.f32 %v9813_v61, %v9809_v22  ;;  %v2792_v40 = vpop.permute.xlu1 %2791 }
0x119b   :  { %v10897_v37 = vmul.f32 %v9815_v62, %v9811_v23 }
0x119c   :  { %8858 = vmatmul.mubr.msk.f32.vlgmr.msra.gmra.mrb[30].mxu1 %vm1943_vm4, %v10895_v35 }
0x119d   :  { %9378 = vmatpush3.bf16.xpose.msk.msra.mxu1 %vm10839_vm5, %v9376_v36  ;;  %8851 = vmatmul.mubr.msk.f32.vlgmr.msra.gmra.mrb[24].mxu0 %vm1943_vm4, %v10897_v37 }
0x119e   :  { %9374 = vmatpush3.bf16.xpose.msk.msra.mxu0 %vm10839_vm5, %v9372_v38  ;;  %8871 = vmatprep.mubr.msk.f32.mxu1 %vm10289_vm1, %v10288_v48 }
0x119f   :  { %8864 = vmatprep.mubr.msk.f32.mxu0 %vm10289_vm1, %v10288_v48  ;;  %9382 = vmatprep.subr.bf16.mxu1 %v10295_v16 }
0x11a0   :  { %9379 = vmatprep.subr.bf16.mxu0 %v10295_v16 }
0x11a4   :  { %8872 = vmatmul.mubr.msk.f32.vlgmr.msra.gmra.mrb[32].mxu1 %vm604_vm2, %v2792_v40 }
0x11a5   :  { %8865 = vmatmul.mubr.msk.f32.vlgmr.msra.gmra.mrb[26].mxu0 %vm604_vm2, %v2710_v39  ;;  %8885 = vmatprep.mubr.msk.f32.mxu1 %vm10289_vm1, %v10288_v48 }
0x11a6   :  { %8878 = vmatprep.mubr.msk.f32.mxu0 %vm10289_vm1, %v10288_v48 }
0x126f   :  { %v10919_v42 = vpop.f32.mrb[30].mxu1 }
0x1270   :  { %v10921_v34 = vpop.f32.mrb[24].mxu0  ;;  %v8859_v44 = vpop.f32.mrb[31].mxu1 }
0x1271   :  { %v8852_v45 = vpop.f32.mrb[25].mxu0 }
0x1277   :  { %v2869_v47 = vpop.f32.mrb[32].mxu1 }
0x1278   :  { %v2870_v49 = vadd.f32 %v2869_v47, %v10877_v7  ;;  %v2787_v1 = vpop.f32.mrb[26].mxu0  ;;  %v8873_v0 = vpop.f32.mrb[33].mxu1 }
0x1279   :  { %v2788_v52 = vadd.f32 %v2787_v1, %v10879_v8  ;;  %v8866_v55 = vpop.f32.mrb[27].mxu0 }
0x127a   :  { %v2876_v57 = vsel %vm1943_vm4, %v2870_v49, -inf }
0x127b   :  { %2877 = vmax.xlane.f32.xlu1 %v2876_v57  ;;  %v2873_v58 = vsel %vm1943_vm4, %v2788_v52, -inf }
0x127c   :  { %2874 = vmax.xlane.f32.xlu0 %v2873_v58 }
0x128c   :  { %9664 = vrot.lane.b32.xlu1 %v10874_v5, %s10290_s9 }
0x1290   :  { %9669 = vrot.lane.b32.xlu1 %v10843_v41, %s10291_s5 }
0x1294   :  { %9674 = vrot.lane.b32.xlu1 %v10848_v46, %s10291_s5 }
0x1298   :  { %3139 = vrot.lane.b32.xlu1 %v10854_v50, %s10291_s5 }
0x1308   :  { %v2878_v2 = vpop.xlane.xlu1 %2877 }
0x1309   :  { %v2880_v3 = vsub.f32 %v2870_v49, %v2878_v2  ;;  %v2875_v4 = vpop.xlane.xlu0 %2874 }
0x130a   :  { %v2879_v6 = vsub.f32 %v2788_v52, %v2875_v4 }
0x130b   :  { %v2883_v63 = vmul.f32 1.442695, %v2880_v3 }
0x130c   :  { %v2881_v9 = vmul.f32 1.442695, %v2879_v6  ;;  %v9665_v10 = vpop.permute.xlu1 %9664 }
0x130d   :  { %9816 = vpow2.f32 %v2883_v63  ;;  %v9667_v11 = vunpack.i.h.bf16 %v9665_v10  ;;  %v9666_v12 = vunpack.i.l.bf16 %v9665_v10 }
0x130e   :  { %9818 = vpow2.f32 %v2881_v9 }
0x130f   :  { %v9383_v13 = vpack.c.bf16 %v9667_v11, %v9666_v12 }
0x1310   :  { %v9670_v20 = vpop.permute.xlu1 %9669 }
0x1311   :  { %9384 = vmatpush3.bf16.msra.mxu1 %v9383_v13  ;;  %v9672_v31 = vunpack.i.h.bf16 %v9670_v20  ;;  %v9671_v33 = vunpack.i.l.bf16 %v9670_v20 }
0x1312   :  { %9389 = vmatprep.subr.bf16.mxu1 %v10295_v16 }
0x1313   :  { %v9386_v61 = vpack.c.bf16 %v9672_v31, %v9671_v33 }
0x1314   :  { %v9675_v22 = vpop.permute.xlu1 %9674 }
0x1315   :  { %v9677_v24 = vunpack.i.h.bf16 %v9675_v22  ;;  %v9676_v25 = vunpack.i.l.bf16 %v9675_v22 }
0x1317   :  { %v9817_v14 = vpop.eup %9816  ;;  %v9390_v29 = vpack.c.bf16 %v9677_v24, %v9676_v25 }
0x1318   :  { %v2888_v15 = vsel %vm1943_vm4, %v9817_v14, 0.0  ;;  %v9819_v17 = vpop.eup %9818  ;;  %v3140_v62 = vpop.permute.xlu1 %3139 }
0x1319   :  { %2889 = vadd.xlane.f32.xlu0 %v2888_v15  ;;  %v2885_v18 = vsel %vm1943_vm4, %v9819_v17, 0.0 }
0x131d   :  { %2886 = vadd.xlane.f32.xlu0 %v2885_v18 }
0x1333   :  { %9659 = vrot.lane.b32.xlu0 %v10940_v19, %s10290_s9 }
0x1337   :  { %3057 = vrot.lane.b32.xlu0 %v10856_v51, %s10291_s5 }
0x13a6   :  { %v2890_v21 = vpop.xlane.xlu0 %2889 }
0x13a7   :  { %9820 = vrcp.f32 %v2890_v21 }
0x13aa   :  { %v2887_v54 = vpop.xlane.xlu0 %2886 }
0x13ab   :  { %9822 = vrcp.f32 %v2887_v54 }
0x13ae   :  { %v9660_v23 = vpop.permute.xlu0 %9659 }
0x13af   :  { %v9662_v26 = vunpack.i.h.bf16 %v9660_v23  ;;  %v9661_v27 = vunpack.i.l.bf16 %v9660_v23 }
0x13b1   :  { %v9821_v28 = vpop.eup %9820  ;;  %v9380_v53 = vpack.c.bf16 %v9662_v26, %v9661_v27 }
0x13b2   :  { %v10946_v56 = vmul.f32 %v9821_v28, %v9817_v14  ;;  %v3058_v36 = vpop.permute.xlu0 %3057 }
0x13b3   :  { %9381 = vmatpush3.bf16.msra.mxu0 %v9380_v53 }
0x13b4   :  { %8886 = vmatmul.mubr.msk.f32.vlgmr.msra.gmra.mrb[34].mxu1 %vm1943_vm4, %v10946_v56  ;;  %9385 = vmatprep.subr.bf16.mxu0 %v10295_v16 }
0x13b5   :  { %v9823_v30 = vpop.eup %9822  ;;  %9392 = vmatpush3.bf16.xpose.msk.msra.mxu1 %vm10839_vm5, %v9390_v29  ;;  %8899 = vmatprep.mubr.msk.f32.mxu1 %vm10289_vm1, %v10288_v48 }
0x13b6   :  { %v10955_v59 = vmul.f32 %v9823_v30, %v9819_v17  ;;  %9396 = vmatprep.subr.bf16.mxu1 %v10295_v16 }
0x13b8   :  { %8879 = vmatmul.mubr.msk.f32.vlgmr.msra.gmra.mrb[28].mxu0 %vm1943_vm4, %v10955_v59 }
0x13b9   :  { %8892 = vmatprep.mubr.msk.f32.mxu0 %vm10289_vm1, %v10288_v48 }
0x13bc   :  { %8900 = vmatmul.mubr.msk.f32.vlgmr.msra.gmra.mrb[36].mxu1 %vm604_vm2, %v3140_v62  ;;  %9388 = vmatpush3.bf16.xpose.msk.msra.mxu0 %vm10839_vm5, %v9386_v61 }
0x13bd   :  { %8913 = vmatprep.mubr.msk.f32.mxu1 %vm10289_vm1, %v10288_v48  ;;  %9393 = vmatprep.subr.bf16.mxu0 %v10295_v16 }
0x13c3   :  { %8893 = vmatmul.mubr.msk.f32.vlgmr.msra.gmra.mrb[30].mxu0 %vm604_vm2, %v3058_v36 }
0x13c4   :  { %8906 = vmatprep.mubr.msk.f32.mxu0 %vm10289_vm1, %v10288_v48 }
0x1487   :  { %v10971_v38 = vpop.f32.mrb[34].mxu1 }
0x1488   :  { %v8887_v39 = vpop.f32.mrb[35].mxu1 }
0x148b   :  { %v10973_v40 = vpop.f32.mrb[28].mxu0 }
0x148c   :  { %v8880_v44 = vpop.f32.mrb[29].mxu0 }
0x148f   :  { %v3217_v45 = vpop.f32.mrb[36].mxu1 }
0x1490   :  { %v3218_v47 = vadd.f32 %v3217_v45, %v10877_v7  ;;  %v8901_v49 = vpop.f32.mrb[37].mxu1 }
0x1492   :  { %v3224_v1 = vsel %vm1943_vm4, %v3218_v47, -inf }
0x1493   :  { %3225 = vmax.xlane.f32.xlu1 %v3224_v1 }
0x1496   :  { %v3135_v0 = vpop.f32.mrb[30].mxu0 }
0x1497   :  { %v3136_v52 = vadd.f32 %v3135_v0, %v10879_v8  ;;  %v8894_v55 = vpop.f32.mrb[31].mxu0 }
0x1499   :  { %v3221_v57 = vsel %vm1943_vm4, %v3136_v52, -inf }
0x149a   :  { %3222 = vmax.xlane.f32.xlu0 %v3221_v57 }
0x14a4   :  { %9684 = vrot.lane.b32.xlu1 %v10874_v5, %s10291_s5 }
0x14a8   :  { %9689 = vrot.lane.b32.xlu1 %v10843_v41, %s10292_s7 }
0x14ac   :  { %9694 = vrot.lane.b32.xlu1 %v10848_v46, %s10292_s7 }
0x14b0   :  { %3483 = vrot.lane.b32.xlu1 %v10854_v50, %s10292_s7 }
0x1520   :  { %v3226_v58 = vpop.xlane.xlu1 %3225 }
0x1521   :  { %v3228_v2 = vsub.f32 %v3218_v47, %v3226_v58 }
0x1523   :  { %v3231_v3 = vmul.f32 1.442695, %v3228_v2 }
0x1524   :  { %v9685_v4 = vpop.permute.xlu1 %9684 }
0x1525   :  { %9824 = vpow2.f32 %v3231_v3  ;;  %v9687_v6 = vunpack.i.h.bf16 %v9685_v4  ;;  %v9686_v63 = vunpack.i.l.bf16 %v9685_v4 }
0x1527   :  { %v9397_v9 = vpack.c.bf16 %v9687_v6, %v9686_v63  ;;  %v3223_v10 = vpop.xlane.xlu0 %3222 }
0x1528   :  { %v3227_v11 = vsub.f32 %v3136_v52, %v3223_v10  ;;  %v9690_v14 = vpop.permute.xlu1 %9689 }
0x1529   :  { %9398 = vmatpush3.bf16.msra.mxu1 %v9397_v9  ;;  %v9692_v28 = vunpack.i.h.bf16 %v9690_v14  ;;  %v9691_v53 = vunpack.i.l.bf16 %v9690_v14 }
0x152a   :  { %v3229_v12 = vmul.f32 1.442695, %v3227_v11  ;;  %9403 = vmatprep.subr.bf16.mxu1 %v10295_v16 }
0x152b   :  { %v9400_v31 = vpack.c.bf16 %v9692_v28, %v9691_v53 }
0x152c   :  { %9826 = vpow2.f32 %v3229_v12  ;;  %v9695_v17 = vpop.permute.xlu1 %9694 }
0x152d   :  { %v9697_v20 = vunpack.i.h.bf16 %v9695_v17  ;;  %v9696_v21 = vunpack.i.l.bf16 %v9695_v17 }
0x152f   :  { %v9825_v41 = vpop.eup %9824  ;;  %v9404_v26 = vpack.c.bf16 %v9697_v20, %v9696_v21  ;;  %v2098_v20 = vld [vmem:[#allocation16 + $0x8] sm:$0xff]  ;;  %v2099_v21 = vld [vmem:[#allocation16 + $0x10] sm:$0xff] }
0x1530   :  { %v3236_v46 = vsel %vm1943_vm4, %v9825_v41, 0.0  ;;  %v3484_v30 = vpop.permute.xlu1 %3483 }
0x1531   :  { %3237 = vadd.xlane.f32.xlu0 %v3236_v46 }
0x1536   :  { %v9827_v50 = vpop.eup %9826 }
0x1537   :  { %v3233_v13 = vsel %vm1943_vm4, %v9827_v50, 0.0 }
0x1538   :  { %3234 = vadd.xlane.f32.xlu0 %v3233_v13 }
0x154e   :  { %9679 = vrot.lane.b32.xlu0 %v10940_v19, %s10291_s5 }
0x1552   :  { %3401 = vrot.lane.b32.xlu0 %v10856_v51, %s10292_s7 }
0x15be   :  { %v3238_v15 = vpop.xlane.xlu0 %3237 }
0x15bf   :  { %9828 = vrcp.f32 %v3238_v15 }
0x15c5   :  { %v3235_v18 = vpop.xlane.xlu0 %3234 }
0x15c6   :  { %9830 = vrcp.f32 %v3235_v18 }
0x15c9   :  { %v9829_v54 = vpop.eup %9828  ;;  %v9680_v22 = vpop.permute.xlu0 %9679 }
0x15ca   :  { %v9682_v23 = vunpack.i.h.bf16 %v9680_v22  ;;  %v9681_v24 = vunpack.i.l.bf16 %v9680_v22  ;;  %v10994_v25 = vmul.f32 %v9829_v54, %v9825_v41  ;;  %v2100_v22 = vld [vmem:[#allocation16 + $0x18] sm:$0xff] }
0x15cc   :  { %v9394_v27 = vpack.c.bf16 %v9682_v23, %v9681_v24  ;;  %8914 = vmatmul.mubr.msk.f32.vlgmr.msra.gmra.mrb[38].mxu1 %vm1943_vm4, %v10994_v25  ;;  %v9417_v23 = vpack.c.bf16 %v2100_v22, %v2099_v21 }
0x15cd   :  { %9406 = vmatpush3.bf16.xpose.msk.msra.mxu1 %vm10839_vm5, %v9404_v26  ;;  %8927 = vmatprep.mubr.msk.f32.mxu1 %vm10289_vm1, %v10288_v48  ;;  %v3402_v33 = vpop.permute.xlu0 %3401 }
0x15ce   :  { %9395 = vmatpush3.bf16.msra.mxu0 %v9394_v27  ;;  %9410 = vmatprep.subr.bf16.mxu1 %v10295_v16 }
0x15cf   :  { %9399 = vmatprep.subr.bf16.mxu0 %v10295_v16 }
0x15d0   :  { %v9831_v51 = vpop.eup %9830 }
0x15d1   :  { %v11004_v29 = vmul.f32 %v9831_v51, %v9827_v50 }
0x15d3   :  { %8907 = vmatmul.mubr.msk.f32.vlgmr.msra.gmra.mrb[32].mxu0 %vm1943_vm4, %v11004_v29 }
0x15d4   :  { %8928 = vmatmul.mubr.msk.f32.vlgmr.msra.gmra.mrb[40].mxu1 %vm604_vm2, %v3484_v30  ;;  %8920 = vmatprep.mubr.msk.f32.mxu0 %vm10289_vm1, %v10288_v48 }
0x15d5   :  { %8941 = vmatprep.mubr.msk.f32.mxu1 %vm10289_vm1, %v10288_v48 }
0x15d7   :  { %9402 = vmatpush3.bf16.xpose.msk.msra.mxu0 %vm10839_vm5, %v9400_v31 }
0x15d8   :  { %9407 = vmatprep.subr.bf16.mxu0 %v10295_v16 }
0x15de   :  { %8921 = vmatmul.mubr.msk.f32.vlgmr.msra.gmra.mrb[34].mxu0 %vm604_vm2, %v3402_v33 }
0x15df   :  { %8934 = vmatprep.mubr.msk.f32.mxu0 %vm10289_vm1, %v10288_v48 }
0x169f   :  { %v3397_v61 = vpop.f32.mrb[38].mxu1 }
0x16a0   :  { %v8915_v62 = vpop.f32.mrb[39].mxu1 }
0x16a6   :  { %v3318_v36 = vpop.f32.mrb[32].mxu0 }
0x16a7   :  { %v3561_v39 = vpop.f32.mrb[40].mxu1  ;;  %v8908_v44 = vpop.f32.mrb[33].mxu0 }
0x16a8   :  { %v3562_v45 = vadd.f32 %v3561_v39, %v10877_v7  ;;  %v8929_v47 = vpop.f32.mrb[41].mxu1 }
0x16aa   :  { %v3568_v49 = vsel %vm1943_vm4, %v3562_v45, -inf }
0x16ab   :  { %3569 = vmax.xlane.f32.xlu1 %v3568_v49  ;;  %v8228_v49 = vld [vmem:[%s11716_s27] ss:$0 sm:$0xff] }
0x16b1   :  { %v3479_v1 = vpop.f32.mrb[34].mxu0 }
0x16b2   :  { %v3480_v0 = vadd.f32 %v3479_v1, %v10879_v8  ;;  %v8922_v52 = vpop.f32.mrb[35].mxu0 }
0x16b4   :  { %v3565_v55 = vsel %vm1943_vm4, %v3480_v0, -inf }
0x16b5   :  { %3566 = vmax.xlane.f32.xlu0 %v3565_v55 }
0x16bc   :  { %9704 = vrot.lane.b32.xlu1 %v10874_v5, %s10292_s7 }
0x16c0   :  { %3747 = vrot.lane.b32.xlu1 %v10973_v40, %s10279_s28 }
0x16c4   :  { %3749 = vrot.lane.b32.xlu1 %v10971_v38, %s10279_s28 }
0x16c8   :  { %3757 = vrot.lane.b32.xlu1 %v3397_v61, %s10293_s10 }
0x1738   :  { %v3570_v7 = vpop.xlane.xlu1 %3569 }
0x1739   :  { %v3572_v57 = vsub.f32 %v3562_v45, %v3570_v7 }
0x173b   :  { %v3575_v58 = vmul.f32 1.442695, %v3572_v57 }
0x173c   :  { %v9705_v2 = vpop.permute.xlu1 %9704 }
0x173d   :  { %9832 = vpow2.f32 %v3575_v58  ;;  %v9707_v8 = vunpack.i.h.bf16 %v9705_v2  ;;  %v9706_v3 = vunpack.i.l.bf16 %v9705_v2 }
0x173f   :  { %v9411_v4 = vpack.c.bf16 %v9707_v8, %v9706_v3 }
0x1740   :  { %v3748_v28 = vpop.permute.xlu1 %3747 }
0x1741   :  { %9412 = vmatpush3.bf16.msra.mxu1 %v9411_v4  ;;  %v3769_v33 = vsel %vm604_vm2, %v10921_v34, %v3748_v28  ;;  %v4046_v28 = vld [vmem:[%s11719_s23] sm:$0xff] }
0x1742   :  { %v3567_v6 = vpop.xlane.xlu0 %3566 }
0x1743   :  { %v3571_v63 = vsub.f32 %v3480_v0, %v3567_v6 }
0x1744   :  { %v3750_v53 = vpop.permute.xlu1 %3749 }
0x1745   :  { %v3573_v5 = vmul.f32 1.442695, %v3571_v63  ;;  %v3770_v62 = vsel %vm604_vm2, %v10919_v42, %v3750_v53  ;;  %v4047_v53 = vld [vmem:[%s11719_s23 + $0x8] sm:$0xff] }
0x1747   :  { %v9833_v9 = vpop.eup %9832  ;;  %9834 = vpow2.f32 %v3573_v5 }
0x1748   :  { %v3580_v40 = vsel %vm1943_vm4, %v9833_v9, 0.0  ;;  %v3758_v30 = vpop.permute.xlu1 %3757 }
0x1749   :  { %3581 = vadd.xlane.f32.xlu0 %v3580_v40  ;;  %v3772_v44 = vsel %vm1943_vm4, %v3770_v62, %v3758_v30  ;;  %v3937_v40 = vld [vmem:[#allocation17 + $0x8] sm:$0xff]  ;;  %v4048_v30 = vld [vmem:[%s11719_s23 + $0x10] sm:$0xff]  ;;  %v4050_v62 = vld [vmem:[%s11719_s23 + $0x20] sm:$0xff] }
0x1751   :  { %v9835_v38 = vpop.eup %9834 }
0x1752   :  { %v3577_v10 = vsel %vm1943_vm4, %v9835_v38, 0.0 }
0x1753   :  { %3578 = vadd.xlane.f32.xlu0 %v3577_v10 }
0x1769   :  { %9699 = vrot.lane.b32.xlu0 %v10940_v19, %s10292_s7  ;;  %v2097_v19 = vld [vmem:[#allocation16] sm:$0xff] }
0x176a   :  { %v9413_v54 = vpack.c.bf16 %v2098_v20, %v2097_v19  ;;  %v8231_v20 = vld [vmem:[%s11717_s22] ss:$0 sm:$0xff] }
0x176d   :  { %3755 = vrot.lane.b32.xlu0 %v3318_v36, %s10293_s10 }
0x17d6   :  { %v3582_v11 = vpop.xlane.xlu0 %3581 }
0x17d7   :  { %9836 = vrcp.f32 %v3582_v11  ;;  %v3939_v11 = vld [vmem:[#allocation17 + $0x18] sm:$0xff] }
0x17e0   :  { %v3579_v12 = vpop.xlane.xlu0 %3578 }
0x17e1   :  { %v9837_v41 = vpop.eup %9836  ;;  %9838 = vrcp.f32 %v3579_v12 }
0x17e2   :  { %v11035_v46 = vmul.f32 %v9837_v41, %v9833_v9  ;;  %v3936_v9 = vld [vmem:[#allocation17] sm:$0xff] }
0x17e3   :  { %v9421_v10 = vpack.c.bf16 %v3937_v40, %v3936_v9 }
0x17e4   :  { %8942 = vmatmul.mubr.msk.f32.vlgmr.msra.gmra.mrb[42].mxu1 %vm1943_vm4, %v11035_v46  ;;  %v9700_v50 = vpop.permute.xlu0 %9699 }
0x17e5   :  { %v9702_v13 = vunpack.i.h.bf16 %v9700_v50  ;;  %v9701_v14 = vunpack.i.l.bf16 %v9700_v50  ;;  %9422 = vmatprep.subr.bf16.mxu1 %v9421_v10 }
0x17e6   :  { %9424 = vmatpush3.bf16.msra.mxu1 %v9421_v10 }
0x17e7   :  { %v9408_v15 = vpack.c.bf16 %v9702_v13, %v9701_v14 }
0x17e8   :  { %v3756_v31 = vpop.permute.xlu0 %3755 }
0x17e9   :  { %9409 = vmatpush3.bf16.msra.mxu0 %v9408_v15  ;;  %v3771_v36 = vsel %vm1943_vm4, %v3769_v33, %v3756_v31  ;;  %v9429_v31 = vpack.c.bf16 %v4047_v53, %v4046_v28  ;;  %v4049_v33 = vld [vmem:[%s11719_s23 + $0x18] sm:$0xff]  ;;  %v8243_v53 = vld [vmem:[%s10339_s29 + $0x20] sm:$0xff] }
0x17ea   :  { %9414 = vmatprep.subr.bf16.mxu0 %v9413_v54 }
0x17eb   :  { %v9839_v17 = vpop.eup %9838 }
0x17ec   :  { %v11039_v18 = vmul.f32 %v9839_v17, %v9835_v38  ;;  %v3938_v38 = vld [vmem:[#allocation17 + $0x10] sm:$0xff] }
0x17ed   :  { %v9425_v12 = vpack.c.bf16 %v3939_v11, %v3938_v38 }
0x17ee   :  { %8935 = vmatmul.mubr.msk.f32.vlgmr.msra.gmra.mrb[36].mxu0 %vm1943_vm4, %v11039_v18 }
0x17ef   :  { %9416 = vmatpush3.bf16.msra.mxu0 %v9413_v54  ;;  %9426 = vmatprep.subr.bf16.mxu1 %v9425_v12  ;;  %v8232_v54 = vld [vmem:[%s11718_s0] ss:$0 sm:$0xff] }
0x17f0   :  { %9418 = vmatprep.subr.bf16.mxu0 %v9417_v23  ;;  %9428 = vmatpush3.bf16.msra.mxu1 %v9425_v12 }
0x17f3   :  { %9420 = vmatpush3.bf16.msra.mxu0 %v9417_v23 }
0x17f4   :  { %9430 = vmatprep.subr.bf16.mxu0 %v9429_v31 }
0x18b7   :  { %v3741_v24 = vpop.f32.mrb[42].mxu1 }
0x18b8   :  { %3765 = vrot.lane.b32.xlu1 %v3741_v24, %s10294_s11  ;;  %v8943_v26 = vpop.f32.mrb[43].mxu1 }
0x18c1   :  { %v3662_v27 = vpop.f32.mrb[36].mxu0 }
0x18c2   :  { %3763 = vrot.lane.b32.xlu0 %v3662_v27, %s10294_s11  ;;  %v8936_v51 = vpop.f32.mrb[37].mxu0 }
0x192a   :  { %v3766_v61 = vpop.permute.xlu1 %3765 }
0x192b   :  { %v3774_v47 = vsel %vm1946_vm3, %v3772_v44, %v3766_v61  ;;  %v9433_v61 = vpack.c.bf16 %v4049_v33, %v4048_v30  ;;  %v4052_v44 = vld [vmem:[%s11719_s23 + $0x30] sm:$0xff]  ;;  %v8244_v30 = vld [vmem:[%s10339_s29 + $0x28] sm:$0xff] }
0x192c   :  { %v9445_v33 = vpack.c.bf16 %v8244_v30, %v8243_v53 }
0x192e   :  { %9446 = vmatprep.subr.bf16.mxu1 %v9445_v33 }
0x1934   :  { %v3764_v39 = vpop.permute.xlu0 %3763 }
0x1935   :  { %v3773_v45 = vsel %vm1946_vm3, %v3771_v36, %v3764_v39  ;;  %v4051_v36 = vld [vmem:[%s11719_s23 + $0x28] sm:$0xff] }
0x1936   :  { %8952 = vmatprep.mubr.msk.f32.mxu0 %vm289_vm0, %v3773_v45  ;;  %v9437_v39 = vpack.c.bf16 %v4051_v36, %v4050_v62  ;;  %v4053_v45 = vld [vmem:[%s11719_s23 + $0x38] sm:$0xff]  ;;  %v8245_v62 = vld [vmem:[%s10339_s29 + $0x30] sm:$0xff] }
0x1937   :  { %8953 = vmatmul.mubr.msk.f32.vlgmr.msra.gmra.mrb[38].mxu0 %vm289_vm0, %v3774_v47  ;;  %v9441_v47 = vpack.c.bf16 %v4053_v45, %v4052_v44  ;;  %v8246_v36 = vld [vmem:[%s10339_s29 + $0x38] sm:$0xff]  ;;  %v8255_v45 = vld [vmem:[%s10359_s19 + $0x30] sm:$0xff]  ;;  %s10297_s29 = smov 48  }
0x1938   :  { %9432 = vmatpush3.bf16.msra.mxu0 %v9429_v31  ;;  %v8253_v31 = vld [vmem:[%s10359_s19 + $0x20] sm:$0xff]  ;;  %v9449_v44 = vpack.c.bf16 %v8246_v36, %v8245_v62 }
0x1939   :  { %9434 = vmatprep.subr.bf16.mxu0 %v9433_v61 }
0x193c   :  { %9436 = vmatpush3.bf16.msra.mxu0 %v9433_v61  ;;  %v8254_v61 = vld [vmem:[%s10359_s19 + $0x28] sm:$0xff] }
0x193d   :  { %9438 = vmatprep.subr.bf16.mxu0 %v9437_v39 }
0x1940   :  { %9440 = vmatpush3.bf16.msra.mxu0 %v9437_v39  ;;  %v9461_v39 = vpack.c.bf16 %v8254_v61, %v8253_v31  ;;  %v11165_v61 = vld [vmem:[#allocation7 + $0x8] sm:$0xff] }
0x1941   :  { %9442 = vmatprep.subr.bf16.mxu0 %v9441_v47 }
0x1944   :  { %9444 = vmatpush3.bf16.msra.mxu0 %v9441_v47  ;;  %v8256_v47 = vld [vmem:[%s10359_s19 + $0x38] sm:$0xff] }
0x1945   :  { %9462 = vmatprep.subr.bf16.mxu0 %v9461_v39 }
0x1a0a   :  { %v8954_v1 = vpop.f32.mrb[38].mxu0 }
0x1a0b   :  { %v3859_v34 = vadd.f32 %v8954_v1, %v8228_v49  ;;  %v3853_v0 = vpop.f32.mrb[39].mxu0 }
0x1a0c   :  { %v3854_v52 = vadd.f32 %v8228_v49, %v3853_v0  ;;  %v8233_v49 = vld [vmem:[%s11720_s12] ss:$0 sm:$0xff] }
0x1a0d   :  { %v11057_v42 = vadd.f32 %v3859_v34, %v10805_v43 }
0x1a0e   :  { %v11060_v55 = vadd.f32 %v3854_v52, %v10808_v60 }
0x1a0f   :  { %v3897_v7 = vsel %vm289_vm0, %v11057_v42, 0.0 }
0x1a10   :  { %3898 = vadd.xlane.f32.xlu1 %v3897_v7  ;;  %v3894_v57 = vsel %vm289_vm0, %v11060_v55, 0.0 }
0x1a11   :  { %3895 = vadd.xlane.f32.xlu0 %v3894_v57 }
0x1a9d   :  { %v3899_v58 = vpop.xlane.xlu1 %3898 }
0x1a9e   :  { %v3901_v2 = vmul.f32 0.03125, %v3899_v58  ;;  %v3896_v8 = vpop.xlane.xlu0 %3895 }
0x1a9f   :  { %v3900_v3 = vmul.f32 0.03125, %v3896_v8 }
0x1aa0   :  { %v3903_v4 = vsub.f32 %v11057_v42, %v3901_v2 }
0x1aa1   :  { %v3902_v43 = vsub.f32 %v11060_v55, %v3900_v3 }
0x1aa2   :  { %v3905_v63 = vmul.f32 %v3903_v4, %v3903_v4 }
0x1aa3   :  { %v3904_v6 = vmul.f32 %v3902_v43, %v3902_v43 }
0x1aa4   :  { %v3909_v5 = vsel %vm289_vm0, %v3905_v63, 0.0 }
0x1aa5   :  { %v3906_v60 = vsel %vm289_vm0, %v3904_v6, 0.0 }
0x1aa6   :  { %3907 = vadd.xlane.f32.xlu0 %v3906_v60 }
0x1aaa   :  { %3910 = vadd.xlane.f32.xlu0 %v3909_v5 }
0x1b33   :  { %v3908_v41 = vpop.xlane.xlu0 %3907 }
0x1b34   :  { %v3912_v50 = vmul.f32 0.03125, %v3908_v41  ;;  %v8236_v41 = vld [vmem:[%s11721_s1] ss:$0 sm:$0xff] }
0x1b36   :  { %v3914_v13 = vadd.f32 1e-06, %v3912_v50 }
0x1b37   :  { %v3911_v14 = vpop.xlane.xlu0 %3910 }
0x1b38   :  { %9840 = vrsqrt.f32 %v3914_v13  ;;  %v3913_v15 = vmul.f32 0.03125, %v3911_v14 }
0x1b3a   :  { %v3915_v17 = vadd.f32 1e-06, %v3913_v15 }
0x1b3c   :  { %9842 = vrsqrt.f32 %v3915_v17 }
0x1b42   :  { %v9841_v19 = vpop.eup %9840 }
0x1b43   :  { %v3918_v21 = vmul.f32 %v9841_v19, %v3902_v43 }
0x1b45   :  { %v3926_v22 = vmul.f32 %v8231_v20, %v3918_v21 }
0x1b46   :  { %v9843_v23 = vpop.eup %9842 }
0x1b47   :  { %v3919_v24 = vmul.f32 %v9843_v23, %v3903_v4  ;;  %v3934_v26 = vadd.f32 %v8232_v54, %v3926_v22 }
0x1b49   :  { %v3927_v27 = vmul.f32 %v8231_v20, %v3919_v24  ;;  %8963 = vmatprep.mubr.msk.f32.mxu1 %vm289_vm0, %v3934_v26 }
0x1b4b   :  { %v3935_v51 = vadd.f32 %v8232_v54, %v3927_v27 }
0x1b4d   :  { %8964 = vmatmul.mubr.msk.f32.vlgmr.msra.gmra.mrb[44].mxu1 %vm289_vm0, %v3935_v51 }
0x1b4e   :  { %9448 = vmatpush3.bf16.msra.mxu1 %v9445_v33 }
0x1b4f   :  { %9450 = vmatprep.subr.bf16.mxu1 %v9449_v44 }
0x1b52   :  { %9452 = vmatpush3.bf16.msra.mxu1 %v9449_v44 }
0x1c20   :  { %v8965_v1 = vpop.f32.mrb[44].mxu1 }
0x1c21   :  { %v4025_v34 = vadd.f32 %v8965_v1, %v8233_v49  ;;  %v4019_v0 = vpop.f32.mrb[45].mxu1  ;;  %v8248_v1 = vld [vmem:[%s10349_s8 + $0x20] sm:$0xff] }
0x1c22   :  { %v4020_v52 = vadd.f32 %v8233_v49, %v4019_v0  ;;  %v9465_v49 = vpack.c.bf16 %v8256_v47, %v8255_v45 }
0x1c23   :  { %v4031_v7 = vmul.f32 0.044715, %v4025_v34  ;;  %v4029_v10 = vmul.f32 0.5, %v4025_v34 }
0x1c24   :  { %v4030_v57 = vmul.f32 0.044715, %v4020_v52  ;;  %v4028_v40 = vmul.f32 0.5, %v4020_v52 }
0x1c25   :  { %v4033_v58 = vmul.f32 %v4031_v7, %v4025_v34 }
0x1c26   :  { %v4032_v2 = vmul.f32 %v4030_v57, %v4020_v52 }
0x1c27   :  { %v4035_v8 = vmul.f32 %v4033_v58, %v4025_v34 }
0x1c28   :  { %v4034_v3 = vmul.f32 %v4032_v2, %v4020_v52 }
0x1c29   :  { %v4037_v4 = vadd.f32 %v4035_v8, %v4025_v34  ;;  %v8249_v34 = vld [vmem:[%s10349_s8 + $0x28] sm:$0xff] }
0x1c2a   :  { %v4036_v43 = vadd.f32 %v4034_v3, %v4020_v52  ;;  %v9453_v0 = vpack.c.bf16 %v8249_v34, %v8248_v1 }
0x1c2b   :  { %v4039_v6 = vmul.f32 0.7978846, %v4037_v4  ;;  %v8241_v4 = vld [vmem:[%s10329_s21 + $0x1] ss:$0 sm:$0xff]  ;;  %s10296_s21 = smov 32  }
0x1c2c   :  { %v4038_v60 = vmul.f32 0.7978846, %v4036_v43  ;;  %9454 = vmatprep.subr.bf16.mxu1 %v9453_v0 }
0x1c2d   :  { %9844 = vtanh.f32 %v4039_v6 }
0x1c2e   :  { %9846 = vtanh.f32 %v4038_v60  ;;  %v8242_v60 = vld [vmem:[%s11704_s3 + $0x1] ss:$0 sm:$0xff]  ;;  %s10299_s3 = smov [#allocation22]  }
0x1c37   :  { %v9845_v63 = vpop.eup %9844 }
0x1c38   :  { %v9847_v5 = vpop.eup %9846  ;;  %v4043_v9 = vadd.f32 1.0, %v9845_v63 }
0x1c39   :  { %v4042_v38 = vadd.f32 1.0, %v9847_v5 }
0x1c3a   :  { %v4045_v12 = vmul.f32 %v4043_v9, %v4029_v10 }
0x1c3b   :  { %v4044_v11 = vmul.f32 %v4042_v38, %v4028_v40  ;;  %v8250_v40 = vld [vmem:[%s10349_s8 + $0x30] sm:$0xff]  ;;  %v8251_v38 = vld [vmem:[%s10349_s8 + $0x38] sm:$0xff]  ;;  %s10298_s8 = smov [#allocation20]  }
0x1c3c   :  { %s8073_s19 = sshll.u32 %s10298_s8, 4  ;;  %s8074_s19 = int_to_ptr.vmem [resolvable:$true] %s8073_s19 }
0x1c3d   :  { %8982 = vmatprep.mubr.msk.f32.mxu0 %vm3887_vm6, %v4044_v11  ;;  %p10165_p11 = scmp.lt.s32.totalorder %s8074_s19, %s8074_s19 }
0x1c3e   :  { %8983 = vmatmul.mubr.msk.f32.vlgmr.msra.gmra.mrb[40].mxu0 %vm3887_vm6, %v4045_v12  ;;  %v9457_v12 = vpack.c.bf16 %v8251_v38, %v8250_v40 }
0x1c3f   :  { %9464 = vmatpush3.bf16.msra.mxu0 %v9461_v39 }
0x1c40   :  { %9466 = vmatprep.subr.bf16.mxu0 %v9465_v49 }
0x1c43   :  { %9468 = vmatpush3.bf16.msra.mxu0 %v9465_v49 }
0x1c44   :  { %9028 = vmatprep.subr.mxu0 %v10288_v48 }
0x1d11   :  { %v8984_v50 = vpop.f32.mrb[40].mxu0 }
0x1d12   :  { %v4139_v13 = vadd.f32 %v8984_v50, %v8236_v41  ;;  %v4133_v14 = vpop.f32.mrb[41].mxu0 }
0x1d13   :  { %v4134_v15 = vadd.f32 %v8236_v41, %v4133_v14  ;;  %v8265_v41 = vld [vmem:[%s11705_s24 + $0x1] ss:$0 sm:$0xff]  ;;  %s8085_s24 = sshll.u32 %s10299_s3, 4  ;;  %s11635_s24 = int_to_ptr.vmem [resolvable:$true] %s8085_s24 }
0x1d14   :  { %v11087_v17 = vadd.f32 %v4139_v13, %v11057_v42 }
0x1d15   :  { %v11090_v19 = vadd.f32 %v4134_v15, %v11060_v55 }
0x1d16   :  { %v4151_v20 = vsel %vm289_vm0, %v11087_v17, 0.0 }
0x1d17   :  { %4152 = vadd.xlane.f32.xlu1 %v4151_v20  ;;  %v4148_v21 = vsel %vm289_vm0, %v11090_v19, 0.0 }
0x1d18   :  { %4149 = vadd.xlane.f32.xlu0 %v4148_v21  ;;  %v8262_v21 = vld [vmem:[%s11706_s2 + $0x1] ss:$0 sm:$0xff]  ;;  %s10160_s2 = scalar_lea.vmem %s8074_s19, 512 }
0x1d19   :  { %p10161_p10 = scmp.ne.s32.totalorder %s8074_s19, %s10160_s2  ;;  %p10166_p12 = scmp.lt.s32.totalorder %s10160_s2, %s10160_s2 }
0x1d1b   :  { %p10167_p13 = por %p10166_p12, %p10165_p11 }
0x1d1d   :  { %p10168_p0 = pnand %p10167_p13, %p10161_p10 }
0x1da4   :  { %v4153_v54 = vpop.xlane.xlu1 %4152 }
0x1da5   :  { %v4155_v22 = vmul.f32 0.03125, %v4153_v54  ;;  %v4150_v42 = vpop.xlane.xlu0 %4149 }
0x1da6   :  { %v4154_v23 = vmul.f32 0.03125, %v4150_v42  ;;  %v8259_v42 = vld [vmem:[%s11707_s6 + $0x1] ss:$0 sm:$0xff] }
0x1da7   :  { %v4157_v55 = vsub.f32 %v11087_v17, %v4155_v22 }
0x1da8   :  { %v4156_v24 = vsub.f32 %v11090_v19, %v4154_v23 }
0x1da9   :  { %v4159_v26 = vmul.f32 %v4157_v55, %v4157_v55 }
0x1daa   :  { %v4158_v27 = vmul.f32 %v4156_v24, %v4156_v24 }
0x1dab   :  { %v4163_v51 = vsel %vm289_vm0, %v4159_v26, 0.0 }
0x1dac   :  { %4164 = vadd.xlane.f32.xlu1 %v4163_v51  ;;  %v4160_v28 = vsel %vm289_vm0, %v4158_v27, 0.0 }
0x1dad   :  { %4161 = vadd.xlane.f32.xlu0 %v4160_v28  ;;  %v11161_v28 = vld [vmem:[#allocation7] sm:$0xff] }
0x1e39   :  { %v4165_v52 = vpop.xlane.xlu1 %4164 }
0x1e3a   :  { %v4167_v7 = vmul.f32 0.03125, %v4165_v52  ;;  %v4162_v57 = vpop.xlane.xlu0 %4161 }
0x1e3b   :  { %v4166_v58 = vmul.f32 0.03125, %v4162_v57 }
0x1e3c   :  { %v4169_v2 = vadd.f32 1e-06, %v4167_v7 }
0x1e3d   :  { %v4168_v8 = vadd.f32 1e-06, %v4166_v58 }
0x1e3e   :  { %9848 = vrsqrt.f32 %v4169_v2 }
0x1e3f   :  { %9850 = vrsqrt.f32 %v4168_v8 }
0x1e48   :  { %v9849_v3 = vpop.eup %9848 }
0x1e49   :  { %v9851_v43 = vpop.eup %9850  ;;  %v4173_v6 = vmul.f32 %v9849_v3, %v4157_v55 }
0x1e4a   :  { %v4172_v63 = vmul.f32 %v9851_v43, %v4156_v24 }
0x1e4b   :  { %v4181_v5 = vmul.f32 %v8241_v4, %v4173_v6 }
0x1e4c   :  { %v4180_v9 = vmul.f32 %v8241_v4, %v4172_v63 }
0x1e4d   :  { %v4189_v10 = vadd.f32 %v8242_v60, %v4181_v5 }
0x1e4e   :  { %v4188_v11 = vadd.f32 %v8242_v60, %v4180_v9 }
0x1e4f   :  { %4192 = vst.msk [vmem:[#allocation22 + $0x18] sm:$0xff] %vm289_vm0, %v4189_v10 }
0x1e50   :  { %8993 = vmatprep.mubr.msk.f32.mxu1 %vm289_vm0, %v4188_v11  ;;  %4191 = vst.msk [vmem:[#allocation22 + $0x10] sm:$0xff] %vm289_vm0, %v4188_v11  ;;  %9015 = vmatprep.mubr.msk.f32.mxu0 %vm289_vm0, %v4188_v11 }
0x1e51   :  { %8994 = vmatmul.mubr.msk.f32.vlgmr.msra.gmra.mrb[46].mxu1 %vm289_vm0, %v4189_v10  ;;  %9016 = vmatmul.mubr.msk.f32.vlgmr.msra.gmra.mrb[42].mxu0 %vm289_vm0, %v4189_v10 }
0x1e52   :  { %9456 = vmatpush3.bf16.msra.mxu1 %v9453_v0  ;;  %9004 = vmatprep.mubr.msk.f32.mxu1 %vm289_vm0, %v4188_v11 }
0x1e53   :  { %9458 = vmatprep.subr.bf16.mxu1 %v9457_v12  ;;  %9030 = vmatprep.mubr.msk.f32.mxu0 %vm10289_vm1, %v10288_v48 }
0x1e56   :  { %9460 = vmatpush3.bf16.msra.mxu1 %v9457_v12 }
0x1e57   :  { %9018 = vmatprep.subr.mxu1 %v10288_v48 }
0x1e59   :  { %9005 = vmatmul.mubr.msk.f32.vlgmr.msra.gmra.mrb[48].mxu1 %vm289_vm0, %v4189_v10 }
0x1e5a   :  { %9020 = vmatprep.mubr.msk.f32.mxu1 %vm10289_vm1, %v10288_v48 }
0x1f24   :  { %v8995_v50 = vpop.f32.mrb[46].mxu1  ;;  %v9017_v13 = vpop.f32.mrb[42].mxu0 }
0x1f25   :  { %v4299_v14 = vpop.f32.mrb[47].mxu1  ;;  %v4461_v15 = vpop.f32.mrb[43].mxu0  ;;  %v11150_v26 = vadd.f32 %v8995_v50, %v8259_v42  ;;  %v11153_v27 = vadd.f32 %v9017_v13, %v8265_v41 }
0x1f26   :  { %v11129_v20 = vadd.f32 %v8265_v41, %v4461_v15  ;;  %v11139_v55 = vadd.f32 %v8259_v42, %v4299_v14 }
0x1f28   :  { %9029 = vmatpush3.msra.mxu0 %v11129_v20 }
0x1f29   :  { %9038 = vmatprep.subr.mxu0 %v10288_v48 }
0x1f2c   :  { %v9006_v54 = vpop.f32.mrb[48].mxu1 }
0x1f2d   :  { %v4380_v22 = vpop.f32.mrb[49].mxu1  ;;  %v11142_v24 = vadd.f32 %v9006_v54, %v8262_v21 }
0x1f2e   :  { %v11135_v23 = vadd.f32 %v8262_v21, %v4380_v22 }
0x1f30   :  { %9019 = vmatpush3.xpose.msk.msra.mxu1 %vm604_vm2, %v11135_v23 }
0x1f31   :  { %9023 = vmatprep.subr.mxu1 %v10288_v48 }
0x1f33   :  { %9021 = vmatmul.mubr.msk.f32.vlgmr.msra.gmra.mrb[50].mxu1 %vm604_vm2, %v11139_v55 }
0x1f34   :  { %9024 = vmatpush3.xpose.msk.msra.mxu1 %vm604_vm2, %v11142_v24  ;;  %9025 = vmatprep.mubr.msk.f32.mxu1 %vm10289_vm1, %v10288_v48 }
0x1f35   :  { %9033 = vmatprep.subr.mxu1 %v10288_v48 }
0x1f37   :  { %9026 = vmatmul.mubr.msk.f32.vlgmr.msra.gmra.mrb[52].mxu1 %vm604_vm2, %v11150_v26 }
0x1f38   :  { %9034 = vmatpush3.msra.mxu1 %v11153_v27  ;;  %9035 = vmatprep.mubr.msk.f32.mxu1 %vm10289_vm1, %v10288_v48 }
0x1f39   :  { %9043 = vmatprep.subr.mxu1 %v10288_v48 }
0x2006   :  { %v4542_v51 = vpop.f32.mrb[50].mxu1 }
0x2007   :  { %v4543_v53 = vadd.f32 %v11161_v28, %v4542_v51  ;;  %v9022_v30 = vpop.f32.mrb[51].mxu1 }
0x2009   :  { %v4622_v31 = vsel %vm604_vm2, %v4543_v53, -inf }
0x200a   :  { %4623 = vmax.xlane.f32.xlu0 %v4622_v31  ;;  %v4618_v33 = vpop.f32.mrb[52].mxu1 }
0x200b   :  { %v4619_v62 = vadd.f32 %v11165_v61, %v4618_v33  ;;  %v9027_v36 = vpop.f32.mrb[53].mxu1 }
0x200d   :  { %v4625_v39 = vsel %vm604_vm2, %v4619_v62, -inf }
0x200e   :  { %4626 = vmax.xlane.f32.xlu1 %v4625_v39 }
0x201f   :  { %4870 = vrot.lane.b32.xlu1 %v11142_v24, %s10290_s9 }
0x2023   :  { %4790 = vrot.lane.b32.xlu1 %v11139_v55, %s10290_s9 }
0x2097   :  { %v4624_v44 = vpop.xlane.xlu0 %4623 }
0x2098   :  { %v4628_v45 = vsub.f32 %v4543_v53, %v4624_v44 }
0x209a   :  { %v4630_v47 = vmul.f32 1.442695, %v4628_v45 }
0x209b   :  { %v4627_v49 = vpop.xlane.xlu1 %4626 }
0x209c   :  { %9852 = vpow2.f32 %v4630_v47  ;;  %v4629_v1 = vsub.f32 %v4619_v62, %v4627_v49 }
0x209e   :  { %v4632_v34 = vmul.f32 1.442695, %v4629_v1 }
0x209f   :  { %v4871_v58 = vpop.permute.xlu1 %4870 }
0x20a0   :  { %9854 = vpow2.f32 %v4632_v34 }
0x20a3   :  { %v4791_v2 = vpop.permute.xlu1 %4790 }
0x20a6   :  { %v9853_v0 = vpop.eup %9852 }
0x20a7   :  { %v4634_v52 = vsel %vm604_vm2, %v9853_v0, 0.0 }
0x20a8   :  { %4635 = vadd.xlane.f32.xlu0 %v4634_v52 }
0x20aa   :  { %v9855_v7 = vpop.eup %9854 }
0x20ab   :  { %v4637_v57 = vsel %vm604_vm2, %v9855_v7, 0.0 }
0x20ac   :  { %4638 = vadd.xlane.f32.xlu1 %v4637_v57 }
0x20bd   :  { %4868 = vrot.lane.b32.xlu1 %v11150_v26, %s10290_s9 }
0x20be   :  { %4792 = vrot.lane.b32.xlu0 %v11135_v23, %s10290_s9 }
0x2135   :  { %v4636_v8 = vpop.xlane.xlu0 %4635 }
0x2136   :  { %9856 = vrcp.f32 %v4636_v8 }
0x2139   :  { %v4639_v3 = vpop.xlane.xlu1 %4638  ;;  %v4793_v6 = vpop.permute.xlu0 %4792 }
0x213a   :  { %9858 = vrcp.f32 %v4639_v3 }
0x213d   :  { %v4869_v5 = vpop.permute.xlu1 %4868 }
0x2140   :  { %v9857_v4 = vpop.eup %9856 }
0x2141   :  { %v4641_v43 = vmul.f32 %v9857_v4, %v9853_v0 }
0x2143   :  { %9031 = vmatmul.mubr.msk.f32.vlgmr.msra.gmra.mrb[44].mxu0 %vm604_vm2, %v4641_v43 }
0x2144   :  { %v9859_v60 = vpop.eup %9858  ;;  %9039 = vmatpush3.xpose.msk.msra.mxu0 %vm604_vm2, %v4793_v6  ;;  %9040 = vmatprep.mubr.msk.f32.mxu0 %vm10289_vm1, %v10288_v48 }
0x2145   :  { %v4643_v63 = vmul.f32 %v9859_v60, %v9855_v7  ;;  %9048 = vmatprep.subr.mxu0 %v10288_v48 }
0x2147   :  { %9036 = vmatmul.mubr.msk.f32.vlgmr.msra.gmra.mrb[54].mxu1 %vm604_vm2, %v4643_v63  ;;  %9041 = vmatmul.mubr.msk.f32.vlgmr.msra.gmra.mrb[46].mxu0 %vm604_vm2, %v4791_v2 }
0x2148   :  { %9044 = vmatpush3.xpose.msk.msra.mxu1 %vm604_vm2, %v4871_v58  ;;  %9045 = vmatprep.mubr.msk.f32.mxu1 %vm10289_vm1, %v10288_v48 }
0x2149   :  { %9053 = vmatprep.subr.mxu1 %v10288_v48  ;;  %9050 = vmatprep.mubr.msk.f32.mxu0 %vm10289_vm1, %v10288_v48 }
0x214b   :  { %9046 = vmatmul.mubr.msk.f32.vlgmr.msra.gmra.mrb[56].mxu1 %vm604_vm2, %v4869_v5 }
0x214c   :  { %9055 = vmatprep.mubr.msk.f32.mxu1 %vm10289_vm1, %v10288_v48 }
0x2216   :  { %v11195_v9 = vpop.f32.mrb[44].mxu0 }
0x2217   :  { %v9032_v40 = vpop.f32.mrb[45].mxu0 }
0x221a   :  { %v11197_v38 = vpop.f32.mrb[54].mxu1  ;;  %v4864_v10 = vpop.f32.mrb[46].mxu0 }
0x221b   :  { %v4865_v11 = vadd.f32 %v11161_v28, %v4864_v10  ;;  %v9037_v12 = vpop.f32.mrb[55].mxu1  ;;  %v9042_v41 = vpop.f32.mrb[47].mxu0 }
0x221d   :  { %v4946_v50 = vsel %vm604_vm2, %v4865_v11, -inf }
0x221e   :  { %4947 = vmax.xlane.f32.xlu0 %v4946_v50  ;;  %v4942_v13 = vpop.f32.mrb[56].mxu1 }
0x221f   :  { %v4943_v14 = vadd.f32 %v11165_v61, %v4942_v13  ;;  %v9047_v15 = vpop.f32.mrb[57].mxu1 }
0x2221   :  { %v4949_v21 = vsel %vm604_vm2, %v4943_v14, -inf }
0x2222   :  { %4950 = vmax.xlane.f32.xlu1 %v4949_v21 }
0x2233   :  { %5046 = vrot.lane.b32.xlu1 %v11153_v27, %s10290_s9 }
0x2234   :  { %4969 = vrot.lane.b32.xlu0 %v11129_v20, %s10290_s9 }
0x2237   :  { %5124 = vrot.lane.b32.xlu1 %v11135_v23, %s10291_s5 }
0x223b   :  { %5202 = vrot.lane.b32.xlu1 %v11142_v24, %s10291_s5 }
0x223f   :  { %5200 = vrot.lane.b32.xlu1 %v11150_v26, %s10291_s5 }
0x22ab   :  { %v4948_v54 = vpop.xlane.xlu0 %4947 }
0x22ac   :  { %v4952_v22 = vsub.f32 %v4865_v11, %v4948_v54 }
0x22ae   :  { %v4954_v42 = vmul.f32 1.442695, %v4952_v22 }
0x22af   :  { %v4970_v51 = vpop.permute.xlu0 %4969  ;;  %v4951_v53 = vpop.xlane.xlu1 %4950 }
0x22b0   :  { %9860 = vpow2.f32 %v4954_v42  ;;  %v4953_v30 = vsub.f32 %v4943_v14, %v4951_v53  ;;  %9049 = vmatpush3.msra.mxu0 %v4970_v51 }
0x22b1   :  { %9058 = vmatprep.subr.mxu0 %v10288_v48 }
0x22b2   :  { %v4956_v31 = vmul.f32 1.442695, %v4953_v30 }
0x22b3   :  { %v5047_v33 = vpop.permute.xlu1 %5046 }
0x22b4   :  { %9862 = vpow2.f32 %v4956_v31  ;;  %9054 = vmatpush3.msra.mxu1 %v5047_v33 }
0x22b5   :  { %9063 = vmatprep.subr.mxu1 %v10288_v48 }
0x22b7   :  { %v5125_v49 = vpop.permute.xlu1 %5124 }
0x22ba   :  { %v9861_v62 = vpop.eup %9860 }
0x22bb   :  { %v4958_v36 = vsel %vm604_vm2, %v9861_v62, 0.0  ;;  %v5203_v52 = vpop.permute.xlu1 %5202 }
0x22bc   :  { %4959 = vadd.xlane.f32.xlu0 %v4958_v36 }
0x22be   :  { %v9863_v39 = vpop.eup %9862 }
0x22bf   :  { %v4961_v44 = vsel %vm604_vm2, %v9863_v39, 0.0  ;;  %v5201_v58 = vpop.permute.xlu1 %5200 }
0x22c0   :  { %4962 = vadd.xlane.f32.xlu0 %v4961_v44 }
0x22d6   :  { %5122 = vrot.lane.b32.xlu0 %v11139_v55, %s10291_s5 }
0x2349   :  { %v4960_v45 = vpop.xlane.xlu0 %4959 }
0x234a   :  { %9864 = vrcp.f32 %v4960_v45 }
0x234d   :  { %v4963_v47 = vpop.xlane.xlu0 %4962 }
0x234e   :  { %9866 = vrcp.f32 %v4963_v47 }
0x2351   :  { %v5123_v57 = vpop.permute.xlu0 %5122 }
0x2354   :  { %v9865_v1 = vpop.eup %9864 }
0x2355   :  { %v4965_v34 = vmul.f32 %v9865_v1, %v9861_v62 }
0x2357   :  { %9051 = vmatmul.mubr.msk.f32.vlgmr.msra.gmra.mrb[48].mxu0 %vm604_vm2, %v4965_v34 }
0x2358   :  { %v9867_v0 = vpop.eup %9866  ;;  %9059 = vmatpush3.xpose.msk.msra.mxu0 %vm604_vm2, %v5125_v49  ;;  %9060 = vmatprep.mubr.msk.f32.mxu0 %vm10289_vm1, %v10288_v48 }
0x2359   :  { %v4967_v7 = vmul.f32 %v9867_v0, %v9863_v39  ;;  %9068 = vmatprep.subr.mxu0 %v10288_v48 }
0x235b   :  { %9056 = vmatmul.mubr.msk.f32.vlgmr.msra.gmra.mrb[58].mxu1 %vm604_vm2, %v4967_v7  ;;  %9061 = vmatmul.mubr.msk.f32.vlgmr.msra.gmra.mrb[50].mxu0 %vm604_vm2, %v5123_v57 }
0x235c   :  { %9064 = vmatpush3.xpose.msk.msra.mxu1 %vm604_vm2, %v5203_v52  ;;  %9065 = vmatprep.mubr.msk.f32.mxu1 %vm10289_vm1, %v10288_v48 }
0x235d   :  { %9073 = vmatprep.subr.mxu1 %v10288_v48  ;;  %9070 = vmatprep.mubr.msk.f32.mxu0 %vm10289_vm1, %v10288_v48 }
0x235f   :  { %9066 = vmatmul.mubr.msk.f32.vlgmr.msra.gmra.mrb[60].mxu1 %vm604_vm2, %v5201_v58 }
0x2360   :  { %9075 = vmatprep.mubr.msk.f32.mxu1 %vm10289_vm1, %v10288_v48 }
0x242a   :  { %v11235_v2 = vpop.f32.mrb[48].mxu0 }
0x242b   :  { %v9052_v8 = vpop.f32.mrb[49].mxu0 }
0x242e   :  { %v11237_v3 = vpop.f32.mrb[58].mxu1  ;;  %v5196_v4 = vpop.f32.mrb[50].mxu0 }
0x242f   :  { %v5197_v43 = vadd.f32 %v11161_v28, %v5196_v4  ;;  %v9057_v6 = vpop.f32.mrb[59].mxu1  ;;  %v9062_v60 = vpop.f32.mrb[51].mxu0 }
0x2431   :  { %v5278_v63 = vsel %vm604_vm2, %v5197_v43, -inf }
0x2432   :  { %5279 = vmax.xlane.f32.xlu0 %v5278_v63  ;;  %v5274_v5 = vpop.f32.mrb[60].mxu1 }
0x2433   :  { %v5275_v40 = vadd.f32 %v11165_v61, %v5274_v5  ;;  %v9067_v10 = vpop.f32.mrb[61].mxu1 }
0x2435   :  { %v5281_v11 = vsel %vm604_vm2, %v5275_v40, -inf }
0x2436   :  { %5282 = vmax.xlane.f32.xlu1 %v5281_v11 }
0x2447   :  { %5376 = vrot.lane.b32.xlu1 %v11153_v27, %s10291_s5 }
0x2448   :  { %5300 = vrot.lane.b32.xlu0 %v11129_v20, %s10291_s5 }
0x244b   :  { %5454 = vrot.lane.b32.xlu1 %v11135_v23, %s10292_s7 }
0x244f   :  { %5532 = vrot.lane.b32.xlu1 %v11142_v24, %s10292_s7 }
0x2453   :  { %5530 = vrot.lane.b32.xlu1 %v11150_v26, %s10292_s7 }
0x24bf   :  { %v5280_v12 = vpop.xlane.xlu0 %5279 }
0x24c0   :  { %v5284_v41 = vsub.f32 %v5197_v43, %v5280_v12 }
0x24c2   :  { %v5286_v50 = vmul.f32 1.442695, %v5284_v41 }
0x24c3   :  { %v5301_v13 = vpop.permute.xlu0 %5300  ;;  %v5283_v14 = vpop.xlane.xlu1 %5282 }
0x24c4   :  { %9868 = vpow2.f32 %v5286_v50  ;;  %v5285_v15 = vsub.f32 %v5275_v40, %v5283_v14  ;;  %9069 = vmatpush3.msra.mxu0 %v5301_v13  ;;  %v4215_v14 = vld [vmem:[#allocation10 + $0x20] sm:$0xff] }
0x24c5   :  { %9078 = vmatprep.subr.mxu0 %v10288_v48 }
0x24c6   :  { %v5288_v21 = vmul.f32 1.442695, %v5285_v15  ;;  %v4216_v15 = vld [vmem:[#allocation10 + $0x28] sm:$0xff] }
0x24c7   :  { %v5377_v54 = vpop.permute.xlu1 %5376 }
0x24c8   :  { %9870 = vpow2.f32 %v5288_v21  ;;  %9074 = vmatpush3.msra.mxu1 %v5377_v54  ;;  %v9469_v21 = vpack.c.bf16 %v4216_v15, %v4215_v14  ;;  %v4218_v54 = vld [vmem:[#allocation10 + $0x38] sm:$0xff]  ;;  %v5950_v15 = vld [vmem:[#allocation11 + $0x30] sm:$0xff] }
0x24c9   :  { %9083 = vmatprep.subr.mxu1 %v10288_v48 }
0x24cb   :  { %v5455_v53 = vpop.permute.xlu1 %5454 }
0x24ce   :  { %v9869_v23 = vpop.eup %9868 }
0x24cf   :  { %v5290_v24 = vsel %vm604_vm2, %v9869_v23, 0.0  ;;  %v5533_v62 = vpop.permute.xlu1 %5532 }
0x24d0   :  { %5291 = vadd.xlane.f32.xlu0 %v5290_v24 }
0x24d2   :  { %v9871_v26 = vpop.eup %9870 }
0x24d3   :  { %v5293_v22 = vsel %vm604_vm2, %v9871_v26, 0.0  ;;  %v5531_v39 = vpop.permute.xlu1 %5530 }
0x24d4   :  { %5294 = vadd.xlane.f32.xlu0 %v5293_v22 }
0x24ea   :  { %5452 = vrot.lane.b32.xlu0 %v11139_v55, %s10292_s7 }
0x255d   :  { %v5292_v42 = vpop.xlane.xlu0 %5291 }
0x255e   :  { %9872 = vrcp.f32 %v5292_v42 }
0x2561   :  { %v5295_v51 = vpop.xlane.xlu0 %5294 }
0x2562   :  { %9874 = vrcp.f32 %v5295_v51 }
0x2565   :  { %v5453_v55 = vpop.permute.xlu0 %5452 }
0x2568   :  { %v9873_v30 = vpop.eup %9872 }
0x2569   :  { %v5297_v31 = vmul.f32 %v9873_v30, %v9869_v23 }
0x256b   :  { %9071 = vmatmul.mubr.msk.f32.vlgmr.msra.gmra.mrb[52].mxu0 %vm604_vm2, %v5297_v31 }
0x256c   :  { %v9875_v33 = vpop.eup %9874  ;;  %9079 = vmatpush3.xpose.msk.msra.mxu0 %vm604_vm2, %v5455_v53  ;;  %9080 = vmatprep.mubr.msk.f32.mxu0 %vm10289_vm1, %v10288_v48 }
0x256d   :  { %v5299_v36 = vmul.f32 %v9875_v33, %v9871_v26  ;;  %9088 = vmatprep.subr.mxu0 %v10288_v48 }
0x256f   :  { %9076 = vmatmul.mubr.msk.f32.vlgmr.msra.gmra.mrb[62].mxu1 %vm604_vm2, %v5299_v36  ;;  %9081 = vmatmul.mubr.msk.f32.vlgmr.msra.gmra.mrb[54].mxu0 %vm604_vm2, %v5453_v55 }
0x2570   :  { %9084 = vmatpush3.xpose.msk.msra.mxu1 %vm604_vm2, %v5533_v62  ;;  %9085 = vmatprep.mubr.msk.f32.mxu1 %vm10289_vm1, %v10288_v48 }
0x2571   :  { %9093 = vmatprep.subr.mxu1 %v10288_v48  ;;  %9090 = vmatprep.mubr.msk.f32.mxu0 %vm10289_vm1, %v10288_v48 }
0x2573   :  { %9086 = vmatmul.mubr.msk.f32.vlgmr.msra.gmra.mrb[64].mxu1 %vm604_vm2, %v5531_v39 }
0x2574   :  { %9095 = vmatprep.mubr.msk.f32.mxu1 %vm10289_vm1, %v10288_v48 }
0x263e   :  { %v5372_v44 = vpop.f32.mrb[52].mxu0 }
0x263f   :  { %v9072_v45 = vpop.f32.mrb[53].mxu0 }
0x2642   :  { %v5448_v47 = vpop.f32.mrb[62].mxu1  ;;  %v5526_v49 = vpop.f32.mrb[54].mxu0 }
0x2643   :  { %v5527_v1 = vadd.f32 %v11161_v28, %v5526_v49  ;;  %v9077_v34 = vpop.f32.mrb[63].mxu1  ;;  %v9082_v0 = vpop.f32.mrb[55].mxu0  ;;  %v11305_v49 = vld [vmem:[#allocation5] sm:$0xff] }
0x2645   :  { %v5608_v52 = vsel %vm604_vm2, %v5527_v1, -inf }
0x2646   :  { %5609 = vmax.xlane.f32.xlu0 %v5608_v52  ;;  %v5604_v7 = vpop.f32.mrb[64].mxu1 }
0x2647   :  { %v5605_v57 = vadd.f32 %v11165_v61, %v5604_v7  ;;  %v9087_v58 = vpop.f32.mrb[65].mxu1 }
0x2649   :  { %v5611_v8 = vsel %vm604_vm2, %v5605_v57, -inf }
0x264a   :  { %5612 = vmax.xlane.f32.xlu1 %v5611_v8 }
0x265b   :  { %5706 = vrot.lane.b32.xlu1 %v11153_v27, %s10292_s7 }
0x265f   :  { %5784 = vrot.lane.b32.xlu1 %v11235_v2, %s10279_s28 }
0x2663   :  { %5786 = vrot.lane.b32.xlu1 %v11237_v3, %s10279_s28 }
0x2667   :  { %5794 = vrot.lane.b32.xlu1 %v5448_v47, %s10293_s10 }
0x26d3   :  { %v5610_v28 = vpop.xlane.xlu0 %5609 }
0x26d4   :  { %v5614_v4 = vsub.f32 %v5527_v1, %v5610_v28 }
0x26d6   :  { %v5616_v43 = vmul.f32 1.442695, %v5614_v4 }
0x26d7   :  { %v5613_v6 = vpop.xlane.xlu1 %5612 }
0x26d8   :  { %9876 = vpow2.f32 %v5616_v43  ;;  %v5615_v61 = vsub.f32 %v5605_v57, %v5613_v6 }
0x26da   :  { %v5618_v60 = vmul.f32 1.442695, %v5615_v61 }
0x26db   :  { %v5707_v63 = vpop.permute.xlu1 %5706 }
0x26dc   :  { %9878 = vpow2.f32 %v5618_v60  ;;  %9094 = vmatpush3.msra.mxu1 %v5707_v63 }
0x26df   :  { %v5785_v51 = vpop.permute.xlu1 %5784 }
0x26e0   :  { %v5806_v31 = vsel %vm604_vm2, %v11195_v9, %v5785_v51  ;;  %v8292_v9 = vld [vmem:[%s11708_s15 + $0x1] ss:$0 sm:$0xff] }
0x26e2   :  { %v9877_v5 = vpop.eup %9876 }
0x26e3   :  { %v5620_v27 = vsel %vm604_vm2, %v9877_v5, 0.0  ;;  %v5787_v53 = vpop.permute.xlu1 %5786 }
0x26e4   :  { %5621 = vadd.xlane.f32.xlu0 %v5620_v27  ;;  %v5807_v39 = vsel %vm604_vm2, %v11197_v38, %v5787_v53  ;;  %v5956_v27 = vld [vmem:[#allocation13 + $0x28] sm:$0xff] }
0x26e6   :  { %v9879_v2 = vpop.eup %9878 }
0x26e7   :  { %v5623_v40 = vsel %vm604_vm2, %v9879_v2, 0.0  ;;  %v5795_v33 = vpop.permute.xlu1 %5794 }
0x26e8   :  { %5624 = vadd.xlane.f32.xlu0 %v5623_v40  ;;  %v5957_v40 = vld [vmem:[#allocation13 + $0x30] sm:$0xff] }
0x26fe   :  { %5630 = vrot.lane.b32.xlu0 %v11129_v20, %s10292_s7  ;;  %v4217_v20 = vld [vmem:[#allocation10 + $0x30] sm:$0xff] }
0x26ff   :  { %v9473_v23 = vpack.c.bf16 %v4218_v54, %v4217_v20  ;;  %v5962_v54 = vld [vmem:[#allocation14 + $0x20] sm:$0xff] }
0x2702   :  { %5792 = vrot.lane.b32.xlu0 %v5372_v44, %s10293_s10  ;;  %v5809_v44 = vsel %vm1943_vm4, %v5807_v39, %v5795_v33  ;;  %v8297_v33 = vld [vmem:[%s11709_s16 + $0x1] ss:$0 sm:$0xff] }
0x2771   :  { %v5622_v3 = vpop.xlane.xlu0 %5621 }
0x2772   :  { %9880 = vrcp.f32 %v5622_v3  ;;  %v5958_v3 = vld [vmem:[#allocation13 + $0x38] sm:$0xff] }
0x2775   :  { %v5625_v10 = vpop.xlane.xlu0 %5624 }
0x2776   :  { %9882 = vrcp.f32 %v5625_v10  ;;  %v9489_v10 = vpack.c.bf16 %v5958_v3, %v5957_v40  ;;  %v8311_v3 = vld [vmem:[%s11715_s18 + $0x1] ss:$0 sm:$0xff] }
0x2779   :  { %v5631_v11 = vpop.permute.xlu0 %5630 }
0x277a   :  { %9089 = vmatpush3.msra.mxu0 %v5631_v11  ;;  %v9935_v11 = vld [vmem:[#allocation5 + $0x8] sm:$0xff] }
0x277b   :  { %9470 = vmatprep.subr.bf16.mxu0 %v9469_v21 }
0x277c   :  { %v9881_v12 = vpop.eup %9880 }
0x277d   :  { %v5627_v41 = vmul.f32 %v9881_v12, %v9877_v5  ;;  %v5793_v30 = vpop.permute.xlu0 %5792  ;;  %v5955_v5 = vld [vmem:[#allocation13 + $0x20] sm:$0xff]  ;;  %v9936_v12 = vld [vmem:[#allocation5 + $0x10] sm:$0xff] }
0x277e   :  { %v5808_v62 = vsel %vm1943_vm4, %v5806_v31, %v5793_v30 }
0x277f   :  { %9091 = vmatmul.mubr.msk.f32.vlgmr.msra.gmra.mrb[56].mxu0 %vm604_vm2, %v5627_v41  ;;  %v9937_v41 = vld [vmem:[#allocation5 + $0x18] sm:$0xff] }
0x2780   :  { %v9883_v50 = vpop.eup %9882  ;;  %9472 = vmatpush3.bf16.msra.mxu0 %v9469_v21  ;;  %v5951_v21 = vld [vmem:[#allocation11 + $0x38] sm:$0xff] }
0x2781   :  { %v5629_v13 = vmul.f32 %v9883_v50, %v9879_v2  ;;  %9474 = vmatprep.subr.bf16.mxu0 %v9473_v23  ;;  %v9485_v2 = vpack.c.bf16 %v5956_v27, %v5955_v5  ;;  %v5948_v50 = vld [vmem:[#allocation11 + $0x20] sm:$0xff]  ;;  %v9481_v20 = vpack.c.bf16 %v5951_v21, %v5950_v15 }
0x2783   :  { %9096 = vmatmul.mubr.msk.f32.vlgmr.msra.gmra.mrb[66].mxu1 %vm604_vm2, %v5629_v13  ;;  %v5949_v13 = vld [vmem:[#allocation11 + $0x28] sm:$0xff] }
0x2784   :  { %9476 = vmatpush3.bf16.msra.mxu0 %v9473_v23  ;;  %v9477_v14 = vpack.c.bf16 %v5949_v13, %v5948_v50  ;;  %v5963_v23 = vld [vmem:[#allocation14 + $0x28] sm:$0xff] }
0x2785   :  { %9486 = vmatprep.subr.bf16.mxu0 %v9485_v2 }
0x2786   :  { %9478 = vmatprep.subr.bf16.mxu1 %v9477_v14 }
0x2787   :  { %9480 = vmatpush3.bf16.msra.mxu1 %v9477_v14 }
0x2788   :  { %9482 = vmatprep.subr.bf16.mxu1 %v9481_v20 }
0x278b   :  { %9484 = vmatpush3.bf16.msra.mxu1 %v9481_v20 }
0x2852   :  { %v5702_v24 = vpop.f32.mrb[56].mxu0 }
0x2853   :  { %5800 = vrot.lane.b32.xlu0 %v5702_v24, %s10294_s11  ;;  %v9092_v26 = vpop.f32.mrb[57].mxu0  ;;  %v9493_v24 = vpack.c.bf16 %v5963_v23, %v5962_v54 }
0x2855   :  { %9494 = vmatprep.subr.bf16.mxu1 %v9493_v24 }
0x2856   :  { %v5778_v22 = vpop.f32.mrb[66].mxu1 }
0x2857   :  { %5802 = vrot.lane.b32.xlu1 %v5778_v22, %s10294_s11  ;;  %v9097_v42 = vpop.f32.mrb[67].mxu1 }
0x28c5   :  { %v5801_v36 = vpop.permute.xlu0 %5800 }
0x28c6   :  { %v5810_v55 = vsel %vm1946_vm3, %v5808_v62, %v5801_v36  ;;  %v8298_v36 = vld [vmem:[%s11710_s13 + $0x1] ss:$0 sm:$0xff] }
0x28c7   :  { %9106 = vmatprep.mubr.msk.f32.mxu0 %vm289_vm0, %v5810_v55 }
0x28c9   :  { %v5803_v45 = vpop.permute.xlu1 %5802 }
0x28ca   :  { %v5811_v47 = vsel %vm1946_vm3, %v5809_v44, %v5803_v45 }
0x28cb   :  { %9107 = vmatmul.mubr.msk.f32.vlgmr.msra.gmra.mrb[58].mxu0 %vm289_vm0, %v5811_v47  ;;  %v5964_v47 = vld [vmem:[#allocation14 + $0x30] sm:$0xff] }
0x28cc   :  { %9128 = vmatprep.mubr.msk.f32.mxu0 %vm289_vm0, %v11305_v49  ;;  %9488 = vmatpush3.bf16.msra.mxu0 %v9485_v2 }
0x28cd   :  { %9490 = vmatprep.subr.bf16.mxu0 %v9489_v10 }
0x28d0   :  { %9492 = vmatpush3.bf16.msra.mxu0 %v9489_v10 }
0x28d1   :  { %9501 = vmatprep.subr.bf16.mxu0 %v10295_v16 }
0x28d3   :  { %9129 = vmatmul.mubr.msk.f32.vlgmr.msra.gmra.mrb[60].mxu0 %vm289_vm0, %v9935_v11 }
0x28d4   :  { %9131 = vmatprep.mubr.msk.f32.mxu0 %vm289_vm0, %v9936_v12 }
0x28d7   :  { %9132 = vmatmul.mubr.msk.f32.gmra.mrb[62].mxu0 %vm289_vm0, %v9937_v41 }
0x28d8   :  { %9152 = vmatprep.mubr.msk.f32.mxu0 %vm10289_vm1, %v10288_v48 }
0x299e   :  { %v9108_v1 = vpop.f32.mrb[58].mxu0 }
0x299f   :  { %v5896_v34 = vadd.f32 %v9108_v1, %v8292_v9  ;;  %v5890_v0 = vpop.f32.mrb[59].mxu0 }
0x29a0   :  { %v5891_v52 = vadd.f32 %v8292_v9, %v5890_v0  ;;  %v5965_v9 = vld [vmem:[#allocation14 + $0x38] sm:$0xff] }
0x29a1   :  { %v11311_v7 = vadd.f32 %v5896_v34, %v11087_v17  ;;  %v9497_v0 = vpack.c.bf16 %v5965_v9, %v5964_v47 }
0x29a2   :  { %v11314_v38 = vadd.f32 %v5891_v52, %v11090_v19  ;;  %v8306_v52 = vld [vmem:[%s11711_s17 + $0x1] ss:$0 sm:$0xff] }
0x29a3   :  { %v5908_v57 = vsel %vm289_vm0, %v11311_v7, 0.0 }
0x29a4   :  { %5909 = vadd.xlane.f32.xlu1 %v5908_v57  ;;  %v5905_v58 = vsel %vm289_vm0, %v11314_v38, 0.0 }
0x29a5   :  { %5906 = vadd.xlane.f32.xlu0 %v5905_v58 }
0x29a6   :  { %v9130_v57 = vpop.f32.mrb[60].mxu0 }
0x29a7   :  { %v6140_v58 = vadd.f32 %v9130_v57, %v8306_v52 }
0x2a31   :  { %v5910_v8 = vpop.xlane.xlu1 %5909 }
0x2a32   :  { %v5912_v28 = vmul.f32 0.03125, %v5910_v8  ;;  %v5907_v4 = vpop.xlane.xlu0 %5906  ;;  %v6134_v8 = vpop.f32.mrb[61].mxu0 }
0x2a33   :  { %v5911_v43 = vmul.f32 0.03125, %v5907_v4  ;;  %v9133_v4 = vpop.f32.mrb[62].mxu0 }
0x2a34   :  { %v5914_v6 = vsub.f32 %v11311_v7, %v5912_v28  ;;  %v6135_v28 = vadd.f32 %v8306_v52, %v6134_v8 }
0x2a35   :  { %v5913_v17 = vsub.f32 %v11314_v38, %v5911_v43 }
0x2a36   :  { %v5916_v60 = vmul.f32 %v5914_v6, %v5914_v6  ;;  %v11343_v43 = vpack.i.bf16 %v6140_v58, %v6135_v28 }
0x2a37   :  { %v5915_v61 = vmul.f32 %v5913_v17, %v5913_v17 }
0x2a38   :  { %v5920_v63 = vsel %vm289_vm0, %v5916_v60, 0.0 }
0x2a39   :  { %v5917_v19 = vsel %vm289_vm0, %v5915_v61, 0.0 }
0x2a3a   :  { %5918 = vadd.xlane.f32.xlu0 %v5917_v19 }
0x2a3e   :  { %5921 = vadd.xlane.f32.xlu0 %v5920_v63  ;;  %v8303_v63 = vld [vmem:[%s11712_s30 + $0x1] ss:$0 sm:$0xff] }
0x2ac7   :  { %v5919_v26 = vpop.xlane.xlu0 %5918 }
0x2ac8   :  { %v5923_v22 = vmul.f32 0.03125, %v5919_v26 }
0x2aca   :  { %v5925_v42 = vadd.f32 1e-06, %v5923_v22 }
0x2acb   :  { %v5922_v51 = vpop.xlane.xlu0 %5921 }
0x2acc   :  { %9884 = vrsqrt.f32 %v5925_v42  ;;  %v5924_v53 = vmul.f32 0.03125, %v5922_v51  ;;  %v11380_v51 = vld [vmem:[#allocation8] sm:$0xff] }
0x2ace   :  { %v5926_v30 = vadd.f32 1e-06, %v5924_v53 }
0x2ad0   :  { %9886 = vrsqrt.f32 %v5926_v30 }
0x2ad6   :  { %v9885_v31 = vpop.eup %9884 }
0x2ad7   :  { %v5929_v62 = vmul.f32 %v9885_v31, %v5913_v17  ;;  %v6144_v17 = vpop.f32.mrb[63].mxu0 }
0x2ad8   :  { %v6145_v61 = vadd.f32 %v8306_v52, %v6144_v17 }
0x2ad9   :  { %v5937_v55 = vmul.f32 %v8297_v33, %v5929_v62 }
0x2ada   :  { %v9887_v39 = vpop.eup %9886 }
0x2adb   :  { %v5930_v44 = vmul.f32 %v9887_v39, %v5914_v6  ;;  %v5945_v45 = vadd.f32 %v8298_v36, %v5937_v55  ;;  %v6150_v6 = vadd.f32 %v9133_v4, %v8306_v52 }
0x2add   :  { %v5938_v1 = vmul.f32 %v8297_v33, %v5930_v44  ;;  %9117 = vmatprep.mubr.msk.f32.mxu1 %vm289_vm0, %v5945_v45  ;;  %v9506_v19 = vpack.c.bf16 %v6150_v6, %v6145_v61  ;;  %v11348_v60 = vpack.i.bf16 %v6150_v6, %v6145_v61 }
0x2adf   :  { %v5946_v34 = vadd.f32 %v8298_v36, %v5938_v1 }
0x2ae1   :  { %9118 = vmatmul.mubr.msk.f32.vlgmr.msra.gmra.mrb[68].mxu1 %vm289_vm0, %v5946_v34 }
0x2ae2   :  { %9496 = vmatpush3.bf16.msra.mxu1 %v9493_v24  ;;  %9142 = vmatprep.mubr.msk.f32.mxu1 %vm289_vm0, %v11305_v49  ;;  %v9502_v49 = vpack.c.bf16 %v6140_v58, %v6135_v28  ;;  %v11377_v24 = vld [vmem:[#allocation8 + $0x8] sm:$0xff] }
0x2ae3   :  { %9498 = vmatprep.subr.bf16.mxu1 %v9497_v0 }
0x2ae4   :  { %9504 = vmatpush3.bf16.xpose.msk.msra.mxu0 %vm10839_vm5, %v9502_v49 }
0x2ae5   :  { %9509 = vmatprep.subr.bf16.mxu0 %v10295_v16 }
0x2ae6   :  { %9500 = vmatpush3.bf16.msra.mxu1 %v9497_v0 }
0x2ae7   :  { %9505 = vmatprep.subr.bf16.mxu1 %v10295_v16 }
0x2ae9   :  { %9143 = vmatmul.mubr.msk.f32.vlgmr.msra.gmra.mrb[70].mxu1 %vm289_vm0, %v9935_v11 }
0x2aea   :  { %9145 = vmatprep.mubr.msk.f32.mxu1 %vm289_vm0, %v9936_v12 }
0x2aed   :  { %9146 = vmatmul.mubr.msk.f32.gmra.mrb[72].mxu1 %vm289_vm0, %v9937_v41 }
0x2aee   :  { %9159 = vmatprep.mubr.msk.f32.mxu1 %vm10289_vm1, %v10288_v48 }
0x2aef   :  { %9508 = vmatpush3.bf16.xpose.msk.msra.mxu1 %vm10839_vm5, %v9506_v19 }
0x2af0   :  { %9512 = vmatprep.subr.bf16.mxu1 %v10295_v16 }
0x2bb4   :  { %v9119_v5 = vpop.f32.mrb[68].mxu1 }
0x2bb5   :  { %v11354_v27 = vadd.f32 %v9119_v5, %v8303_v63  ;;  %v6053_v2 = vpop.f32.mrb[69].mxu1 }
0x2bb6   :  { %v11356_v40 = vadd.f32 %v8303_v63, %v6053_v2 }
0x2bb7   :  { %9160 = vmatmul.mubr.msk.f32.vlgmr.msra.gmra.mrb[74].mxu1 %vm604_vm2, %v11354_v27 }
0x2bb8   :  { %9153 = vmatmul.mubr.msk.f32.vlgmr.msra.gmra.mrb[64].mxu0 %vm604_vm2, %v11356_v40  ;;  %9173 = vmatprep.mubr.msk.f32.mxu1 %vm10289_vm1, %v10288_v48 }
0x2bb9   :  { %9166 = vmatprep.mubr.msk.f32.mxu0 %vm10289_vm1, %v10288_v48 }
0x2bbc   :  { %v9144_v10 = vpop.f32.mrb[70].mxu1 }
0x2bbd   :  { %v11367_v11 = vadd.f32 %v9144_v10, %v8311_v3  ;;  %v6225_v12 = vpop.f32.mrb[71].mxu1 }
0x2bbe   :  { %v11369_v41 = vadd.f32 %v8311_v3, %v6225_v12 }
0x2bc0   :  { %v9147_v50 = vpop.f32.mrb[72].mxu1  ;;  %v9510_v13 = vpack.c.bf16 %v11367_v11, %v11369_v41 }
0x2bc1   :  { %v6241_v14 = vadd.f32 %v9147_v50, %v8311_v3  ;;  %v6235_v15 = vpop.f32.mrb[73].mxu1 }
0x2bc2   :  { %v6236_v21 = vadd.f32 %v8311_v3, %v6235_v15  ;;  %9511 = vmatpush3.bf16.msra.mxu0 %v9510_v13 }
0x2bc3   :  { %9515 = vmatprep.subr.bf16.mxu0 %v10295_v16 }
0x2bc4   :  { %v9513_v20 = vpack.c.bf16 %v6241_v14, %v6236_v21  ;;  %v11374_v54 = vpack.i.bf16 %v6241_v14, %v6236_v21 }
0x2bc6   :  { %9514 = vmatpush3.bf16.msra.mxu1 %v9513_v20 }
0x2bc7   :  { %9519 = vmatprep.subr.bf16.mxu1 %v10295_v16 }
0x2c8a   :  { %v6398_v23 = vpop.f32.mrb[74].mxu1 }
0x2c8b   :  { %v6399_v26 = vadd.f32 %v11377_v24, %v6398_v23  ;;  %v6319_v22 = vpop.f32.mrb[64].mxu0  ;;  %v9161_v42 = vpop.f32.mrb[75].mxu1 }
0x2c8c   :  { %v6320_v53 = vadd.f32 %v11380_v51, %v6319_v22  ;;  %v9154_v30 = vpop.f32.mrb[65].mxu0 }
0x2c8d   :  { %v6405_v31 = vsel %vm1943_vm4, %v6399_v26, -inf }
0x2c8e   :  { %6406 = vmax.xlane.f32.xlu1 %v6405_v31  ;;  %v6402_v33 = vsel %vm1943_vm4, %v6320_v53, -inf }
0x2c8f   :  { %6403 = vmax.xlane.f32.xlu0 %v6402_v33 }
0x2d1b   :  { %v6407_v62 = vpop.xlane.xlu1 %6406 }
0x2d1c   :  { %v6409_v36 = vsub.f32 %v6399_v26, %v6407_v62  ;;  %v6404_v55 = vpop.xlane.xlu0 %6403 }
0x2d1d   :  { %v6408_v39 = vsub.f32 %v6320_v53, %v6404_v55 }
0x2d1e   :  { %v6412_v44 = vmul.f32 1.442695, %v6409_v36 }
0x2d1f   :  { %v6410_v45 = vmul.f32 1.442695, %v6408_v39 }
0x2d20   :  { %9888 = vpow2.f32 %v6412_v44 }
0x2d21   :  { %9890 = vpow2.f32 %v6410_v45 }
0x2d2a   :  { %v9889_v47 = vpop.eup %9888 }
0x2d2b   :  { %v9891_v9 = vpop.eup %9890  ;;  %v6417_v1 = vsel %vm1943_vm4, %v9889_v47, 0.0 }
0x2d2c   :  { %6418 = vadd.xlane.f32.xlu1 %v6417_v1  ;;  %v6414_v34 = vsel %vm1943_vm4, %v9891_v9, 0.0 }
0x2d2d   :  { %6415 = vadd.xlane.f32.xlu0 %v6414_v34 }
0x2d3d   :  { %9714 = vrot.lane.b32.xlu1 %v11348_v60, %s10290_s9 }
0x2d41   :  { %6570 = vrot.lane.b32.xlu1 %v11356_v40, %s10290_s9 }
0x2d43   :  { %9709 = vrot.lane.b32.xlu0 %v11343_v43, %s10290_s9 }
0x2d45   :  { %6652 = vrot.lane.b32.xlu1 %v11354_v27, %s10290_s9 }
0x2db9   :  { %v6419_v0 = vpop.xlane.xlu1 %6418 }
0x2dba   :  { %9892 = vrcp.f32 %v6419_v0  ;;  %v6416_v52 = vpop.xlane.xlu0 %6415  ;;  %v11440_v0 = vpack.i.bf16 %v11367_v11, %v11369_v41 }
0x2dbb   :  { %9894 = vrcp.f32 %v6416_v52 }
0x2dbd   :  { %v9715_v57 = vpop.permute.xlu1 %9714 }
0x2dbe   :  { %v9710_v58 = vpop.permute.xlu0 %9709  ;;  %v9717_v8 = vunpack.i.h.bf16 %v9715_v57  ;;  %v9716_v28 = vunpack.i.l.bf16 %v9715_v57 }
0x2dbf   :  { %v9712_v49 = vunpack.i.h.bf16 %v9710_v58  ;;  %v9711_v4 = vunpack.i.l.bf16 %v9710_v58 }
0x2dc0   :  { %v9520_v63 = vpack.c.bf16 %v9717_v8, %v9716_v28 }
0x2dc1   :  { %v9516_v5 = vpack.c.bf16 %v9712_v49, %v9711_v4  ;;  %v6571_v2 = vpop.permute.xlu1 %6570 }
0x2dc4   :  { %v9893_v6 = vpop.eup %9892 }
0x2dc5   :  { %v9895_v17 = vpop.eup %9894  ;;  %v11395_v61 = vmul.f32 %v9893_v6, %v9889_v47  ;;  %v6653_v3 = vpop.permute.xlu1 %6652 }
0x2dc6   :  { %v11397_v19 = vmul.f32 %v9895_v17, %v9891_v9 }
0x2dc7   :  { %9174 = vmatmul.mubr.msk.f32.vlgmr.msra.gmra.mrb[76].mxu1 %vm1943_vm4, %v11395_v61 }
0x2dc8   :  { %9522 = vmatpush3.bf16.xpose.msk.msra.mxu1 %vm10839_vm5, %v9520_v63  ;;  %9167 = vmatmul.mubr.msk.f32.vlgmr.msra.gmra.mrb[66].mxu0 %vm1943_vm4, %v11397_v19 }
0x2dc9   :  { %9518 = vmatpush3.bf16.xpose.msk.msra.mxu0 %vm10839_vm5, %v9516_v5  ;;  %9187 = vmatprep.mubr.msk.f32.mxu1 %vm10289_vm1, %v10288_v48 }
0x2dca   :  { %9180 = vmatprep.mubr.msk.f32.mxu0 %vm10289_vm1, %v10288_v48  ;;  %9526 = vmatprep.subr.bf16.mxu1 %v10295_v16 }
0x2dcb   :  { %9523 = vmatprep.subr.bf16.mxu0 %v10295_v16 }
0x2dcf   :  { %9188 = vmatmul.mubr.msk.f32.vlgmr.msra.gmra.mrb[78].mxu1 %vm604_vm2, %v6653_v3 }
0x2dd0   :  { %9181 = vmatmul.mubr.msk.f32.vlgmr.msra.gmra.mrb[68].mxu0 %vm604_vm2, %v6571_v2  ;;  %9201 = vmatprep.mubr.msk.f32.mxu1 %vm10289_vm1, %v10288_v48 }
0x2dd1   :  { %9194 = vmatprep.mubr.msk.f32.mxu0 %vm10289_vm1, %v10288_v48 }
0x2e9a   :  { %v11419_v10 = vpop.f32.mrb[76].mxu1 }
0x2e9b   :  { %v11421_v12 = vpop.f32.mrb[66].mxu0  ;;  %v9175_v50 = vpop.f32.mrb[77].mxu1 }
0x2e9c   :  { %v9168_v13 = vpop.f32.mrb[67].mxu0 }
0x2ea2   :  { %v6730_v14 = vpop.f32.mrb[78].mxu1 }
0x2ea3   :  { %v6731_v15 = vadd.f32 %v11377_v24, %v6730_v14  ;;  %v6648_v21 = vpop.f32.mrb[68].mxu0  ;;  %v9189_v20 = vpop.f32.mrb[79].mxu1 }
0x2ea4   :  { %v6649_v23 = vadd.f32 %v11380_v51, %v6648_v21  ;;  %v9182_v26 = vpop.f32.mrb[69].mxu0 }
0x2ea5   :  { %v6737_v22 = vsel %vm1943_vm4, %v6731_v15, -inf }
0x2ea6   :  { %6738 = vmax.xlane.f32.xlu1 %v6737_v22  ;;  %v6734_v42 = vsel %vm1943_vm4, %v6649_v23, -inf }
0x2ea7   :  { %6735 = vmax.xlane.f32.xlu0 %v6734_v42 }
0x2eb7   :  { %9724 = vrot.lane.b32.xlu1 %v11374_v54, %s10290_s9 }
0x2ebb   :  { %9729 = vrot.lane.b32.xlu1 %v11343_v43, %s10291_s5 }
0x2ebf   :  { %9734 = vrot.lane.b32.xlu1 %v11348_v60, %s10291_s5 }
0x2ec3   :  { %7000 = vrot.lane.b32.xlu1 %v11354_v27, %s10291_s5 }
0x2f33   :  { %v6739_v53 = vpop.xlane.xlu1 %6738 }
0x2f34   :  { %v6741_v30 = vsub.f32 %v6731_v15, %v6739_v53  ;;  %v6736_v31 = vpop.xlane.xlu0 %6735 }
0x2f35   :  { %v6740_v33 = vsub.f32 %v6649_v23, %v6736_v31 }
0x2f36   :  { %v6744_v62 = vmul.f32 1.442695, %v6741_v30 }
0x2f37   :  { %v6742_v36 = vmul.f32 1.442695, %v6740_v33  ;;  %v9725_v55 = vpop.permute.xlu1 %9724 }
0x2f38   :  { %9896 = vpow2.f32 %v6744_v62  ;;  %v9727_v39 = vunpack.i.h.bf16 %v9725_v55  ;;  %v9726_v44 = vunpack.i.l.bf16 %v9725_v55 }
0x2f39   :  { %9898 = vpow2.f32 %v6742_v36 }
0x2f3a   :  { %v9527_v45 = vpack.c.bf16 %v9727_v39, %v9726_v44 }
0x2f3b   :  { %v9730_v52 = vpop.permute.xlu1 %9729 }
0x2f3c   :  { %9528 = vmatpush3.bf16.msra.mxu1 %v9527_v45  ;;  %v9732_v3 = vunpack.i.h.bf16 %v9730_v52  ;;  %v9731_v50 = vunpack.i.l.bf16 %v9730_v52 }
0x2f3d   :  { %9533 = vmatprep.subr.bf16.mxu1 %v10295_v16 }
0x2f3e   :  { %v9530_v14 = vpack.c.bf16 %v9732_v3, %v9731_v50 }
0x2f3f   :  { %v9735_v8 = vpop.permute.xlu1 %9734 }
0x2f40   :  { %v9737_v49 = vunpack.i.h.bf16 %v9735_v8  ;;  %v9736_v4 = vunpack.i.l.bf16 %v9735_v8 }
0x2f42   :  { %v9897_v47 = vpop.eup %9896  ;;  %v9534_v5 = vpack.c.bf16 %v9737_v49, %v9736_v4 }
0x2f43   :  { %v6749_v9 = vsel %vm1943_vm4, %v9897_v47, 0.0  ;;  %v9899_v1 = vpop.eup %9898  ;;  %v7001_v15 = vpop.permute.xlu1 %7000 }
0x2f44   :  { %6750 = vadd.xlane.f32.xlu0 %v6749_v9  ;;  %v6746_v34 = vsel %vm1943_vm4, %v9899_v1, 0.0 }
0x2f48   :  { %6747 = vadd.xlane.f32.xlu0 %v6746_v34 }
0x2f5e   :  { %9719 = vrot.lane.b32.xlu0 %v11440_v0, %s10290_s9 }
0x2f62   :  { %6918 = vrot.lane.b32.xlu0 %v11356_v40, %s10291_s5 }
0x2fd1   :  { %v6751_v57 = vpop.xlane.xlu0 %6750 }
0x2fd2   :  { %9900 = vrcp.f32 %v6751_v57 }
0x2fd5   :  { %v6748_v58 = vpop.xlane.xlu0 %6747 }
0x2fd6   :  { %9902 = vrcp.f32 %v6748_v58 }
0x2fd9   :  { %v9720_v28 = vpop.permute.xlu0 %9719 }
0x2fda   :  { %v9722_v6 = vunpack.i.h.bf16 %v9720_v28  ;;  %v9721_v17 = vunpack.i.l.bf16 %v9720_v28 }
0x2fdc   :  { %v9901_v63 = vpop.eup %9900  ;;  %v9524_v11 = vpack.c.bf16 %v9722_v6, %v9721_v17 }
0x2fdd   :  { %v11446_v41 = vmul.f32 %v9901_v63, %v9897_v47  ;;  %v6919_v21 = vpop.permute.xlu0 %6918 }
0x2fde   :  { %9525 = vmatpush3.bf16.msra.mxu0 %v9524_v11 }
0x2fdf   :  { %9202 = vmatmul.mubr.msk.f32.vlgmr.msra.gmra.mrb[80].mxu1 %vm1943_vm4, %v11446_v41  ;;  %9529 = vmatprep.subr.bf16.mxu0 %v10295_v16 }
0x2fe0   :  { %v9903_v2 = vpop.eup %9902  ;;  %9536 = vmatpush3.bf16.xpose.msk.msra.mxu1 %vm10839_vm5, %v9534_v5  ;;  %9215 = vmatprep.mubr.msk.f32.mxu1 %vm10289_vm1, %v10288_v48 }
0x2fe1   :  { %v11455_v13 = vmul.f32 %v9903_v2, %v9899_v1  ;;  %9540 = vmatprep.subr.bf16.mxu1 %v10295_v16 }
0x2fe3   :  { %9195 = vmatmul.mubr.msk.f32.vlgmr.msra.gmra.mrb[70].mxu0 %vm1943_vm4, %v11455_v13 }
0x2fe4   :  { %9208 = vmatprep.mubr.msk.f32.mxu0 %vm10289_vm1, %v10288_v48 }
0x2fe7   :  { %9216 = vmatmul.mubr.msk.f32.vlgmr.msra.gmra.mrb[82].mxu1 %vm604_vm2, %v7001_v15  ;;  %9532 = vmatpush3.bf16.xpose.msk.msra.mxu0 %vm10839_vm5, %v9530_v14 }
0x2fe8   :  { %9229 = vmatprep.mubr.msk.f32.mxu1 %vm10289_vm1, %v10288_v48  ;;  %9537 = vmatprep.subr.bf16.mxu0 %v10295_v16 }
0x2fee   :  { %9209 = vmatmul.mubr.msk.f32.vlgmr.msra.gmra.mrb[72].mxu0 %vm604_vm2, %v6919_v21 }
0x2fef   :  { %9222 = vmatprep.mubr.msk.f32.mxu0 %vm10289_vm1, %v10288_v48 }
0x30b2   :  { %v11471_v20 = vpop.f32.mrb[80].mxu1 }
0x30b3   :  { %v9203_v23 = vpop.f32.mrb[81].mxu1 }
0x30b6   :  { %v11473_v26 = vpop.f32.mrb[70].mxu0 }
0x30b7   :  { %v9196_v22 = vpop.f32.mrb[71].mxu0 }
0x30ba   :  { %v7078_v42 = vpop.f32.mrb[82].mxu1 }
0x30bb   :  { %v7079_v53 = vadd.f32 %v11377_v24, %v7078_v42  ;;  %v9217_v30 = vpop.f32.mrb[83].mxu1 }
0x30bd   :  { %v7085_v31 = vsel %vm1943_vm4, %v7079_v53, -inf }
0x30be   :  { %7086 = vmax.xlane.f32.xlu1 %v7085_v31 }
0x30c1   :  { %v6996_v33 = vpop.f32.mrb[72].mxu0 }
0x30c2   :  { %v6997_v62 = vadd.f32 %v11380_v51, %v6996_v33  ;;  %v9210_v36 = vpop.f32.mrb[73].mxu0 }
0x30c4   :  { %v7082_v55 = vsel %vm1943_vm4, %v6997_v62, -inf }
0x30c5   :  { %7083 = vmax.xlane.f32.xlu0 %v7082_v55 }
0x30cf   :  { %9744 = vrot.lane.b32.xlu1 %v11374_v54, %s10291_s5 }
0x30d3   :  { %9749 = vrot.lane.b32.xlu1 %v11343_v43, %s10292_s7 }
0x30d7   :  { %9754 = vrot.lane.b32.xlu1 %v11348_v60, %s10292_s7 }
0x30db   :  { %7344 = vrot.lane.b32.xlu1 %v11354_v27, %s10292_s7 }
0x314b   :  { %v7087_v39 = vpop.xlane.xlu1 %7086 }
0x314c   :  { %v7089_v44 = vsub.f32 %v7079_v53, %v7087_v39 }
0x314e   :  { %v7092_v45 = vmul.f32 1.442695, %v7089_v44 }
0x314f   :  { %v9745_v47 = vpop.permute.xlu1 %9744 }
0x3150   :  { %9904 = vpow2.f32 %v7092_v45  ;;  %v9747_v9 = vunpack.i.h.bf16 %v9745_v47  ;;  %v9746_v1 = vunpack.i.l.bf16 %v9745_v47 }
0x3152   :  { %v9541_v34 = vpack.c.bf16 %v9747_v9, %v9746_v1  ;;  %v7084_v52 = vpop.xlane.xlu0 %7083 }
0x3153   :  { %v7088_v57 = vsub.f32 %v6997_v62, %v7084_v52  ;;  %v9750_v28 = vpop.permute.xlu1 %9749 }
0x3154   :  { %9542 = vmatpush3.bf16.msra.mxu1 %v9541_v34  ;;  %v9752_v21 = vunpack.i.h.bf16 %v9750_v28  ;;  %v9751_v23 = vunpack.i.l.bf16 %v9750_v28 }
0x3155   :  { %v7090_v58 = vmul.f32 1.442695, %v7088_v57  ;;  %9547 = vmatprep.subr.bf16.mxu1 %v10295_v16 }
0x3156   :  { %v9544_v53 = vpack.c.bf16 %v9752_v21, %v9751_v23 }
0x3157   :  { %9906 = vpow2.f32 %v7090_v58  ;;  %v9755_v4 = vpop.permute.xlu1 %9754 }
0x3158   :  { %v9757_v17 = vunpack.i.h.bf16 %v9755_v4  ;;  %v9756_v63 = vunpack.i.l.bf16 %v9755_v4 }
0x315a   :  { %v9905_v43 = vpop.eup %9904  ;;  %v9548_v14 = vpack.c.bf16 %v9757_v17, %v9756_v63 }
0x315b   :  { %v7097_v60 = vsel %vm1943_vm4, %v9905_v43, 0.0  ;;  %v7345_v42 = vpop.permute.xlu1 %7344 }
0x315c   :  { %7098 = vadd.xlane.f32.xlu0 %v7097_v60 }
0x3161   :  { %v9907_v27 = vpop.eup %9906 }
0x3162   :  { %v7094_v8 = vsel %vm1943_vm4, %v9907_v27, 0.0 }
0x3163   :  { %7095 = vadd.xlane.f32.xlu0 %v7094_v8 }
0x3179   :  { %9739 = vrot.lane.b32.xlu0 %v11440_v0, %s10291_s5 }
0x317d   :  { %7262 = vrot.lane.b32.xlu0 %v11356_v40, %s10292_s7 }
0x31e9   :  { %v7099_v49 = vpop.xlane.xlu0 %7098 }
0x31ea   :  { %9908 = vrcp.f32 %v7099_v49 }
0x31f0   :  { %v7096_v6 = vpop.xlane.xlu0 %7095 }
0x31f1   :  { %9910 = vrcp.f32 %v7096_v6 }
0x31f4   :  { %v9909_v11 = vpop.eup %9908  ;;  %v9740_v5 = vpop.permute.xlu0 %9739 }
0x31f5   :  { %v11494_v2 = vmul.f32 %v9909_v11, %v9905_v43  ;;  %v9742_v3 = vunpack.i.h.bf16 %v9740_v5  ;;  %v9741_v50 = vunpack.i.l.bf16 %v9740_v5 }
0x31f7   :  { %v9538_v15 = vpack.c.bf16 %v9742_v3, %v9741_v50  ;;  %9230 = vmatmul.mubr.msk.f32.vlgmr.msra.gmra.mrb[84].mxu1 %vm1943_vm4, %v11494_v2  ;;  %v5970_v50 = vld [vmem:[#allocation16 + $0x28] sm:$0xff] }
0x31f8   :  { %9550 = vmatpush3.bf16.xpose.msk.msra.mxu1 %vm10839_vm5, %v9548_v14  ;;  %9243 = vmatprep.mubr.msk.f32.mxu1 %vm10289_vm1, %v10288_v48  ;;  %v7263_v30 = vpop.permute.xlu0 %7262  ;;  %v5971_v14 = vld [vmem:[#allocation16 + $0x30] sm:$0xff] }
0x31f9   :  { %9539 = vmatpush3.bf16.msra.mxu0 %v9538_v15  ;;  %9554 = vmatprep.subr.bf16.mxu1 %v10295_v16 }
0x31fa   :  { %9543 = vmatprep.subr.bf16.mxu0 %v10295_v16 }
0x31fb   :  { %v9911_v40 = vpop.eup %9910 }
0x31fc   :  { %v11504_v22 = vmul.f32 %v9911_v40, %v9907_v27  ;;  %v5972_v40 = vld [vmem:[#allocation16 + $0x38] sm:$0xff] }
0x31fd   :  { %v9561_v21 = vpack.c.bf16 %v5972_v40, %v5971_v14 }
0x31fe   :  { %9223 = vmatmul.mubr.msk.f32.vlgmr.msra.gmra.mrb[74].mxu0 %vm1943_vm4, %v11504_v22 }
0x31ff   :  { %9244 = vmatmul.mubr.msk.f32.vlgmr.msra.gmra.mrb[86].mxu1 %vm604_vm2, %v7345_v42  ;;  %9236 = vmatprep.mubr.msk.f32.mxu0 %vm10289_vm1, %v10288_v48 }
0x3200   :  { %9257 = vmatprep.mubr.msk.f32.mxu1 %vm10289_vm1, %v10288_v48 }
0x3202   :  { %9546 = vmatpush3.bf16.xpose.msk.msra.mxu0 %vm10839_vm5, %v9544_v53 }
0x3203   :  { %9551 = vmatprep.subr.bf16.mxu0 %v10295_v16 }
0x3209   :  { %9237 = vmatmul.mubr.msk.f32.vlgmr.msra.gmra.mrb[76].mxu0 %vm604_vm2, %v7263_v30 }
0x320a   :  { %9250 = vmatprep.mubr.msk.f32.mxu0 %vm10289_vm1, %v10288_v48 }
0x32ca   :  { %v7258_v31 = vpop.f32.mrb[84].mxu1 }
0x32cb   :  { %v9231_v33 = vpop.f32.mrb[85].mxu1 }
0x32d1   :  { %v7179_v62 = vpop.f32.mrb[74].mxu0 }
0x32d2   :  { %v7422_v36 = vpop.f32.mrb[86].mxu1  ;;  %v9224_v55 = vpop.f32.mrb[75].mxu0 }
0x32d3   :  { %v7423_v39 = vadd.f32 %v11377_v24, %v7422_v36  ;;  %v9245_v44 = vpop.f32.mrb[87].mxu1 }
0x32d5   :  { %v7429_v45 = vsel %vm1943_vm4, %v7423_v39, -inf }
0x32d6   :  { %7430 = vmax.xlane.f32.xlu1 %v7429_v45 }
0x32dc   :  { %v7340_v32 = vpop.f32.mrb[76].mxu0 }
0x32dd   :  { %v7341_v16 = vadd.f32 %v11380_v51, %v7340_v32  ;;  %v9238_v47 = vpop.f32.mrb[77].mxu0 }
0x32df   :  { %v7426_v9 = vsel %vm1943_vm4, %v7341_v16, -inf }
0x32e0   :  { %7427 = vmax.xlane.f32.xlu0 %v7426_v9 }
0x32e7   :  { %9764 = vrot.lane.b32.xlu1 %v11374_v54, %s10292_s7 }
0x32eb   :  { %7608 = vrot.lane.b32.xlu1 %v11473_v26, %s10279_s28 }
0x32ef   :  { %7610 = vrot.lane.b32.xlu1 %v11471_v20, %s10279_s28 }
0x32f3   :  { %7618 = vrot.lane.b32.xlu1 %v7258_v31, %s10293_s10 }
0x3363   :  { %v7431_v48 = vpop.xlane.xlu1 %7430 }
0x3364   :  { %v7433_v24 = vsub.f32 %v7423_v39, %v7431_v48  ;;  %v8348_v48 = vld [vmem:[%s11716_s27 + $0x1] ss:$0 sm:$0xff] }
0x3366   :  { %v7436_v1 = vmul.f32 1.442695, %v7433_v24 }
0x3367   :  { %v9765_v34 = vpop.permute.xlu1 %9764 }
0x3368   :  { %9912 = vpow2.f32 %v7436_v1  ;;  %v9767_v51 = vunpack.i.h.bf16 %v9765_v34  ;;  %v9766_v52 = vunpack.i.l.bf16 %v9765_v34 }
0x336a   :  { %v9555_v57 = vpack.c.bf16 %v9767_v51, %v9766_v52 }
0x336b   :  { %v7609_v31 = vpop.permute.xlu1 %7608 }
0x336c   :  { %9556 = vmatpush3.bf16.msra.mxu1 %v9555_v57  ;;  %v7630_v55 = vsel %vm604_vm2, %v11421_v12, %v7609_v31 }
0x336d   :  { %v7428_v58 = vpop.xlane.xlu0 %7427 }
0x336e   :  { %v7432_v43 = vsub.f32 %v7341_v16, %v7428_v58 }
0x336f   :  { %v7611_v33 = vpop.permute.xlu1 %7610 }
0x3370   :  { %v7434_v54 = vmul.f32 1.442695, %v7432_v43  ;;  %v7631_v44 = vsel %vm604_vm2, %v11419_v10, %v7611_v33 }
0x3372   :  { %v9913_v60 = vpop.eup %9912  ;;  %9914 = vpow2.f32 %v7434_v54 }
0x3373   :  { %v7441_v26 = vsel %vm1943_vm4, %v9913_v60, 0.0 }
0x3374   :  { %7442 = vadd.xlane.f32.xlu0 %v7441_v26 }
0x337c   :  { %v9915_v20 = vpop.eup %9914 }
0x337d   :  { %v7438_v27 = vsel %vm1943_vm4, %v9915_v20, 0.0 }
0x337e   :  { %7439 = vadd.xlane.f32.xlu0 %v7438_v27 }
0x3394   :  { %9759 = vrot.lane.b32.xlu0 %v11440_v0, %s10292_s7  ;;  %v5969_v0 = vld [vmem:[#allocation16 + $0x20] sm:$0xff] }
0x3395   :  { %v9557_v15 = vpack.c.bf16 %v5970_v50, %v5969_v0 }
0x3398   :  { %7616 = vrot.lane.b32.xlu0 %v7179_v62, %s10293_s10  ;;  %v7619_v62 = vpop.permute.xlu1 %7618 }
0x3399   :  { %v7633_v16 = vsel %vm1943_vm4, %v7631_v44, %v7619_v62  ;;  %v8360_v44 = vld [vmem:[%s11719_s23 + $0x48] sm:$0xff] }
0x3401   :  { %v7443_v8 = vpop.xlane.xlu0 %7442 }
0x3402   :  { %9916 = vrcp.f32 %v7443_v8 }
0x340b   :  { %v7440_v28 = vpop.xlane.xlu0 %7439 }
0x340c   :  { %v9917_v49 = vpop.eup %9916  ;;  %9918 = vrcp.f32 %v7440_v28  ;;  %v7799_v28 = vld [vmem:[#allocation17 + $0x20] sm:$0xff] }
0x340d   :  { %v11535_v4 = vmul.f32 %v9917_v49, %v9913_v60  ;;  %v7800_v49 = vld [vmem:[#allocation17 + $0x28] sm:$0xff] }
0x340f   :  { %9258 = vmatmul.mubr.msk.f32.vlgmr.msra.gmra.mrb[88].mxu1 %vm1943_vm4, %v11535_v4  ;;  %v9760_v6 = vpop.permute.xlu0 %9759 }
0x3410   :  { %v9762_v17 = vunpack.i.h.bf16 %v9760_v6  ;;  %v9761_v63 = vunpack.i.l.bf16 %v9760_v6  ;;  %v9565_v6 = vpack.c.bf16 %v7800_v49, %v7799_v28 }
0x3412   :  { %v9552_v11 = vpack.c.bf16 %v9762_v17, %v9761_v63  ;;  %9566 = vmatprep.subr.bf16.mxu1 %v9565_v6  ;;  %v7801_v17 = vld [vmem:[#allocation17 + $0x30] sm:$0xff]  ;;  %v7802_v63 = vld [vmem:[#allocation17 + $0x38] sm:$0xff] }
0x3413   :  { %v7617_v36 = vpop.permute.xlu0 %7616  ;;  %9568 = vmatpush3.bf16.msra.mxu1 %v9565_v6 }
0x3414   :  { %9553 = vmatpush3.bf16.msra.mxu0 %v9552_v11  ;;  %v7632_v45 = vsel %vm1943_vm4, %v7630_v55, %v7617_v36  ;;  %v9569_v11 = vpack.c.bf16 %v7802_v63, %v7801_v17 }
0x3415   :  { %9558 = vmatprep.subr.bf16.mxu0 %v9557_v15 }
0x3416   :  { %v9919_v5 = vpop.eup %9918  ;;  %9570 = vmatprep.subr.bf16.mxu1 %v9569_v11 }
0x3417   :  { %v11539_v3 = vmul.f32 %v9919_v5, %v9915_v20  ;;  %9572 = vmatpush3.bf16.msra.mxu1 %v9569_v11 }
0x3419   :  { %9251 = vmatmul.mubr.msk.f32.vlgmr.msra.gmra.mrb[78].mxu0 %vm1943_vm4, %v11539_v3 }
0x341a   :  { %9560 = vmatpush3.bf16.msra.mxu0 %v9557_v15 }
0x341b   :  { %9562 = vmatprep.subr.bf16.mxu0 %v9561_v21 }
0x341e   :  { %9564 = vmatpush3.bf16.msra.mxu0 %v9561_v21 }
0x34e2   :  { %v7602_v23 = vpop.f32.mrb[88].mxu1 }
0x34e3   :  { %7626 = vrot.lane.b32.xlu1 %v7602_v23, %s10294_s11  ;;  %v9259_v42 = vpop.f32.mrb[89].mxu1  ;;  %v8353_v23 = vld [vmem:[%s11717_s22 + $0x1] ss:$0 sm:$0xff] }
0x34ec   :  { %v7523_v53 = vpop.f32.mrb[78].mxu0 }
0x34ed   :  { %7624 = vrot.lane.b32.xlu0 %v7523_v53, %s10294_s11  ;;  %v9252_v30 = vpop.f32.mrb[79].mxu0  ;;  %v8354_v53 = vld [vmem:[%s11718_s0 + $0x1] ss:$0 sm:$0xff] }
0x3555   :  { %v7627_v39 = vpop.permute.xlu1 %7626 }
0x3556   :  { %v7635_v9 = vsel %vm1946_vm3, %v7633_v16, %v7627_v39  ;;  %v8359_v39 = vld [vmem:[%s11719_s23 + $0x40] sm:$0xff]  ;;  %v8362_v16 = vld [vmem:[%s11719_s23 + $0x58] sm:$0xff] }
0x355f   :  { %v7625_v32 = vpop.permute.xlu0 %7624 }
0x3560   :  { %v7634_v47 = vsel %vm1946_vm3, %v7632_v45, %v7625_v32  ;;  %v8361_v45 = vld [vmem:[%s11719_s23 + $0x50] sm:$0xff]  ;;  %v9573_v32 = vpack.c.bf16 %v8360_v44, %v8359_v39 }
0x3561   :  { %9268 = vmatprep.mubr.msk.f32.mxu0 %vm289_vm0, %v7634_v47  ;;  %v9577_v47 = vpack.c.bf16 %v8362_v16, %v8361_v45 }
0x3562   :  { %9269 = vmatmul.mubr.msk.f32.vlgmr.msra.gmra.mrb[80].mxu0 %vm289_vm0, %v7635_v9  ;;  %v8363_v9 = vld [vmem:[%s11719_s23 + $0x60] sm:$0xff]  ;;  %9574 = vmatprep.subr.bf16.mxu0 %v9573_v32 }
0x3563   :  { %9576 = vmatpush3.bf16.msra.mxu0 %v9573_v32 }
0x3564   :  { %9578 = vmatprep.subr.bf16.mxu0 %v9577_v47 }
0x3567   :  { %9580 = vmatpush3.bf16.msra.mxu0 %v9577_v47 }
0x3635   :  { %v9270_v24 = vpop.f32.mrb[80].mxu0 }
0x3636   :  { %v7720_v12 = vadd.f32 %v9270_v24, %v8348_v48  ;;  %v7714_v1 = vpop.f32.mrb[81].mxu0 }
0x3637   :  { %v7715_v34 = vadd.f32 %v8348_v48, %v7714_v1  ;;  %v8364_v48 = vld [vmem:[%s11719_s23 + $0x68] sm:$0xff]  ;;  %v8366_v1 = vld [vmem:[%s11719_s23 + $0x78] sm:$0xff] }
0x3638   :  { %v11557_v10 = vadd.f32 %v7720_v12, %v11311_v7  ;;  %v9581_v24 = vpack.c.bf16 %v8364_v48, %v8363_v9  ;;  %v8365_v12 = vld [vmem:[%s11719_s23 + $0x70] sm:$0xff] }
0x3639   :  { %v11560_v51 = vadd.f32 %v7715_v34, %v11314_v38  ;;  %v9585_v34 = vpack.c.bf16 %v8366_v1, %v8365_v12 }
0x363a   :  { %v7759_v52 = vsel %vm289_vm0, %v11557_v10, 0.0  ;;  %9582 = vmatprep.subr.bf16.mxu0 %v9581_v24 }
0x363b   :  { %7760 = vadd.xlane.f32.xlu1 %v7759_v52  ;;  %v7756_v57 = vsel %vm289_vm0, %v11560_v51, 0.0  ;;  %9584 = vmatpush3.bf16.msra.mxu0 %v9581_v24  ;;  %v8356_v52 = vld [vmem:[%s11720_s12 + $0x1] ss:$0 sm:$0xff] }
0x363c   :  { %7757 = vadd.xlane.f32.xlu0 %v7756_v57  ;;  %9586 = vmatprep.subr.bf16.mxu0 %v9585_v34 }
0x363f   :  { %9588 = vmatpush3.bf16.msra.mxu0 %v9585_v34 }
0x36c8   :  { %v7761_v58 = vpop.xlane.xlu1 %7760 }
0x36c9   :  { %v7763_v43 = vmul.f32 0.03125, %v7761_v58  ;;  %v7758_v54 = vpop.xlane.xlu0 %7757 }
0x36ca   :  { %v7762_v60 = vmul.f32 0.03125, %v7758_v54 }
0x36cb   :  { %v7765_v26 = vsub.f32 %v11557_v10, %v7763_v43 }
0x36cc   :  { %v7764_v7 = vsub.f32 %v11560_v51, %v7762_v60 }
0x36cd   :  { %v7767_v27 = vmul.f32 %v7765_v26, %v7765_v26 }
0x36ce   :  { %v7766_v20 = vmul.f32 %v7764_v7, %v7764_v7 }
0x36cf   :  { %v7771_v8 = vsel %vm289_vm0, %v7767_v27, 0.0 }
0x36d0   :  { %v7768_v38 = vsel %vm289_vm0, %v7766_v20, 0.0 }
0x36d1   :  { %7769 = vadd.xlane.f32.xlu0 %v7768_v38 }
0x36d5   :  { %7772 = vadd.xlane.f32.xlu0 %v7771_v8 }
0x375e   :  { %v7770_v5 = vpop.xlane.xlu0 %7769 }
0x375f   :  { %v7774_v0 = vmul.f32 0.03125, %v7770_v5 }
0x3761   :  { %v7776_v50 = vadd.f32 1e-06, %v7774_v0 }
0x3762   :  { %v7773_v14 = vpop.xlane.xlu0 %7772 }
0x3763   :  { %9920 = vrsqrt.f32 %v7776_v50  ;;  %v7775_v15 = vmul.f32 0.03125, %v7773_v14 }
0x3765   :  { %v7777_v40 = vadd.f32 1e-06, %v7775_v15 }
0x3767   :  { %9922 = vrsqrt.f32 %v7777_v40  ;;  %v8368_v40 = vld [vmem:[%s11721_s1 + $0x1] ss:$0 sm:$0xff] }
0x376d   :  { %v9921_v21 = vpop.eup %9920 }
0x376e   :  { %v7780_v42 = vmul.f32 %v9921_v21, %v7764_v7 }
0x3770   :  { %v7788_v30 = vmul.f32 %v8353_v23, %v7780_v42 }
0x3771   :  { %v9923_v31 = vpop.eup %9922 }
0x3772   :  { %v7781_v33 = vmul.f32 %v9923_v31, %v7765_v26  ;;  %v7796_v62 = vadd.f32 %v8354_v53, %v7788_v30 }
0x3774   :  { %v7789_v36 = vmul.f32 %v8353_v23, %v7781_v33  ;;  %9279 = vmatprep.mubr.msk.f32.mxu1 %vm289_vm0, %v7796_v62 }
0x3776   :  { %v7797_v55 = vadd.f32 %v8354_v53, %v7789_v36 }
0x3778   :  { %9280 = vmatmul.mubr.msk.f32.vlgmr.msra.gmra.mrb[90].mxu1 %vm289_vm0, %v7797_v55 }
0x384b   :  { %v9281_v57 = vpop.f32.mrb[90].mxu1 }
0x384c   :  { %v7889_v58 = vadd.f32 %v9281_v57, %v8356_v52  ;;  %v7883_v43 = vpop.f32.mrb[91].mxu1 }
0x384d   :  { %v7884_v54 = vadd.f32 %v8356_v52, %v7883_v43 }
0x384e   :  { %v7895_v60 = vmul.f32 0.044715, %v7889_v58  ;;  %v7893_v50 = vmul.f32 0.5, %v7889_v58 }
0x384f   :  { %v7894_v26 = vmul.f32 0.044715, %v7884_v54  ;;  %v7892_v5 = vmul.f32 0.5, %v7884_v54 }
0x3850   :  { %v7897_v7 = vmul.f32 %v7895_v60, %v7889_v58 }
0x3851   :  { %v7896_v20 = vmul.f32 %v7894_v26, %v7884_v54 }
0x3852   :  { %v7899_v38 = vmul.f32 %v7897_v7, %v7889_v58 }
0x3853   :  { %v7898_v27 = vmul.f32 %v7896_v20, %v7884_v54 }
0x3854   :  { %v7901_v8 = vadd.f32 %v7899_v38, %v7889_v58 }
0x3855   :  { %v7900_v28 = vadd.f32 %v7898_v27, %v7884_v54 }
0x3856   :  { %v7903_v49 = vmul.f32 0.7978846, %v7901_v8 }
0x3857   :  { %v7902_v6 = vmul.f32 0.7978846, %v7900_v28 }
0x3858   :  { %9924 = vtanh.f32 %v7903_v49 }
0x3859   :  { %9926 = vtanh.f32 %v7902_v6 }
0x3862   :  { %v9925_v17 = vpop.eup %9924 }
0x3863   :  { %v9927_v63 = vpop.eup %9926  ;;  %v7907_v11 = vadd.f32 1.0, %v9925_v17 }
0x3864   :  { %v7906_v0 = vadd.f32 1.0, %v9927_v63 }
0x3865   :  { %v7909_v15 = vmul.f32 %v7907_v11, %v7893_v50 }
0x3866   :  { %v7908_v14 = vmul.f32 %v7906_v0, %v7892_v5 }
0x3868   :  { %9298 = vmatprep.mubr.msk.f32.mxu0 %vm3887_vm6, %v7908_v14 }
0x3869   :  { %9299 = vmatmul.mubr.msk.f32.vlgmr.msra.gmra.mrb[82].mxu0 %vm3887_vm6, %v7909_v15 }
0x393c   :  { %v9300_v21 = vpop.f32.mrb[82].mxu0 }
0x393d   :  { %v8005_v23 = vadd.f32 %v9300_v21, %v8368_v40  ;;  %v7999_v42 = vpop.f32.mrb[83].mxu0 }
0x393e   :  { %v8000_v53 = vadd.f32 %v8368_v40, %v7999_v42 }
0x393f   :  { %v8009_v30 = vadd.f32 %v8005_v23, %v11557_v10 }
0x3940   :  { %v8008_v31 = vadd.f32 %v8000_v53, %v11560_v51 }
0x3941   :  { %v8015_v33 = vsel %vm289_vm0, %v8009_v30, 0.0 }
0x3942   :  { %8016 = vadd.xlane.f32.xlu1 %v8015_v33  ;;  %v8012_v62 = vsel %vm289_vm0, %v8008_v31, 0.0 }
0x3943   :  { %8013 = vadd.xlane.f32.xlu0 %v8012_v62 }
0x3953   :  { %3864 = vrot.lane.b32.xlu1 %v10946_v56, %s10293_s10 }
0x3957   :  { %7723 = vrot.lane.b32.xlu1 %v11455_v13, %s10293_s10 }
0x3959   :  { %3862 = vrot.lane.b32.xlu0 %v10955_v59, %s10293_s10 }
0x395b   :  { %7725 = vrot.lane.b32.xlu1 %v11446_v41, %s10293_s10 }
0x395d   :  { %3868 = vrot.lane.b32.xlu0 %v11004_v29, %s10296_s21 }
0x395f   :  { %3870 = vrot.lane.b32.xlu1 %v10994_v25, %s10296_s21 }
0x3961   :  { %7729 = vrot.lane.b32.xlu0 %v11504_v22, %s10296_s21 }
0x3963   :  { %7731 = vrot.lane.b32.xlu1 %v11494_v2, %s10296_s21 }
0x39cf   :  { %v8017_v10 = vpop.xlane.xlu1 %8016 }
0x39d0   :  { %v8019_v56 = vmul.f32 0.03125, %v8017_v10  ;;  %v8014_v51 = vpop.xlane.xlu0 %8013 }
0x39d1   :  { %v8018_v36 = vmul.f32 0.03125, %v8014_v51 }
0x39d2   :  { %v11602_v13 = vsub.f32 %v8009_v30, %v8019_v56 }
0x39d3   :  { %v11604_v55 = vsub.f32 %v8008_v31, %v8018_v36  ;;  %v3865_v2 = vpop.permute.xlu1 %3864 }
0x39d4   :  { %v8023_v59 = vmul.f32 %v11602_v13, %v11602_v13  ;;  %v3863_v44 = vpop.permute.xlu0 %3862 }
0x39d5   :  { %v8022_v29 = vmul.f32 %v11604_v55, %v11604_v55 }
0x39d6   :  { %v8027_v25 = vsel %vm289_vm0, %v8023_v59, 0.0 }
0x39d7   :  { %8028 = vadd.xlane.f32.xlu1 %v8027_v25  ;;  %v8024_v41 = vsel %vm289_vm0, %v8022_v29, 0.0  ;;  %v7724_v22 = vpop.permute.xlu1 %7723 }
0x39d8   :  { %8025 = vadd.xlane.f32.xlu0 %v8024_v41  ;;  %v3869_v32 = vpop.permute.xlu0 %3868 }
0x39db   :  { %v7726_v39 = vpop.permute.xlu1 %7725 }
0x39dc   :  { %v7730_v47 = vpop.permute.xlu0 %7729 }
0x39df   :  { %v3871_v45 = vpop.permute.xlu1 %3870 }
0x39e3   :  { %v7732_v16 = vpop.permute.xlu1 %7731 }
0x39e8   :  { %3876 = vrot.lane.b32.xlu1 %v11035_v46, %s10297_s29  ;;  %v3881_v46 = vsel %vm1943_vm4, %v10895_v35, %v3865_v2  ;;  %v7742_v35 = vsel %vm1943_vm4, %v11395_v61, %v7726_v39 }
0x39e9   :  { %v7744_v54 = vsel %vm289_vm0, %v7742_v35, %v7732_v16 }
0x39ec   :  { %7737 = vrot.lane.b32.xlu1 %v11535_v4, %s10297_s29 }
0x39ee   :  { %3874 = vrot.lane.b32.xlu0 %v11039_v18, %s10297_s29  ;;  %v3880_v18 = vsel %vm1943_vm4, %v10897_v37, %v3863_v44  ;;  %v7741_v37 = vsel %vm1943_vm4, %v11397_v19, %v7724_v22 }
0x39ef   :  { %v3882_v52 = vsel %vm289_vm0, %v3880_v18, %v3869_v32  ;;  %v7743_v26 = vsel %vm289_vm0, %v7741_v37, %v7730_v47 }
0x39f2   :  { %7735 = vrot.lane.b32.xlu0 %v11539_v3, %s10297_s29  ;;  %v3883_v3 = vsel %vm289_vm0, %v3881_v46, %v3871_v45 }
0x3a64   :  { %v8029_v9 = vpop.xlane.xlu1 %8028 }
0x3a65   :  { %v8031_v48 = vmul.f32 0.03125, %v8029_v9  ;;  %v8026_v24 = vpop.xlane.xlu0 %8025 }
0x3a66   :  { %v8030_v12 = vmul.f32 0.03125, %v8026_v24 }
0x3a67   :  { %v8033_v4 = vadd.f32 1e-06, %v8031_v48 }
0x3a68   :  { %v8032_v1 = vadd.f32 1e-06, %v8030_v12  ;;  %v3877_v34 = vpop.permute.xlu1 %3876 }
0x3a69   :  { %9928 = vrsqrt.f32 %v8033_v4  ;;  %v3886_v57 = vsel %vm3884_vm7, %v3883_v3, %v3877_v34  ;;  %v3875_v58 = vpop.permute.xlu0 %3874 }
0x3a6a   :  { %9930 = vrsqrt.f32 %v8032_v1  ;;  %3889 = vst.msk [vmem:[#allocation20 + $0x8] sm:$0xff] %vm3887_vm6, %v3886_v57  ;;  %v3885_v43 = vsel %vm3884_vm7, %v3882_v52, %v3875_v58 }
0x3a6b   :  { %3888 = vst.msk [vmem:[#allocation20] sm:$0xff] %vm3887_vm6, %v3885_v43 }
0x3a6c   :  { %v7738_v60 = vpop.permute.xlu1 %7737 }
0x3a6d   :  { %v7746_v7 = vsel %vm3884_vm7, %v7744_v54, %v7738_v60  ;;  %v7736_v20 = vpop.permute.xlu0 %7735 }
0x3a6e   :  { %7749 = vst.msk [vmem:[#allocation20 + $0x18] sm:$0xff] %vm3887_vm6, %v7746_v7  ;;  %v7745_v61 = vsel %vm3884_vm7, %v7743_v26, %v7736_v20 }
0x3a6f   :  { %7748 = vst.msk [vmem:[#allocation20 + $0x10] sm:$0xff] %vm3887_vm6, %v7745_v61 }
0x3a70   :  { %10171 = shalt.err (!%p10168_p0)
}
0x3a71   :  { %s10172_s6 = scalar_lea.hbm %s10474_s4, 512 }
0x3a72   :  { %p10173_p1 = scmp.ne.s32.totalorder %s10474_s4, %s10172_s6  ;;  %p10176_p2 = scmp.lt.u32.totalorder %s10172_s6, %s10474_s4 }
0x3a74   :  { %p10178_p3 = pnand %p10176_p2, %p10173_p1 }
0x3a76   :  { %10181 = shalt.err (!%p10178_p3)
}
0x3a77   :  { %8079 = dma.vmem_to_hbm [thread:$0]  %s8074_s19, 512, %s10474_s4, [#allocation21], %s10278_s26, %s10278_s26, %s10279_s28  }
0x3a78   :  { %s10182_s9 = scalar_lea.vmem %s11635_s24, 512  ;;  %p10187_p5 = scmp.lt.s32.totalorder %s11635_s24, %s11635_s24 }
0x3a79   :  { %p10183_p4 = scmp.ne.s32.totalorder %s11635_s24, %s10182_s9  ;;  %p10188_p6 = scmp.lt.s32.totalorder %s10182_s9, %s10182_s9 }
0x3a7b   :  { %p10189_p7 = por %p10188_p6, %p10187_p5 }
0x3a7d   :  { %p10190_p8 = pnand %p10189_p7, %p10183_p4 }
0x3a7f   :  { %10193 = shalt.err (!%p10190_p8)
}
0x3a80   :  { %s10194_s5 = scalar_lea.hbm %s10479_s25, 512 }
0x3a81   :  { %p10195_p9 = scmp.ne.s32.totalorder %s10479_s25, %s10194_s5  ;;  %p10198_p10 = scmp.lt.u32.totalorder %s10194_s5, %s10479_s25 }
0x3a83   :  { %p10200_p11 = pnand %p10198_p10, %p10195_p9 }
0x3a85   :  { %10203 = shalt.err (!%p10200_p11)
}
0x3a86   :  { %s11722_s4 = sld [smem:[#allocation47_spill]]  ;;  %v9929_v19 = vpop.eup %9928  ;;  %v8372_v28 = vld [vmem:[%s10464_s20] ss:$0 sm:$0xff]  ;;  %s10300_s7 = smov [#allocation19]  }
0x3a87   :  { %8091 = dma.vmem_to_hbm [thread:$0]  %s11635_s24, 512, %s10479_s25, [#allocation21], %s10278_s26, %s10278_s26, %s10279_s28   ;;  %v9931_v27 = vpop.eup %9930  ;;  %v8037_v8 = vmul.f32 %v9929_v19, %v11602_v13 }
0x3a88   :  { %v8036_v49 = vmul.f32 %v9931_v27, %v11604_v55  ;;  %s8061_s10 = sshll.u32 %s10300_s7, 4  ;;  %s8062_s10 = int_to_ptr.vmem [resolvable:$true] %s8061_s10 }
0x3a89   :  { %s10204_s25 = scalar_lea.vmem %s8062_s10, 256  ;;  %p10209_p13 = scmp.lt.s32.totalorder %s8062_s10, %s8062_s10 }
0x3a8a   :  { %p10205_p12 = scmp.ne.s32.totalorder %s8062_s10, %s10204_s25  ;;  %p10210_p0 = scmp.lt.s32.totalorder %s10204_s25, %s10204_s25 }
0x3a8c   :  { %v8371_v38 = vld [vmem:[%s11722_s4] ss:$0 sm:$0xff]  ;;  %p10211_p1 = por %p10210_p0, %p10209_p13 }
0x3a8d   :  { %v8045_v6 = vmul.f32 %v8371_v38, %v8037_v8  ;;  %v8044_v17 = vmul.f32 %v8371_v38, %v8036_v49 }
0x3a8e   :  { %p10212_p2 = pnand %p10211_p1, %p10205_p12 }
0x3a8f   :  { %v8053_v63 = vadd.f32 %v8372_v28, %v8045_v6  ;;  %v8052_v11 = vadd.f32 %v8372_v28, %v8044_v17 }
0x3a91   :  { %8055 = vst.msk [vmem:[#allocation19 + $0x8] sm:$0xff] %vm289_vm0, %v8053_v63  ;;  %8054 = vst.msk [vmem:[#allocation19] sm:$0xff] %vm289_vm0, %v8052_v11 }
0x3a92   :  { %10215 = shalt.err (!%p10212_p2)
}
0x3a93   :  { %s10216_s20 = scalar_lea.hbm %s10469_s14, 256 }
0x3a94   :  { %p10217_p3 = scmp.ne.s32.totalorder %s10469_s14, %s10216_s20  ;;  %p10220_p4 = scmp.lt.u32.totalorder %s10216_s20, %s10469_s14 }
0x3a96   :  { %p10222_p5 = pnand %p10220_p4, %p10217_p3 }
0x3a98   :  { %10225 = shalt.err (!%p10222_p5)
}
0x3a99   :  { %8067 = dma.vmem_to_hbm [thread:$0]  %s8062_s10, 256, %s10469_s14, [#allocation4], %s10278_s26, %s10278_s26, %s10279_s28  }
0x3a9a   :  { %10238 = dma.done.wait [#allocation4], 256  }
0x3a9b   :  { %10239 = vsyncadd [#allocation4], 4294967040 }
0x3a9c   :  { %10240 = dma.done.wait [#allocation21], 1024  }
0x3a9d   :  { %10241 = vsyncadd [#allocation21], 4294966272 }
0x3a9e   :  { %8101 = vsyncpa [#allocation3], 1 }
0x3a9f   :  { %8102 = vsyncpa [#allocation6], 1 }
0x3aa0   :  { %8103 = vsyncpa [#allocation9], 1 }
0x3aa1   :  { %8104 = vsyncpa [#allocation12], 1 }
0x3aa2   :  { %8105 = vsyncpa [#allocation15], 1 }
0x3aa3   :  { %8106 = vsyncpa [#allocation18], 1 }
0x3aa4   :  { %8107 = vsyncpa [#allocation4], 1 }
0x3aa5   :  { %8108 = vsyncpa [#allocation21], 1 }

</bundles_post_ra>
